<compile_context>
chip_gen: v6e
topology: v6e:2x2x1
jax: 0.10.0
libtpu: 0.0.40
codegen_flags: <defaults>
</compile_context>

<pallas_src>
import functools

import jax
import jax.numpy as jnp
from jax.experimental import pallas as pl
from jax.experimental.pallas import tpu as pltpu

NUM_CLASSES = 8
LSTM_HIDDEN = 64
CNN_OUT = 32


def _round_up(v, m):
    return ((v + m - 1) // m) * m


def _vmem_limit(block_bytes):
    # 2x for double-buffered operands + headroom, capped for v7x's 64 MiB VMEM.
    return int(min(2 * block_bytes + (8 << 20), 64 << 20))


# ----------------------------------------------------------------------------
# Branch-batched fused matmul:  y = act((x @ w) * scale + bias)
# x: (NB, M, K) bf16, w: (NB, K, N) bf16, scale/bias: (NB, 1, N) f32.
# Grid = (branch, row-tile); used for conv-as-im2col (folded BN) and for the
# hoisted LSTM input projections.
# ----------------------------------------------------------------------------
def _make_branch_linear_kernel(act, use_scale):
    def kernel(*refs):
        if use_scale:
            x_ref, w_ref, s_ref, b_ref, o_ref = refs
        else:
            x_ref, w_ref, b_ref, o_ref = refs
            s_ref = None
        y = jnp.dot(x_ref[...], w_ref[...], preferred_element_type=jnp.float32)
        if use_scale:
            y = y * s_ref[...]
        y = y + b_ref[...]
        if act == "relu":
            y = jnp.maximum(y, 0.0)
        elif act == "tanh":
            y = jnp.tanh(y)
        o_ref[...] = y.astype(o_ref.dtype)

    return kernel


def branch_linear(x, w, bias, scale=None, act="none", out_dtype=jnp.float32):
    NB, M, K = x.shape
    N = w.shape[-1]
    tm = min(256, _round_up(M, 8))
    Mp = _round_up(M, tm)
    if Mp != M:
        x = jnp.pad(x, ((0, 0), (0, Mp - M), (0, 0)))
    use_scale = scale is not None

    in_specs = [
        pl.BlockSpec((None, tm, K), lambda n, i: (n, i, 0)),
        pl.BlockSpec((None, K, N), lambda n, i: (n, 0, 0)),
    ]
    args = [x, w]
    if use_scale:
        in_specs.append(pl.BlockSpec((None, 1, N), lambda n, i: (n, 0, 0)))
        args.append(scale)
    in_specs.append(pl.BlockSpec((None, 1, N), lambda n, i: (n, 0, 0)))
    args.append(bias)

    blk = (tm * K * x.dtype.itemsize + K * N * w.dtype.itemsize
           + tm * N * jnp.dtype(out_dtype).itemsize + 2 * N * 4)
    out = pl.pallas_call(
        _make_branch_linear_kernel(act, use_scale),
        out_shape=jax.ShapeDtypeStruct((NB, Mp, N), out_dtype),
        grid=(NB, Mp // tm),
        in_specs=in_specs,
        out_specs=pl.BlockSpec((None, tm, N), lambda n, i: (n, i, 0)),
        compiler_params=pltpu.CompilerParams(
            dimension_semantics=("parallel", "parallel"),
            vmem_limit_bytes=_vmem_limit(blk)),
    )(*args)
    if Mp != M:
        out = out[:, :M, :]
    return out


# ----------------------------------------------------------------------------
# AdaptiveAvgPool2d((1, None)): mean over the frequency axis.
# (NB, B, F, T, C) bf16 -> (NB, B, T, C) f32, grid over (branch, batch).
# ----------------------------------------------------------------------------
def _freq_pool_kernel(x_ref, o_ref):
    o_ref[...] = jnp.mean(x_ref[...].astype(jnp.float32), axis=0)


def freq_pool(h):
    NB, B, F, T, C = h.shape
    blk = F * T * C * h.dtype.itemsize + T * C * 4
    return pl.pallas_call(
        _freq_pool_kernel,
        out_shape=jax.ShapeDtypeStruct((NB, B, T, C), jnp.float32),
        grid=(NB, B),
        in_specs=[pl.BlockSpec((None, None, F, T, C),
                               lambda n, b: (n, b, 0, 0, 0))],
        out_specs=pl.BlockSpec((None, None, T, C), lambda n, b: (n, b, 0, 0)),
        compiler_params=pltpu.CompilerParams(
            dimension_semantics=("parallel", "parallel"),
            vmem_limit_bytes=_vmem_limit(blk)),
    )(h)


# ----------------------------------------------------------------------------
# Bidirectional LSTM recurrence (PyTorch gate order i,f,g,o), zero init state.
# Input gx = x @ Wih_packed + b_packed is precomputed (branch_linear).
# Packed lane layout:  hidden/cell   = [fwd(64) | bwd(64)]            (128 lanes)
#                      gates (8H)    = [i_f i_b f_f f_b g_f g_b o_f o_b]
# Whh_packed (2H, 8H) is block-diagonal so one (B,128)x(128,512) matmul updates
# both directions; fwd walks t = 0..T-1 while bwd walks T-1..0 in the same loop.
# Output per branch: (T, B, 2H) with [fwd | bwd] concatenated on features.
# ----------------------------------------------------------------------------
def _lstm_recurrence_kernel(gx_ref, whh_ref, o_ref):
    Tn, Bn, G = gx_ref.shape
    HH = whh_ref.shape[0]          # 2H = 128
    H = HH // 2
    whh = whh_ref[...]             # hoisted, bf16

    gate_lane = jax.lax.broadcasted_iota(jnp.int32, (Bn, G), 1)
    fwd_gate = (gate_lane % HH) < H              # fwd sub-lanes of each gate
    out_lane = jax.lax.broadcasted_iota(jnp.int32, (Bn, HH), 1)
    fwd_half = out_lane < H                      # fwd half of the hidden vector

    def step(t, carry):
        h_cat, c_cat = carry
        rt = Tn - 1 - t
        # fwd gate inputs from time t, bwd gate inputs from time T-1-t
        gx_t = jnp.where(fwd_gate, gx_ref[t], gx_ref[rt])
        gates = gx_t + jnp.dot(h_cat.astype(jnp.bfloat16), whh,
                               preferred_element_type=jnp.float32)
        i_g = jax.nn.sigmoid(gates[:, 0:HH])
        f_g = jax.nn.sigmoid(gates[:, HH:2 * HH])
        g_g = jnp.tanh(gates[:, 2 * HH:3 * HH])
        o_g = jax.nn.sigmoid(gates[:, 3 * HH:4 * HH])
        c_new = f_g * c_cat + i_g * g_g
        h_new = o_g * jnp.tanh(c_new)
        # Scatter the two halves to their time rows; read-modify-write keeps
        # every store full-lane-width (no cross-lane relayout in the hot loop).
        o_ref[t] = jnp.where(fwd_half, h_new, o_ref[t])
        o_ref[rt] = jnp.where(fwd_half, o_ref[rt], h_new)
        return (h_new, c_new)

    h0 = jnp.zeros((Bn, HH), jnp.float32)
    c0 = jnp.zeros((Bn, HH), jnp.float32)
    jax.lax.fori_loop(0, Tn, step, (h0, c0))


def lstm_recurrence(gx, whh):
    NB, T, B, G = gx.shape
    HH = whh.shape[1]
    blk = T * B * G * 4 + HH * G * 2 + T * B * HH * 4
    return pl.pallas_call(
        _lstm_recurrence_kernel,
        out_shape=jax.ShapeDtypeStruct((NB, T, B, HH), jnp.float32),
        grid=(NB,),
        in_specs=[
            pl.BlockSpec((None, T, B, G), lambda n: (n, 0, 0, 0)),
            pl.BlockSpec((None, HH, G), lambda n: (n, 0, 0)),
        ],
        out_specs=pl.BlockSpec((None, T, B, HH), lambda n: (n, 0, 0, 0)),
        compiler_params=pltpu.CompilerParams(
            dimension_semantics=("parallel",),
            vmem_limit_bytes=_vmem_limit(blk)),
    )(gx, whh)


# ----------------------------------------------------------------------------
# Fused tail: attention score MLP (shared across branches) + softmax over the
# 3 branches + weighted sum + mean over time + classifier, one pallas_call with
# an accumulating grid over T chunks.  Scores never leave VMEM.
# ----------------------------------------------------------------------------
def _make_tail_kernel(inv_T):
    def kernel(x_ref, w1_ref, b1_ref, w2_ref, b2_ref,
               wc1_ref, bc1_ref, wc2_ref, bc2_ref, o_ref, acc_ref):
        step = pl.program_id(0)

        @pl.when(step == 0)
        def _init():
            acc_ref[...] = jnp.zeros_like(acc_ref)

        x = x_ref[...]                               # (3, tc, B, D) f32
        nb, tc, Bn, D = x.shape
        xf = x.reshape(nb * tc * Bn, D)
        hh = jnp.tanh(jnp.dot(xf.astype(jnp.bfloat16), w1_ref[...],
                              preferred_element_type=jnp.float32) + b1_ref[...])
        s = jnp.sum(hh * w2_ref[...], axis=-1, keepdims=True) + b2_ref[...]
        s = s.reshape(nb, tc, Bn, 1)
        m = jnp.maximum(jnp.maximum(s[0], s[1]), s[2])
        e0 = jnp.exp(s[0] - m)
        e1 = jnp.exp(s[1] - m)
        e2 = jnp.exp(s[2] - m)
        z = e0 + e1 + e2
        fused = (e0 * x[0] + e1 * x[1] + e2 * x[2]) / z     # (tc, B, D)
        acc_ref[...] += jnp.sum(fused, axis=0)

        @pl.when(step == pl.num_programs(0) - 1)
        def _finalize():
            pooled = acc_ref[...] * inv_T                    # mean over time
            hcls = jnp.dot(pooled.astype(jnp.bfloat16), wc1_ref[...],
                           preferred_element_type=jnp.float32) + bc1_ref[...]
            hcls = jnp.maximum(hcls, 0.0)
            # TODO(synk): Dropout(0.3) is identity (eval-mode semantics).
            logits = jnp.dot(hcls.astype(jnp.bfloat16), wc2_ref[...],
                             preferred_element_type=jnp.float32) + bc2_ref[...]
            o_ref[...] = logits.astype(o_ref.dtype)

    return kernel


def attention_classifier(feats, fusion, cls, T):
    NB, Tn, B, D = feats.shape
    CH = cls["w1"].shape[-1]
    NC = cls["w2"].shape[-1]
    tc = Tn
    if Tn > 128:
        tc = 128
        while Tn % tc:
            tc -= 1
    nchunks = Tn // tc
    blk = (NB * tc * B * D * 4 + (D * D + D * CH + CH * NC) * 2
           + (2 * D + CH + NC + 1) * 4 + (B * D + B * NC) * 4)
    return pl.pallas_call(
        _make_tail_kernel(1.0 / T),
        out_shape=jax.ShapeDtypeStruct((B, NC), jnp.float32),
        grid=(nchunks,),
        in_specs=[
            pl.BlockSpec((NB, tc, B, D), lambda i: (0, i, 0, 0)),
            pl.BlockSpec((D, D), lambda i: (0, 0)),
            pl.BlockSpec((1, D), lambda i: (0, 0)),
            pl.BlockSpec((1, D), lambda i: (0, 0)),
            pl.BlockSpec((1, 1), lambda i: (0, 0)),
            pl.BlockSpec((D, CH), lambda i: (0, 0)),
            pl.BlockSpec((1, CH), lambda i: (0, 0)),
            pl.BlockSpec((CH, NC), lambda i: (0, 0)),
            pl.BlockSpec((1, NC), lambda i: (0, 0)),
        ],
        out_specs=pl.BlockSpec((B, NC), lambda i: (0, 0)),
        scratch_shapes=[pltpu.VMEM((B, D), jnp.float32)],
        compiler_params=pltpu.CompilerParams(
            dimension_semantics=("arbitrary",),
            vmem_limit_bytes=_vmem_limit(blk)),
    )(feats, fusion["w1"], fusion["b1"], fusion["w2"], fusion["b2"],
      cls["w1"], cls["b1"], cls["w2"], cls["b2"])


# ----------------------------------------------------------------------------
# Glue: im2col for 3x3 / pad 1 conv, applied to all 3 branches at once.
# TODO(synk): replace with a fully fused conv-stack kernel (halo tiles) to avoid
#             the 9x patch materialization in HBM.
# ----------------------------------------------------------------------------
def im2col_3x3(x):
    NB, B, F, T, C = x.shape
    xp = jnp.pad(x, ((0, 0), (0, 0), (1, 1), (1, 1), (0, 0)))
    cols = [xp[:, :, dy:dy + F, dx:dx + T, :]
            for dy in range(3) for dx in range(3)]
    patches = jnp.concatenate(cols, axis=-1)           # (NB, B, F, T, 9C)
    return patches.reshape(NB, B * F * T, 9 * C)


# ----------------------------------------------------------------------------
# Full forward pass.
# ----------------------------------------------------------------------------
def multibranch_lstm(x, params):
    # x: (B, 3, freq, time) -- NCHW like the PyTorch reference (resized=True).
    B, _, Fr, T = x.shape
    h = jnp.transpose(x, (1, 0, 2, 3))[..., None].astype(jnp.bfloat16)  # (3,B,F,T,1)

    # Conv stack (im2col matmul + folded BN + ReLU), all 3 branches per call.
    for cp in params["convs"]:
        cout = cp["w"].shape[-1]
        patches = im2col_3x3(h)                                    # XLA glue
        y = branch_linear(patches, cp["w"], cp["bias"], scale=cp["scale"],
                          act="relu", out_dtype=jnp.bfloat16)      # Pallas
        h = y.reshape(3, B, Fr, T, cout)

    pooled = freq_pool(h)                                          # (3,B,T,C3)
    seq = jnp.transpose(pooled, (0, 2, 1, 3))                      # (3,T,B,C3)

    # 2-layer bidirectional LSTM: hoisted input projection + packed recurrence.
    for lp in params["lstm"]:
        D = seq.shape[-1]
        gx = branch_linear(seq.reshape(3, T * B, D).astype(jnp.bfloat16),
                           lp["wih"], lp["b"], scale=None,
                           act="none", out_dtype=jnp.float32)      # (3,T*B,8H)
        seq = lstm_recurrence(gx.reshape(3, T, B, -1), lp["whh"])  # (3,T,B,2H)

    # Attention fusion + time mean + classifier, fully fused.
    return attention_classifier(seq, params["fusion"], params["cls"], T)


# ----------------------------------------------------------------------------
# Deterministic synthetic parameters (packed layouts built once, in plain JAX).
# ----------------------------------------------------------------------------
def init_params(key):
    state = [key]

    def nxt():
        state[0], sub = jax.random.split(state[0])
        return sub

    def nrm(shape, scale=0.1):
        return (scale * jax.random.normal(nxt(), shape)).astype(jnp.float32)

    H = LSTM_HIDDEN
    bn_scale_val = float((1.0 + 1e-5) ** -0.5)  # gamma=1, beta=0, mean=0, var=1

    convs = []
    cin = 1
    for cout in (CNN_OUT, 2 * CNN_OUT, 4 * CNN_OUT):
        convs.append({
            "w": nrm((3, 9 * cin, cout)).astype(jnp.bfloat16),      # im2col layout
            "scale": jnp.full((3, 1, cout), bn_scale_val, jnp.float32),
            "bias": jnp.zeros((3, 1, cout), jnp.float32),
        })
        cin = cout

    def pack_cols(wf, wb):
        # (.., 4H) fwd / bwd -> (.., 8H) laid out [i_f i_b f_f f_b g_f g_b o_f o_b]
        parts = []
        for k in range(4):
            parts.append(wf[..., k * H:(k + 1) * H])
            parts.append(wb[..., k * H:(k + 1) * H])
        return jnp.concatenate(parts, axis=-1)

    lstm = []
    d = 4 * CNN_OUT
    for _ in range(2):
        wih_l, whh_l, b_l = [], [], []
        for _branch in range(3):
            wih_f, wih_b = nrm((d, 4 * H)), nrm((d, 4 * H))
            whh_f, whh_b = nrm((H, 4 * H)), nrm((H, 4 * H))
            b_f, b_b = nrm((1, 4 * H), 0.05), nrm((1, 4 * H), 0.05)  # b_ih + b_hh
            wih_l.append(pack_cols(wih_f, wih_b))
            z = jnp.zeros((H, H), jnp.float32)
            top = jnp.concatenate(
                [jnp.concatenate([whh_f[:, k * H:(k + 1) * H], z], axis=1)
                 for k in range(4)], axis=1)
            bot = jnp.concatenate(
                [jnp.concatenate([z, whh_b[:, k * H:(k + 1) * H]], axis=1)
                 for k in range(4)], axis=1)
            whh_l.append(jnp.concatenate([top, bot], axis=0))        # (2H, 8H)
            b_l.append(pack_cols(b_f, b_b))
        lstm.append({
            "wih": jnp.stack(wih_l).astype(jnp.bfloat16),            # (3, d, 8H)
            "whh": jnp.stack(whh_l).astype(jnp.bfloat16),            # (3, 2H, 8H)
            "b": jnp.stack(b_l).astype(jnp.float32),                 # (3, 1, 8H)
        })
        d = 2 * H

    D = 2 * H
    return {
        "convs": convs,
        "lstm": lstm,
        "fusion": {
            "w1": nrm((D, D)).astype(jnp.bfloat16), "b1": nrm((1, D), 0.05),
            "w2": nrm((1, D)),                      # row form of the (D,1) proj
            "b2": nrm((1, 1), 0.05),
        },
        "cls": {
            "w1": nrm((D, 128)).astype(jnp.bfloat16), "b1": nrm((1, 128), 0.05),
            "w2": nrm((128, NUM_CLASSES)).astype(jnp.bfloat16),
            "b2": nrm((1, NUM_CLASSES), 0.05),
        },
    }


if __name__ == "__main__":
    B, FREQ, TIME = 2, 16, 8
    key = jax.random.PRNGKey(0)
    x = jax.random.normal(key, (B, 3, FREQ, TIME), jnp.float32)
    params = init_params(jax.random.PRNGKey(42))

    fwd = jax.jit(functools.partial(multibranch_lstm, params=params))
    out = jax.block_until_ready(fwd(x))
    assert out.shape == (B, NUM_CLASSES), out.shape
    assert bool(jnp.all(jnp.isfinite(out)))
    print("KERNEL_OK")
</pallas_src>

<mosaic_0001>
module attributes {stable_mosaic.version = 11 : i64} {
  func.func @kernel(%arg0: i32, %arg1: i32, %arg2: memref<1x256x9xbf16, #tpu.memory_space<vmem>>, %arg3: memref<1x9x32xbf16, #tpu.memory_space<vmem>>, %arg4: memref<1x1x32xf32, #tpu.memory_space<vmem>>, %arg5: memref<1x1x32xf32, #tpu.memory_space<vmem>>, %arg6: memref<1x256x32xbf16, #tpu.memory_space<vmem>>) attributes {dimension_semantics = [#tpu.dimension_semantics<parallel>, #tpu.dimension_semantics<parallel>], iteration_bounds = array<i64: 3, 1>, scalar_prefetch = 0 : i64, scratch_operands = 0 : i64, tpu.core_type = #tpu.core_type<tc>, window_params = [{transform_indices = @transform_0, window_bounds = array<i64: 1, 256, 9>}, {transform_indices = @transform_1, window_bounds = array<i64: 1, 9, 32>}, {transform_indices = @transform_2, window_bounds = array<i64: 1, 1, 32>}, {transform_indices = @transform_3, window_bounds = array<i64: 1, 1, 32>}, {transform_indices = @transform_4, window_bounds = array<i64: 1, 256, 32>}]} {
    %c0 = arith.constant 0 : index
    %c0_0 = arith.constant 0 : index
    %c0_1 = arith.constant 0 : index
    %0 = vector.load %arg2[%c0, %c0_0, %c0_1] : memref<1x256x9xbf16, #tpu.memory_space<vmem>>, vector<1x256x9xbf16>
    %1 = vector.shape_cast %0 : vector<1x256x9xbf16> to vector<256x9xbf16>
    %c0_2 = arith.constant 0 : index
    %c0_3 = arith.constant 0 : index
    %c0_4 = arith.constant 0 : index
    %2 = vector.load %arg3[%c0_2, %c0_3, %c0_4] : memref<1x9x32xbf16, #tpu.memory_space<vmem>>, vector<1x9x32xbf16>
    %3 = vector.shape_cast %2 : vector<1x9x32xbf16> to vector<9x32xbf16>
    %cst = arith.constant dense<0.000000e+00> : vector<256x32xf32>
    %4 = tpu.matmul %1, %3, %cst {dimension_numbers = #tpu.dot_dimension_numbers<[1], [0], [0], [1], [0, 0, 1, 1], [], []>} : vector<256x9xbf16>, vector<9x32xbf16>, vector<256x32xf32> -> vector<256x32xf32>
    %c0_5 = arith.constant 0 : index
    %c0_6 = arith.constant 0 : index
    %c0_7 = arith.constant 0 : index
    %5 = vector.load %arg4[%c0_5, %c0_6, %c0_7] : memref<1x1x32xf32, #tpu.memory_space<vmem>>, vector<1x1x32xf32>
    %6 = vector.shape_cast %5 : vector<1x1x32xf32> to vector<1x32xf32>
    %7 = vector.broadcast %6 : vector<1x32xf32> to vector<256x32xf32>
    %8 = arith.mulf %4, %7 : vector<256x32xf32>
    %c0_8 = arith.constant 0 : index
    %c0_9 = arith.constant 0 : index
    %c0_10 = arith.constant 0 : index
    %9 = vector.load %arg5[%c0_8, %c0_9, %c0_10] : memref<1x1x32xf32, #tpu.memory_space<vmem>>, vector<1x1x32xf32>
    %10 = vector.shape_cast %9 : vector<1x1x32xf32> to vector<1x32xf32>
    %11 = vector.broadcast %10 : vector<1x32xf32> to vector<256x32xf32>
    %12 = arith.addf %8, %11 : vector<256x32xf32>
    %cst_11 = arith.constant 0.000000e+00 : f32
    %13 = vector.broadcast %cst_11 : f32 to vector<256x32xf32>
    %14 = arith.maximumf %12, %13 : vector<256x32xf32>
    %15 = arith.truncf %14 : vector<256x32xf32> to vector<256x32xbf16>
    %c0_12 = arith.constant 0 : index
    %c0_13 = arith.constant 0 : index
    %c0_14 = arith.constant 0 : index
    %16 = vector.load %arg6[%c0_12, %c0_13, %c0_14] : memref<1x256x32xbf16, #tpu.memory_space<vmem>>, vector<1x256x32xbf16>
    %17 = vector.shape_cast %16 : vector<1x256x32xbf16> to vector<256x32xbf16>
    %18 = vector.shape_cast %15 : vector<256x32xbf16> to vector<1x256x32xbf16>
    tpu.vector_store %arg6[%c0_12, %c0_13, %c0_14], %18 {strides = array<i32>} : memref<1x256x32xbf16, #tpu.memory_space<vmem>>, vector<1x256x32xbf16>,
    return
  }
  func.func @transform_0(%arg0: i32, %arg1: i32) -> (i32, i32, i32) {
    %c0_i32 = arith.constant 0 : i32
    %c0_i32_0 = arith.constant 0 : i32
    return %arg0, %arg1, %c0_i32 : i32, i32, i32
  }
  func.func @transform_1(%arg0: i32, %arg1: i32) -> (i32, i32, i32) {
    %c0_i32 = arith.constant 0 : i32
    %c0_i32_0 = arith.constant 0 : i32
    %c0_i32_1 = arith.constant 0 : i32
    return %arg0, %c0_i32, %c0_i32_0 : i32, i32, i32
  }
  func.func @transform_2(%arg0: i32, %arg1: i32) -> (i32, i32, i32) {
    %c0_i32 = arith.constant 0 : i32
    %c0_i32_0 = arith.constant 0 : i32
    %c0_i32_1 = arith.constant 0 : i32
    return %arg0, %c0_i32, %c0_i32_0 : i32, i32, i32
  }
  func.func @transform_3(%arg0: i32, %arg1: i32) -> (i32, i32, i32) {
    %c0_i32 = arith.constant 0 : i32
    %c0_i32_0 = arith.constant 0 : i32
    %c0_i32_1 = arith.constant 0 : i32
    return %arg0, %c0_i32, %c0_i32_0 : i32, i32, i32
  }
  func.func @transform_4(%arg0: i32, %arg1: i32) -> (i32, i32, i32) {
    %c0_i32 = arith.constant 0 : i32
    %c0_i32_0 = arith.constant 0 : i32
    return %arg0, %arg1, %c0_i32 : i32, i32, i32
  }
}

module attributes {stable_mosaic.version = 11 : i64} {
  func.func @kernel(%arg0: i32, %arg1: i32, %arg2: memref<1x256x288xbf16, #tpu.memory_space<vmem>>, %arg3: memref<1x288x64xbf16, #tpu.memory_space<vmem>>, %arg4: memref<1x1x64xf32, #tpu.memory_space<vmem>>, %arg5: memref<1x1x64xf32, #tpu.memory_space<vmem>>, %arg6: memref<1x256x64xbf16, #tpu.memory_space<vmem>>) attributes {dimension_semantics = [#tpu.dimension_semantics<parallel>, #tpu.dimension_semantics<parallel>], iteration_bounds = array<i64: 3, 1>, scalar_prefetch = 0 : i64, scratch_operands = 0 : i64, tpu.core_type = #tpu.core_type<tc>, window_params = [{transform_indices = @transform_0, window_bounds = array<i64: 1, 256, 288>}, {transform_indices = @transform_1, window_bounds = array<i64: 1, 288, 64>}, {transform_indices = @transform_2, window_bounds = array<i64: 1, 1, 64>}, {transform_indices = @transform_3, window_bounds = array<i64: 1, 1, 64>}, {transform_indices = @transform_4, window_bounds = array<i64: 1, 256, 64>}]} {
    %c0 = arith.constant 0 : index
    %c0_0 = arith.constant 0 : index
    %c0_1 = arith.constant 0 : index
    %0 = vector.load %arg2[%c0, %c0_0, %c0_1] : memref<1x256x288xbf16, #tpu.memory_space<vmem>>, vector<1x256x288xbf16>
    %1 = vector.shape_cast %0 : vector<1x256x288xbf16> to vector<256x288xbf16>
    %c0_2 = arith.constant 0 : index
    %c0_3 = arith.constant 0 : index
    %c0_4 = arith.constant 0 : index
    %2 = vector.load %arg3[%c0_2, %c0_3, %c0_4] : memref<1x288x64xbf16, #tpu.memory_space<vmem>>, vector<1x288x64xbf16>
    %3 = vector.shape_cast %2 : vector<1x288x64xbf16> to vector<288x64xbf16>
    %cst = arith.constant dense<0.000000e+00> : vector<256x64xf32>
    %4 = tpu.matmul %1, %3, %cst {dimension_numbers = #tpu.dot_dimension_numbers<[1], [0], [0], [1], [0, 0, 1, 1], [], []>} : vector<256x288xbf16>, vector<288x64xbf16>, vector<256x64xf32> -> vector<256x64xf32>
    %c0_5 = arith.constant 0 : index
    %c0_6 = arith.constant 0 : index
    %c0_7 = arith.constant 0 : index
    %5 = vector.load %arg4[%c0_5, %c0_6, %c0_7] : memref<1x1x64xf32, #tpu.memory_space<vmem>>, vector<1x1x64xf32>
    %6 = vector.shape_cast %5 : vector<1x1x64xf32> to vector<1x64xf32>
    %7 = vector.broadcast %6 : vector<1x64xf32> to vector<256x64xf32>
    %8 = arith.mulf %4, %7 : vector<256x64xf32>
    %c0_8 = arith.constant 0 : index
    %c0_9 = arith.constant 0 : index
    %c0_10 = arith.constant 0 : index
    %9 = vector.load %arg5[%c0_8, %c0_9, %c0_10] : memref<1x1x64xf32, #tpu.memory_space<vmem>>, vector<1x1x64xf32>
    %10 = vector.shape_cast %9 : vector<1x1x64xf32> to vector<1x64xf32>
    %11 = vector.broadcast %10 : vector<1x64xf32> to vector<256x64xf32>
    %12 = arith.addf %8, %11 : vector<256x64xf32>
    %cst_11 = arith.constant 0.000000e+00 : f32
    %13 = vector.broadcast %cst_11 : f32 to vector<256x64xf32>
    %14 = arith.maximumf %12, %13 : vector<256x64xf32>
    %15 = arith.truncf %14 : vector<256x64xf32> to vector<256x64xbf16>
    %c0_12 = arith.constant 0 : index
    %c0_13 = arith.constant 0 : index
    %c0_14 = arith.constant 0 : index
    %16 = vector.load %arg6[%c0_12, %c0_13, %c0_14] : memref<1x256x64xbf16, #tpu.memory_space<vmem>>, vector<1x256x64xbf16>
    %17 = vector.shape_cast %16 : vector<1x256x64xbf16> to vector<256x64xbf16>
    %18 = vector.shape_cast %15 : vector<256x64xbf16> to vector<1x256x64xbf16>
    tpu.vector_store %arg6[%c0_12, %c0_13, %c0_14], %18 {strides = array<i32>} : memref<1x256x64xbf16, #tpu.memory_space<vmem>>, vector<1x256x64xbf16>,
    return
  }
  func.func @transform_0(%arg0: i32, %arg1: i32) -> (i32, i32, i32) {
    %c0_i32 = arith.constant 0 : i32
    %c0_i32_0 = arith.constant 0 : i32
    return %arg0, %arg1, %c0_i32 : i32, i32, i32
  }
  func.func @transform_1(%arg0: i32, %arg1: i32) -> (i32, i32, i32) {
    %c0_i32 = arith.constant 0 : i32
    %c0_i32_0 = arith.constant 0 : i32
    %c0_i32_1 = arith.constant 0 : i32
    return %arg0, %c0_i32, %c0_i32_0 : i32, i32, i32
  }
  func.func @transform_2(%arg0: i32, %arg1: i32) -> (i32, i32, i32) {
    %c0_i32 = arith.constant 0 : i32
    %c0_i32_0 = arith.constant 0 : i32
    %c0_i32_1 = arith.constant 0 : i32
    return %arg0, %c0_i32, %c0_i32_0 : i32, i32, i32
  }
  func.func @transform_3(%arg0: i32, %arg1: i32) -> (i32, i32, i32) {
    %c0_i32 = arith.constant 0 : i32
    %c0_i32_0 = arith.constant 0 : i32
    %c0_i32_1 = arith.constant 0 : i32
    return %arg0, %c0_i32, %c0_i32_0 : i32, i32, i32
  }
  func.func @transform_4(%arg0: i32, %arg1: i32) -> (i32, i32, i32) {
    %c0_i32 = arith.constant 0 : i32
    %c0_i32_0 = arith.constant 0 : i32
    return %arg0, %arg1, %c0_i32 : i32, i32, i32
  }
}

module attributes {stable_mosaic.version = 11 : i64} {
  func.func @kernel(%arg0: i32, %arg1: i32, %arg2: memref<1x256x576xbf16, #tpu.memory_space<vmem>>, %arg3: memref<1x576x128xbf16, #tpu.memory_space<vmem>>, %arg4: memref<1x1x128xf32, #tpu.memory_space<vmem>>, %arg5: memref<1x1x128xf32, #tpu.memory_space<vmem>>, %arg6: memref<1x256x128xbf16, #tpu.memory_space<vmem>>) attributes {dimension_semantics = [#tpu.dimension_semantics<parallel>, #tpu.dimension_semantics<parallel>], iteration_bounds = array<i64: 3, 1>, scalar_prefetch = 0 : i64, scratch_operands = 0 : i64, tpu.core_type = #tpu.core_type<tc>, window_params = [{transform_indices = @transform_0, window_bounds = array<i64: 1, 256, 576>}, {transform_indices = @transform_1, window_bounds = array<i64: 1, 576, 128>}, {transform_indices = @transform_2, window_bounds = array<i64: 1, 1, 128>}, {transform_indices = @transform_3, window_bounds = array<i64: 1, 1, 128>}, {transform_indices = @transform_4, window_bounds = array<i64: 1, 256, 128>}]} {
    %c0 = arith.constant 0 : index
    %c0_0 = arith.constant 0 : index
    %c0_1 = arith.constant 0 : index
    %0 = vector.load %arg2[%c0, %c0_0, %c0_1] : memref<1x256x576xbf16, #tpu.memory_space<vmem>>, vector<1x256x576xbf16>
    %1 = vector.shape_cast %0 : vector<1x256x576xbf16> to vector<256x576xbf16>
    %c0_2 = arith.constant 0 : index
    %c0_3 = arith.constant 0 : index
    %c0_4 = arith.constant 0 : index
    %2 = vector.load %arg3[%c0_2, %c0_3, %c0_4] : memref<1x576x128xbf16, #tpu.memory_space<vmem>>, vector<1x576x128xbf16>
    %3 = vector.shape_cast %2 : vector<1x576x128xbf16> to vector<576x128xbf16>
    %cst = arith.constant dense<0.000000e+00> : vector<256x128xf32>
    %4 = tpu.matmul %1, %3, %cst {dimension_numbers = #tpu.dot_dimension_numbers<[1], [0], [0], [1], [0, 0, 1, 1], [], []>} : vector<256x576xbf16>, vector<576x128xbf16>, vector<256x128xf32> -> vector<256x128xf32>
    %c0_5 = arith.constant 0 : index
    %c0_6 = arith.constant 0 : index
    %c0_7 = arith.constant 0 : index
    %5 = vector.load %arg4[%c0_5, %c0_6, %c0_7] : memref<1x1x128xf32, #tpu.memory_space<vmem>>, vector<1x1x128xf32>
    %6 = vector.shape_cast %5 : vector<1x1x128xf32> to vector<1x128xf32>
    %7 = vector.broadcast %6 : vector<1x128xf32> to vector<256x128xf32>
    %8 = arith.mulf %4, %7 : vector<256x128xf32>
    %c0_8 = arith.constant 0 : index
    %c0_9 = arith.constant 0 : index
    %c0_10 = arith.constant 0 : index
    %9 = vector.load %arg5[%c0_8, %c0_9, %c0_10] : memref<1x1x128xf32, #tpu.memory_space<vmem>>, vector<1x1x128xf32>
    %10 = vector.shape_cast %9 : vector<1x1x128xf32> to vector<1x128xf32>
    %11 = vector.broadcast %10 : vector<1x128xf32> to vector<256x128xf32>
    %12 = arith.addf %8, %11 : vector<256x128xf32>
    %cst_11 = arith.constant 0.000000e+00 : f32
    %13 = vector.broadcast %cst_11 : f32 to vector<256x128xf32>
    %14 = arith.maximumf %12, %13 : vector<256x128xf32>
    %15 = arith.truncf %14 : vector<256x128xf32> to vector<256x128xbf16>
    %c0_12 = arith.constant 0 : index
    %c0_13 = arith.constant 0 : index
    %c0_14 = arith.constant 0 : index
    %16 = vector.load %arg6[%c0_12, %c0_13, %c0_14] : memref<1x256x128xbf16, #tpu.memory_space<vmem>>, vector<1x256x128xbf16>
    %17 = vector.shape_cast %16 : vector<1x256x128xbf16> to vector<256x128xbf16>
    %18 = vector.shape_cast %15 : vector<256x128xbf16> to vector<1x256x128xbf16>
    tpu.vector_store %arg6[%c0_12, %c0_13, %c0_14], %18 {strides = array<i32>} : memref<1x256x128xbf16, #tpu.memory_space<vmem>>, vector<1x256x128xbf16>,
    return
  }
  func.func @transform_0(%arg0: i32, %arg1: i32) -> (i32, i32, i32) {
    %c0_i32 = arith.constant 0 : i32
    %c0_i32_0 = arith.constant 0 : i32
    return %arg0, %arg1, %c0_i32 : i32, i32, i32
  }
  func.func @transform_1(%arg0: i32, %arg1: i32) -> (i32, i32, i32) {
    %c0_i32 = arith.constant 0 : i32
    %c0_i32_0 = arith.constant 0 : i32
    %c0_i32_1 = arith.constant 0 : i32
    return %arg0, %c0_i32, %c0_i32_0 : i32, i32, i32
  }
  func.func @transform_2(%arg0: i32, %arg1: i32) -> (i32, i32, i32) {
    %c0_i32 = arith.constant 0 : i32
    %c0_i32_0 = arith.constant 0 : i32
    %c0_i32_1 = arith.constant 0 : i32
    return %arg0, %c0_i32, %c0_i32_0 : i32, i32, i32
  }
  func.func @transform_3(%arg0: i32, %arg1: i32) -> (i32, i32, i32) {
    %c0_i32 = arith.constant 0 : i32
    %c0_i32_0 = arith.constant 0 : i32
    %c0_i32_1 = arith.constant 0 : i32
    return %arg0, %c0_i32, %c0_i32_0 : i32, i32, i32
  }
  func.func @transform_4(%arg0: i32, %arg1: i32) -> (i32, i32, i32) {
    %c0_i32 = arith.constant 0 : i32
    %c0_i32_0 = arith.constant 0 : i32
    return %arg0, %arg1, %c0_i32 : i32, i32, i32
  }
}

module attributes {stable_mosaic.version = 11 : i64} {
  func.func @_freq_pool_kernel(%arg0: i32, %arg1: i32, %arg2: memref<1x1x16x8x128xbf16, #tpu.memory_space<vmem>>, %arg3: memref<1x1x8x128xf32, #tpu.memory_space<vmem>>) attributes {dimension_semantics = [#tpu.dimension_semantics<parallel>, #tpu.dimension_semantics<parallel>], iteration_bounds = array<i64: 3, 2>, scalar_prefetch = 0 : i64, scratch_operands = 0 : i64, tpu.core_type = #tpu.core_type<tc>, window_params = [{transform_indices = @transform_0, window_bounds = array<i64: 1, 1, 16, 8, 128>}, {transform_indices = @transform_1, window_bounds = array<i64: 1, 1, 8, 128>}]} {
    %c0 = arith.constant 0 : index
    %c0_0 = arith.constant 0 : index
    %c0_1 = arith.constant 0 : index
    %c0_2 = arith.constant 0 : index
    %c0_3 = arith.constant 0 : index
    %0 = vector.load %arg2[%c0, %c0_0, %c0_1, %c0_2, %c0_3] : memref<1x1x16x8x128xbf16, #tpu.memory_space<vmem>>, vector<1x1x16x8x128xbf16>
    %1 = vector.shape_cast %0 : vector<1x1x16x8x128xbf16> to vector<16x8x128xbf16>
    %2 = arith.extf %1 : vector<16x8x128xbf16> to vector<16x8x128xf32>
    %cst = arith.constant dense<0.000000e+00> : vector<8x128xf32>
    %3 = vector.multi_reduction <add>, %2, %cst [0] : vector<16x8x128xf32> to vector<8x128xf32>
    %cst_4 = arith.constant 1.600000e+01 : f32
    %4 = vector.broadcast %cst_4 : f32 to vector<8x128xf32>
    %5 = arith.divf %3, %4 : vector<8x128xf32>
    %c0_5 = arith.constant 0 : index
    %c0_6 = arith.constant 0 : index
    %c0_7 = arith.constant 0 : index
    %c0_8 = arith.constant 0 : index
    %6 = vector.load %arg3[%c0_5, %c0_6, %c0_7, %c0_8] : memref<1x1x8x128xf32, #tpu.memory_space<vmem>>, vector<1x1x8x128xf32>
    %7 = vector.shape_cast %6 : vector<1x1x8x128xf32> to vector<8x128xf32>
    %8 = vector.shape_cast %5 : vector<8x128xf32> to vector<1x1x8x128xf32>
    tpu.vector_store %arg3[%c0_5, %c0_6, %c0_7, %c0_8], %8 {strides = array<i32>} : memref<1x1x8x128xf32, #tpu.memory_space<vmem>>, vector<1x1x8x128xf32>,
    return
  }
  func.func @transform_0(%arg0: i32, %arg1: i32) -> (i32, i32, i32, i32, i32) {
    %c0_i32 = arith.constant 0 : i32
    %c0_i32_0 = arith.constant 0 : i32
    %c0_i32_1 = arith.constant 0 : i32
    %c0_i32_2 = arith.constant 0 : i32
    return %arg0, %arg1, %c0_i32, %c0_i32_0, %c0_i32_1 : i32, i32, i32, i32, i32
  }
  func.func @transform_1(%arg0: i32, %arg1: i32) -> (i32, i32, i32, i32) {
    %c0_i32 = arith.constant 0 : i32
    %c0_i32_0 = arith.constant 0 : i32
    %c0_i32_1 = arith.constant 0 : i32
    return %arg0, %arg1, %c0_i32, %c0_i32_0 : i32, i32, i32, i32
  }
}

module attributes {stable_mosaic.version = 11 : i64} {
  func.func @kernel(%arg0: i32, %arg1: i32, %arg2: memref<1x16x128xbf16, #tpu.memory_space<vmem>>, %arg3: memref<1x128x512xbf16, #tpu.memory_space<vmem>>, %arg4: memref<1x1x512xf32, #tpu.memory_space<vmem>>, %arg5: memref<1x16x512xf32, #tpu.memory_space<vmem>>) attributes {dimension_semantics = [#tpu.dimension_semantics<parallel>, #tpu.dimension_semantics<parallel>], iteration_bounds = array<i64: 3, 1>, scalar_prefetch = 0 : i64, scratch_operands = 0 : i64, tpu.core_type = #tpu.core_type<tc>, window_params = [{transform_indices = @transform_0, window_bounds = array<i64: 1, 16, 128>}, {transform_indices = @transform_1, window_bounds = array<i64: 1, 128, 512>}, {transform_indices = @transform_2, window_bounds = array<i64: 1, 1, 512>}, {transform_indices = @transform_3, window_bounds = array<i64: 1, 16, 512>}]} {
    %c0 = arith.constant 0 : index
    %c0_0 = arith.constant 0 : index
    %c0_1 = arith.constant 0 : index
    %0 = vector.load %arg2[%c0, %c0_0, %c0_1] : memref<1x16x128xbf16, #tpu.memory_space<vmem>>, vector<1x16x128xbf16>
    %1 = vector.shape_cast %0 : vector<1x16x128xbf16> to vector<16x128xbf16>
    %c0_2 = arith.constant 0 : index
    %c0_3 = arith.constant 0 : index
    %c0_4 = arith.constant 0 : index
    %2 = vector.load %arg3[%c0_2, %c0_3, %c0_4] : memref<1x128x512xbf16, #tpu.memory_space<vmem>>, vector<1x128x512xbf16>
    %3 = vector.shape_cast %2 : vector<1x128x512xbf16> to vector<128x512xbf16>
    %cst = arith.constant dense<0.000000e+00> : vector<16x512xf32>
    %4 = tpu.matmul %1, %3, %cst {dimension_numbers = #tpu.dot_dimension_numbers<[1], [0], [0], [1], [0, 0, 1, 1], [], []>} : vector<16x128xbf16>, vector<128x512xbf16>, vector<16x512xf32> -> vector<16x512xf32>
    %c0_5 = arith.constant 0 : index
    %c0_6 = arith.constant 0 : index
    %c0_7 = arith.constant 0 : index
    %5 = vector.load %arg4[%c0_5, %c0_6, %c0_7] : memref<1x1x512xf32, #tpu.memory_space<vmem>>, vector<1x1x512xf32>
    %6 = vector.shape_cast %5 : vector<1x1x512xf32> to vector<1x512xf32>
    %7 = vector.broadcast %6 : vector<1x512xf32> to vector<16x512xf32>
    %8 = arith.addf %4, %7 : vector<16x512xf32>
    %c0_8 = arith.constant 0 : index
    %c0_9 = arith.constant 0 : index
    %c0_10 = arith.constant 0 : index
    %9 = vector.load %arg5[%c0_8, %c0_9, %c0_10] : memref<1x16x512xf32, #tpu.memory_space<vmem>>, vector<1x16x512xf32>
    %10 = vector.shape_cast %9 : vector<1x16x512xf32> to vector<16x512xf32>
    %11 = vector.shape_cast %8 : vector<16x512xf32> to vector<1x16x512xf32>
    tpu.vector_store %arg5[%c0_8, %c0_9, %c0_10], %11 {strides = array<i32>} : memref<1x16x512xf32, #tpu.memory_space<vmem>>, vector<1x16x512xf32>,
    return
  }
  func.func @transform_0(%arg0: i32, %arg1: i32) -> (i32, i32, i32) {
    %c0_i32 = arith.constant 0 : i32
    %c0_i32_0 = arith.constant 0 : i32
    return %arg0, %arg1, %c0_i32 : i32, i32, i32
  }
  func.func @transform_1(%arg0: i32, %arg1: i32) -> (i32, i32, i32) {
    %c0_i32 = arith.constant 0 : i32
    %c0_i32_0 = arith.constant 0 : i32
    %c0_i32_1 = arith.constant 0 : i32
    return %arg0, %c0_i32, %c0_i32_0 : i32, i32, i32
  }
  func.func @transform_2(%arg0: i32, %arg1: i32) -> (i32, i32, i32) {
    %c0_i32 = arith.constant 0 : i32
    %c0_i32_0 = arith.constant 0 : i32
    %c0_i32_1 = arith.constant 0 : i32
    return %arg0, %c0_i32, %c0_i32_0 : i32, i32, i32
  }
  func.func @transform_3(%arg0: i32, %arg1: i32) -> (i32, i32, i32) {
    %c0_i32 = arith.constant 0 : i32
    %c0_i32_0 = arith.constant 0 : i32
    return %arg0, %arg1, %c0_i32 : i32, i32, i32
  }
}

module attributes {stable_mosaic.version = 11 : i64} {
  func.func @_lstm_recurrence_kernel(%arg0: i32, %arg1: memref<1x8x2x512xf32, #tpu.memory_space<vmem>>, %arg2: memref<1x128x512xbf16, #tpu.memory_space<vmem>>, %arg3: memref<1x8x2x128xf32, #tpu.memory_space<vmem>>) attributes {dimension_semantics = [#tpu.dimension_semantics<parallel>], iteration_bounds = array<i64: 3>, scalar_prefetch = 0 : i64, scratch_operands = 0 : i64, tpu.core_type = #tpu.core_type<tc>, window_params = [{transform_indices = @transform_0, window_bounds = array<i64: 1, 8, 2, 512>}, {transform_indices = @transform_1, window_bounds = array<i64: 1, 128, 512>}, {transform_indices = @transform_2, window_bounds = array<i64: 1, 8, 2, 128>}]} {
    %c0 = arith.constant 0 : index
    %c0_0 = arith.constant 0 : index
    %c0_1 = arith.constant 0 : index
    %0 = vector.load %arg2[%c0, %c0_0, %c0_1] : memref<1x128x512xbf16, #tpu.memory_space<vmem>>, vector<1x128x512xbf16>
    %1 = vector.shape_cast %0 : vector<1x128x512xbf16> to vector<128x512xbf16>
    %2 = tpu.iota {dimensions = array<i32: 1>} : vector<2x512xi32>
    %c128_i32 = arith.constant 128 : i32
    %c0_i32 = arith.constant 0 : i32
    %3 = arith.cmpi eq, %c128_i32, %c0_i32 : i32
    %c1_i32 = arith.constant 1 : i32
    %4 = arith.select %3, %c1_i32, %c128_i32 : i32
    %5 = vector.broadcast %4 : i32 to vector<2x512xi32>
    %6 = arith.remsi %2, %5 : vector<2x512xi32>
    %c0_i32_2 = arith.constant 0 : i32
    %7 = vector.broadcast %c0_i32_2 : i32 to vector<2x512xi32>
    %8 = arith.cmpi ne, %6, %7 : vector<2x512xi32>
    %c0_i32_3 = arith.constant 0 : i32
    %9 = vector.broadcast %c0_i32_3 : i32 to vector<2x512xi32>
    %10 = arith.cmpi slt, %6, %9 : vector<2x512xi32>
    %c0_i32_4 = arith.constant 0 : i32
    %11 = arith.cmpi slt, %4, %c0_i32_4 : i32
    %12 = vector.broadcast %11 : i1 to vector<2x512xi1>
    %13 = vector.broadcast %12 : vector<2x512xi1> to vector<2x512xi1>
    %14 = arith.xori %10, %13 : vector<2x512xi1>
    %15 = arith.andi %14, %8 : vector<2x512xi1>
    %16 = vector.broadcast %4 : i32 to vector<2x512xi32>
    %17 = arith.addi %6, %16 : vector<2x512xi32>
    %18 = arith.select %15, %17, %6 : vector<2x512xi1>, vector<2x512xi32>
    %c64_i32 = arith.constant 64 : i32
    %19 = vector.broadcast %c64_i32 : i32 to vector<2x512xi32>
    %20 = arith.cmpi slt, %18, %19 : vector<2x512xi32>
    %21 = tpu.iota {dimensions = array<i32: 1>} : vector<2x128xi32>
    %c64_i32_5 = arith.constant 64 : i32
    %22 = vector.broadcast %c64_i32_5 : i32 to vector<2x128xi32>
    %23 = arith.cmpi slt, %21, %22 : vector<2x128xi32>
    %cst = arith.constant 0.000000e+00 : f32
    %24 = vector.broadcast %cst : f32 to vector<2x128xf32>
    %cst_6 = arith.constant 0.000000e+00 : f32
    %25 = vector.broadcast %cst_6 : f32 to vector<2x128xf32>
    %c0_i32_7 = arith.constant 0 : i32
    %c8_i32 = arith.constant 8 : i32
    %26 = arith.addi %c0_i32_7, %c8_i32 : i32
    %c1_i32_8 = arith.constant 1 : i32
    %27:2 = scf.for %arg4 = %c0_i32_7 to %26 step %c1_i32_8 iter_args(%arg5 = %24, %arg6 = %25) -> (vector<2x128xf32>, vector<2x128xf32>)  : i32 {
      %c7_i32 = arith.constant 7 : i32
      %28 = arith.subi %c7_i32, %arg4 : i32
      %c0_10 = arith.constant 0 : index
      %29 = arith.index_cast %arg4 : i32 to index
      %c0_11 = arith.constant 0 : index
      %c0_12 = arith.constant 0 : index
      %30 = vector.load %arg1[%c0_10, %29, %c0_11, %c0_12] : memref<1x8x2x512xf32, #tpu.memory_space<vmem>>, vector<1x1x2x512xf32>
      %31 = vector.shape_cast %30 : vector<1x1x2x512xf32> to vector<2x512xf32>
      %c0_13 = arith.constant 0 : index
      %32 = arith.index_cast %28 : i32 to index
      %c0_14 = arith.constant 0 : index
      %c0_15 = arith.constant 0 : index
      %33 = vector.load %arg1[%c0_13, %32, %c0_14, %c0_15] : memref<1x8x2x512xf32, #tpu.memory_space<vmem>>, vector<1x1x2x512xf32>
      %34 = vector.shape_cast %33 : vector<1x1x2x512xf32> to vector<2x512xf32>
      %35 = arith.select %20, %31, %34 : vector<2x512xi1>, vector<2x512xf32>
      %36 = arith.truncf %arg5 : vector<2x128xf32> to vector<2x128xbf16>
      %cst_16 = arith.constant dense<0.000000e+00> : vector<2x512xf32>
      %37 = tpu.matmul %36, %1, %cst_16 {dimension_numbers = #tpu.dot_dimension_numbers<[1], [0], [0], [1], [0, 0, 1, 1], [], []>} : vector<2x128xbf16>, vector<128x512xbf16>, vector<2x512xf32> -> vector<2x512xf32>
      %38 = arith.addf %35, %37 : vector<2x512xf32>
      %39 = vector.extract_strided_slice %38 {offsets = [0, 0], sizes = [2, 128], strides = [1, 1]} : vector<2x512xf32> to vector<2x128xf32>
      %40 = arith.negf %39 : vector<2x128xf32>
      %41 = math.exp %40 : vector<2x128xf32>
      %cst_17 = arith.constant 1.000000e+00 : f32
      %42 = vector.broadcast %cst_17 : f32 to vector<2x128xf32>
      %43 = arith.addf %42, %41 : vector<2x128xf32>
      %44 = arith.divf %42, %43 : vector<2x128xf32>
      %45 = vector.extract_strided_slice %38 {offsets = [0, 128], sizes = [2, 128], strides = [1, 1]} : vector<2x512xf32> to vector<2x128xf32>
      %46 = arith.negf %45 : vector<2x128xf32>
      %47 = math.exp %46 : vector<2x128xf32>
      %cst_18 = arith.constant 1.000000e+00 : f32
      %48 = vector.broadcast %cst_18 : f32 to vector<2x128xf32>
      %49 = arith.addf %48, %47 : vector<2x128xf32>
      %50 = arith.divf %48, %49 : vector<2x128xf32>
      %51 = vector.extract_strided_slice %38 {offsets = [0, 256], sizes = [2, 128], strides = [1, 1]} : vector<2x512xf32> to vector<2x128xf32>
      %52 = math.tanh %51 : vector<2x128xf32>
      %53 = vector.extract_strided_slice %38 {offsets = [0, 384], sizes = [2, 128], strides = [1, 1]} : vector<2x512xf32> to vector<2x128xf32>
      %54 = arith.negf %53 : vector<2x128xf32>
      %55 = math.exp %54 : vector<2x128xf32>
      %cst_19 = arith.constant 1.000000e+00 : f32
      %56 = vector.broadcast %cst_19 : f32 to vector<2x128xf32>
      %57 = arith.addf %56, %55 : vector<2x128xf32>
      %58 = arith.divf %56, %57 : vector<2x128xf32>
      %59 = arith.mulf %50, %arg6 : vector<2x128xf32>
      %60 = arith.mulf %44, %52 : vector<2x128xf32>
      %61 = arith.addf %59, %60 : vector<2x128xf32>
      %62 = math.tanh %61 : vector<2x128xf32>
      %63 = arith.mulf %58, %62 : vector<2x128xf32>
      %c0_20 = arith.constant 0 : index
      %64 = arith.index_cast %arg4 : i32 to index
      %c0_21 = arith.constant 0 : index
      %c0_22 = arith.constant 0 : index
      %65 = vector.load %arg3[%c0_20, %64, %c0_21, %c0_22] : memref<1x8x2x128xf32, #tpu.memory_space<vmem>>, vector<1x1x2x128xf32>
      %66 = vector.shape_cast %65 : vector<1x1x2x128xf32> to vector<2x128xf32>
      %67 = arith.select %23, %63, %66 : vector<2x128xi1>, vector<2x128xf32>
      %c0_23 = arith.constant 0 : index
      %68 = arith.index_cast %arg4 : i32 to index
      %c0_24 = arith.constant 0 : index
      %c0_25 = arith.constant 0 : index
      %69 = vector.load %arg3[%c0_23, %68, %c0_24, %c0_25] : memref<1x8x2x128xf32, #tpu.memory_space<vmem>>, vector<1x1x2x128xf32>
      %70 = vector.shape_cast %69 : vector<1x1x2x128xf32> to vector<2x128xf32>
      %71 = vector.shape_cast %67 : vector<2x128xf32> to vector<1x1x2x128xf32>
      tpu.vector_store %arg3[%c0_23, %68, %c0_24, %c0_25], %71 {strides = array<i32>} : memref<1x8x2x128xf32, #tpu.memory_space<vmem>>, vector<1x1x2x128xf32>,
      %c0_26 = arith.constant 0 : index
      %72 = arith.index_cast %28 : i32 to index
      %c0_27 = arith.constant 0 : index
      %c0_28 = arith.constant 0 : index
      %73 = vector.load %arg3[%c0_26, %72, %c0_27, %c0_28] : memref<1x8x2x128xf32, #tpu.memory_space<vmem>>, vector<1x1x2x128xf32>
      %74 = vector.shape_cast %73 : vector<1x1x2x128xf32> to vector<2x128xf32>
      %75 = arith.select %23, %74, %63 : vector<2x128xi1>, vector<2x128xf32>
      %c0_29 = arith.constant 0 : index
      %76 = arith.index_cast %28 : i32 to index
      %c0_30 = arith.constant 0 : index
      %c0_31 = arith.constant 0 : index
      %77 = vector.load %arg3[%c0_29, %76, %c0_30, %c0_31] : memref<1x8x2x128xf32, #tpu.memory_space<vmem>>, vector<1x1x2x128xf32>
      %78 = vector.shape_cast %77 : vector<1x1x2x128xf32> to vector<2x128xf32>
      %79 = vector.shape_cast %75 : vector<2x128xf32> to vector<1x1x2x128xf32>
      tpu.vector_store %arg3[%c0_29, %76, %c0_30, %c0_31], %79 {strides = array<i32>} : memref<1x8x2x128xf32, #tpu.memory_space<vmem>>, vector<1x1x2x128xf32>,
      scf.yield %63, %61 : vector<2x128xf32>, vector<2x128xf32>
    }
    %c8_i32_9 = arith.constant 8 : i32
    return
  }
  func.func @transform_0(%arg0: i32) -> (i32, i32, i32, i32) {
    %c0_i32 = arith.constant 0 : i32
    %c0_i32_0 = arith.constant 0 : i32
    %c0_i32_1 = arith.constant 0 : i32
    %c0_i32_2 = arith.constant 0 : i32
    return %arg0, %c0_i32, %c0_i32_0, %c0_i32_1 : i32, i32, i32, i32
  }
  func.func @transform_1(%arg0: i32) -> (i32, i32, i32) {
    %c0_i32 = arith.constant 0 : i32
    %c0_i32_0 = arith.constant 0 : i32
    %c0_i32_1 = arith.constant 0 : i32
    return %arg0, %c0_i32, %c0_i32_0 : i32, i32, i32
  }
  func.func @transform_2(%arg0: i32) -> (i32, i32, i32, i32) {
    %c0_i32 = arith.constant 0 : i32
    %c0_i32_0 = arith.constant 0 : i32
    %c0_i32_1 = arith.constant 0 : i32
    %c0_i32_2 = arith.constant 0 : i32
    return %arg0, %c0_i32, %c0_i32_0, %c0_i32_1 : i32, i32, i32, i32
  }
}

module attributes {stable_mosaic.version = 11 : i64} {
  func.func @kernel(%arg0: i32, %arg1: memref<3x8x2x128xf32, #tpu.memory_space<vmem>>, %arg2: memref<128x128xbf16, #tpu.memory_space<vmem>>, %arg3: memref<1x128xf32, #tpu.memory_space<vmem>>, %arg4: memref<1x128xf32, #tpu.memory_space<vmem>>, %arg5: memref<1x1xf32, #tpu.memory_space<vmem>>, %arg6: memref<128x128xbf16, #tpu.memory_space<vmem>>, %arg7: memref<1x128xf32, #tpu.memory_space<vmem>>, %arg8: memref<128x8xbf16, #tpu.memory_space<vmem>>, %arg9: memref<1x8xf32, #tpu.memory_space<vmem>>, %arg10: memref<2x8xf32, #tpu.memory_space<vmem>>, %arg11: memref<2x128xf32, #tpu.memory_space<vmem>>) attributes {dimension_semantics = [#tpu.dimension_semantics<arbitrary>], iteration_bounds = array<i64: 1>, scalar_prefetch = 0 : i64, scratch_operands = 1 : i64, tpu.core_type = #tpu.core_type<tc>, window_params = [{transform_indices = @transform_0, window_bounds = array<i64: 3, 8, 2, 128>}, {pipeline_mode = #tpu.pipeline_mode<synchronous>, transform_indices = @transform_1, window_bounds = array<i64: 128, 128>}, {pipeline_mode = #tpu.pipeline_mode<synchronous>, transform_indices = @transform_2, window_bounds = array<i64: 1, 128>}, {pipeline_mode = #tpu.pipeline_mode<synchronous>, transform_indices = @transform_3, window_bounds = array<i64: 1, 128>}, {pipeline_mode = #tpu.pipeline_mode<synchronous>, transform_indices = @transform_4, window_bounds = array<i64: 1, 1>}, {pipeline_mode = #tpu.pipeline_mode<synchronous>, transform_indices = @transform_5, window_bounds = array<i64: 128, 128>}, {pipeline_mode = #tpu.pipeline_mode<synchronous>, transform_indices = @transform_6, window_bounds = array<i64: 1, 128>}, {pipeline_mode = #tpu.pipeline_mode<synchronous>, transform_indices = @transform_7, window_bounds = array<i64: 128, 8>}, {pipeline_mode = #tpu.pipeline_mode<synchronous>, transform_indices = @transform_8, window_bounds = array<i64: 1, 8>}, {pipeline_mode = #tpu.pipeline_mode<synchronous>, transform_indices = @transform_9, window_bounds = array<i64: 2, 8>}]} {
    %c0_i32 = arith.constant 0 : i32
    %0 = arith.cmpi eq, %arg0, %c0_i32 : i32
    %1 = arith.extui %0 : i1 to i32
    %c0_i32_0 = arith.constant 0 : i32
    %2 = arith.cmpi ne, %1, %c0_i32_0 : i32
    scf.if %2 {
      %cst_20 = arith.constant 0.000000e+00 : f32
      %66 = vector.broadcast %cst_20 : f32 to vector<2x128xf32>
      %c0_21 = arith.constant 0 : index
      %c0_22 = arith.constant 0 : index
      %67 = vector.load %arg11[%c0_21, %c0_22] : memref<2x128xf32, #tpu.memory_space<vmem>>, vector<2x128xf32>
      tpu.vector_store %arg11[%c0_21, %c0_22], %66 {strides = array<i32>} : memref<2x128xf32, #tpu.memory_space<vmem>>, vector<2x128xf32>,
    } else {
    }
    %c0 = arith.constant 0 : index
    %c0_1 = arith.constant 0 : index
    %c0_2 = arith.constant 0 : index
    %c0_3 = arith.constant 0 : index
    %3 = vector.load %arg1[%c0, %c0_1, %c0_2, %c0_3] : memref<3x8x2x128xf32, #tpu.memory_space<vmem>>, vector<3x8x2x128xf32>
    %4 = vector.shape_cast %3 : vector<3x8x2x128xf32> to vector<48x128xf32>
    %5 = arith.truncf %4 : vector<48x128xf32> to vector<48x128xbf16>
    %c0_4 = arith.constant 0 : index
    %c0_5 = arith.constant 0 : index
    %6 = vector.load %arg2[%c0_4, %c0_5] : memref<128x128xbf16, #tpu.memory_space<vmem>>, vector<128x128xbf16>
    %cst = arith.constant dense<0.000000e+00> : vector<48x128xf32>
    %7 = tpu.matmul %5, %6, %cst {dimension_numbers = #tpu.dot_dimension_numbers<[1], [0], [0], [1], [0, 0, 1, 1], [], []>} : vector<48x128xbf16>, vector<128x128xbf16>, vector<48x128xf32> -> vector<48x128xf32>
    %c0_6 = arith.constant 0 : index
    %c0_7 = arith.constant 0 : index
    %8 = vector.load %arg3[%c0_6, %c0_7] : memref<1x128xf32, #tpu.memory_space<vmem>>, vector<1x128xf32>
    %9 = vector.broadcast %8 : vector<1x128xf32> to vector<48x128xf32>
    %10 = arith.addf %7, %9 : vector<48x128xf32>
    %11 = math.tanh %10 : vector<48x128xf32>
    %c0_8 = arith.constant 0 : index
    %c0_9 = arith.constant 0 : index
    %12 = vector.load %arg4[%c0_8, %c0_9] : memref<1x128xf32, #tpu.memory_space<vmem>>, vector<1x128xf32>
    %13 = vector.broadcast %12 : vector<1x128xf32> to vector<48x128xf32>
    %14 = arith.mulf %11, %13 : vector<48x128xf32>
    %cst_10 = arith.constant dense<0.000000e+00> : vector<48xf32>
    %15 = vector.multi_reduction <add>, %14, %cst_10 [1] : vector<48x128xf32> to vector<48xf32>
    %16 = vector.shape_cast %15 : vector<48xf32> to vector<48x1xf32>
    %c0_11 = arith.constant 0 : index
    %c0_12 = arith.constant 0 : index
    %17 = vector.load %arg5[%c0_11, %c0_12] : memref<1x1xf32, #tpu.memory_space<vmem>>, vector<1x1xf32>
    %18 = vector.broadcast %17 : vector<1x1xf32> to vector<48x1xf32>
    %19 = arith.addf %16, %18 : vector<48x1xf32>
    %20 = vector.shape_cast %19 : vector<48x1xf32> to vector<3x8x2x1xf32>
    %21 = vector.extract_strided_slice %20 {offsets = [0, 0, 0, 0], sizes = [1, 8, 2, 1], strides = [1, 1, 1, 1]} : vector<3x8x2x1xf32> to vector<1x8x2x1xf32>
    %22 = vector.shape_cast %21 : vector<1x8x2x1xf32> to vector<8x2x1xf32>
    %23 = vector.extract_strided_slice %20 {offsets = [1, 0, 0, 0], sizes = [1, 8, 2, 1], strides = [1, 1, 1, 1]} : vector<3x8x2x1xf32> to vector<1x8x2x1xf32>
    %24 = vector.shape_cast %23 : vector<1x8x2x1xf32> to vector<8x2x1xf32>
    %25 = arith.maximumf %22, %24 : vector<8x2x1xf32>
    %26 = vector.extract_strided_slice %20 {offsets = [2, 0, 0, 0], sizes = [1, 8, 2, 1], strides = [1, 1, 1, 1]} : vector<3x8x2x1xf32> to vector<1x8x2x1xf32>
    %27 = vector.shape_cast %26 : vector<1x8x2x1xf32> to vector<8x2x1xf32>
    %28 = arith.maximumf %25, %27 : vector<8x2x1xf32>
    %29 = vector.extract_strided_slice %20 {offsets = [0, 0, 0, 0], sizes = [1, 8, 2, 1], strides = [1, 1, 1, 1]} : vector<3x8x2x1xf32> to vector<1x8x2x1xf32>
    %30 = vector.shape_cast %29 : vector<1x8x2x1xf32> to vector<8x2x1xf32>
    %31 = arith.subf %30, %28 : vector<8x2x1xf32>
    %32 = math.exp %31 : vector<8x2x1xf32>
    %33 = vector.extract_strided_slice %20 {offsets = [1, 0, 0, 0], sizes = [1, 8, 2, 1], strides = [1, 1, 1, 1]} : vector<3x8x2x1xf32> to vector<1x8x2x1xf32>
    %34 = vector.shape_cast %33 : vector<1x8x2x1xf32> to vector<8x2x1xf32>
    %35 = arith.subf %34, %28 : vector<8x2x1xf32>
    %36 = math.exp %35 : vector<8x2x1xf32>
    %37 = vector.extract_strided_slice %20 {offsets = [2, 0, 0, 0], sizes = [1, 8, 2, 1], strides = [1, 1, 1, 1]} : vector<3x8x2x1xf32> to vector<1x8x2x1xf32>
    %38 = vector.shape_cast %37 : vector<1x8x2x1xf32> to vector<8x2x1xf32>
    %39 = arith.subf %38, %28 : vector<8x2x1xf32>
    %40 = math.exp %39 : vector<8x2x1xf32>
    %41 = arith.addf %32, %36 : vector<8x2x1xf32>
    %42 = arith.addf %41, %40 : vector<8x2x1xf32>
    %43 = vector.extract_strided_slice %3 {offsets = [0, 0, 0, 0], sizes = [1, 8, 2, 128], strides = [1, 1, 1, 1]} : vector<3x8x2x128xf32> to vector<1x8x2x128xf32>
    %44 = vector.shape_cast %43 : vector<1x8x2x128xf32> to vector<8x2x128xf32>
    %45 = vector.broadcast %32 : vector<8x2x1xf32> to vector<8x2x128xf32>
    %46 = arith.mulf %45, %44 : vector<8x2x128xf32>
    %47 = vector.extract_strided_slice %3 {offsets = [1, 0, 0, 0], sizes = [1, 8, 2, 128], strides = [1, 1, 1, 1]} : vector<3x8x2x128xf32> to vector<1x8x2x128xf32>
    %48 = vector.shape_cast %47 : vector<1x8x2x128xf32> to vector<8x2x128xf32>
    %49 = vector.broadcast %36 : vector<8x2x1xf32> to vector<8x2x128xf32>
    %50 = arith.mulf %49, %48 : vector<8x2x128xf32>
    %51 = arith.addf %46, %50 : vector<8x2x128xf32>
    %52 = vector.extract_strided_slice %3 {offsets = [2, 0, 0, 0], sizes = [1, 8, 2, 128], strides = [1, 1, 1, 1]} : vector<3x8x2x128xf32> to vector<1x8x2x128xf32>
    %53 = vector.shape_cast %52 : vector<1x8x2x128xf32> to vector<8x2x128xf32>
    %54 = vector.broadcast %40 : vector<8x2x1xf32> to vector<8x2x128xf32>
    %55 = arith.mulf %54, %53 : vector<8x2x128xf32>
    %56 = arith.addf %51, %55 : vector<8x2x128xf32>
    %57 = vector.broadcast %42 : vector<8x2x1xf32> to vector<8x2x128xf32>
    %58 = arith.divf %56, %57 : vector<8x2x128xf32>
    %c0_13 = arith.constant 0 : index
    %c0_14 = arith.constant 0 : index
    %59 = vector.load %arg11[%c0_13, %c0_14] : memref<2x128xf32, #tpu.memory_space<vmem>>, vector<2x128xf32>
    %cst_15 = arith.constant dense<0.000000e+00> : vector<2x128xf32>
    %60 = vector.multi_reduction <add>, %58, %cst_15 [0] : vector<8x2x128xf32> to vector<2x128xf32>
    %61 = arith.addf %59, %60 : vector<2x128xf32>
    %c0_16 = arith.constant 0 : index
    %c0_17 = arith.constant 0 : index
    %62 = vector.load %arg11[%c0_16, %c0_17] : memref<2x128xf32, #tpu.memory_space<vmem>>, vector<2x128xf32>
    tpu.vector_store %arg11[%c0_16, %c0_17], %61 {strides = array<i32>} : memref<2x128xf32, #tpu.memory_space<vmem>>, vector<2x128xf32>,
    %c0_i32_18 = arith.constant 0 : i32
    %63 = arith.cmpi eq, %arg0, %c0_i32_18 : i32
    %64 = arith.extui %63 : i1 to i32
    %c0_i32_19 = arith.constant 0 : i32
    %65 = arith.cmpi ne, %64, %c0_i32_19 : i32
    scf.if %65 {
      %c0_20 = arith.constant 0 : index
      %c0_21 = arith.constant 0 : index
      %66 = vector.load %arg11[%c0_20, %c0_21] : memref<2x128xf32, #tpu.memory_space<vmem>>, vector<2x128xf32>
      %cst_22 = arith.constant 1.250000e-01 : f32
      %67 = vector.broadcast %cst_22 : f32 to vector<2x128xf32>
      %68 = arith.mulf %66, %67 : vector<2x128xf32>
      %69 = arith.truncf %68 : vector<2x128xf32> to vector<2x128xbf16>
      %c0_23 = arith.constant 0 : index
      %c0_24 = arith.constant 0 : index
      %70 = vector.load %arg6[%c0_23, %c0_24] : memref<128x128xbf16, #tpu.memory_space<vmem>>, vector<128x128xbf16>
      %cst_25 = arith.constant dense<0.000000e+00> : vector<2x128xf32>
      %71 = tpu.matmul %69, %70, %cst_25 {dimension_numbers = #tpu.dot_dimension_numbers<[1], [0], [0], [1], [0, 0, 1, 1], [], []>} : vector<2x128xbf16>, vector<128x128xbf16>, vector<2x128xf32> -> vector<2x128xf32>
      %c0_26 = arith.constant 0 : index
      %c0_27 = arith.constant 0 : index
      %72 = vector.load %arg7[%c0_26, %c0_27] : memref<1x128xf32, #tpu.memory_space<vmem>>, vector<1x128xf32>
      %73 = vector.broadcast %72 : vector<1x128xf32> to vector<2x128xf32>
      %74 = arith.addf %71, %73 : vector<2x128xf32>
      %cst_28 = arith.constant 0.000000e+00 : f32
      %75 = vector.broadcast %cst_28 : f32 to vector<2x128xf32>
      %76 = arith.maximumf %74, %75 : vector<2x128xf32>
      %77 = arith.truncf %76 : vector<2x128xf32> to vector<2x128xbf16>
      %c0_29 = arith.constant 0 : index
      %c0_30 = arith.constant 0 : index
      %78 = vector.load %arg8[%c0_29, %c0_30] : memref<128x8xbf16, #tpu.memory_space<vmem>>, vector<128x8xbf16>
      %cst_31 = arith.constant dense<0.000000e+00> : vector<2x8xf32>
      %79 = tpu.matmul %77, %78, %cst_31 {dimension_numbers = #tpu.dot_dimension_numbers<[1], [0], [0], [1], [0, 0, 1, 1], [], []>} : vector<2x128xbf16>, vector<128x8xbf16>, vector<2x8xf32> -> vector<2x8xf32>
      %c0_32 = arith.constant 0 : index
      %c0_33 = arith.constant 0 : index
      %80 = vector.load %arg9[%c0_32, %c0_33] : memref<1x8xf32, #tpu.memory_space<vmem>>, vector<1x8xf32>
      %81 = vector.broadcast %80 : vector<1x8xf32> to vector<2x8xf32>
      %82 = arith.addf %79, %81 : vector<2x8xf32>
      %c0_34 = arith.constant 0 : index
      %c0_35 = arith.constant 0 : index
      %83 = vector.load %arg10[%c0_34, %c0_35] : memref<2x8xf32, #tpu.memory_space<vmem>>, vector<2x8xf32>
      tpu.vector_store %arg10[%c0_34, %c0_35], %82 {strides = array<i32>} : memref<2x8xf32, #tpu.memory_space<vmem>>, vector<2x8xf32>,
    } else {
    }
    return
  }
  func.func @transform_0(%arg0: i32) -> (i32, i32, i32, i32) {
    %c0_i32 = arith.constant 0 : i32
    %c0_i32_0 = arith.constant 0 : i32
    %c0_i32_1 = arith.constant 0 : i32
    %c0_i32_2 = arith.constant 0 : i32
    return %c0_i32, %arg0, %c0_i32_0, %c0_i32_1 : i32, i32, i32, i32
  }
  func.func @transform_1(%arg0: i32) -> (i32, i32) {
    %c0_i32 = arith.constant 0 : i32
    %c0_i32_0 = arith.constant 0 : i32
    %c0_i32_1 = arith.constant 0 : i32
    return %c0_i32, %c0_i32_0 : i32, i32
  }
  func.func @transform_2(%arg0: i32) -> (i32, i32) {
    %c0_i32 = arith.constant 0 : i32
    %c0_i32_0 = arith.constant 0 : i32
    %c0_i32_1 = arith.constant 0 : i32
    return %c0_i32, %c0_i32_0 : i32, i32
  }
  func.func @transform_3(%arg0: i32) -> (i32, i32) {
    %c0_i32 = arith.constant 0 : i32
    %c0_i32_0 = arith.constant 0 : i32
    %c0_i32_1 = arith.constant 0 : i32
    return %c0_i32, %c0_i32_0 : i32, i32
  }
  func.func @transform_4(%arg0: i32) -> (i32, i32) {
    %c0_i32 = arith.constant 0 : i32
    %c0_i32_0 = arith.constant 0 : i32
    %c0_i32_1 = arith.constant 0 : i32
    return %c0_i32, %c0_i32_0 : i32, i32
  }
  func.func @transform_5(%arg0: i32) -> (i32, i32) {
    %c0_i32 = arith.constant 0 : i32
    %c0_i32_0 = arith.constant 0 : i32
    %c0_i32_1 = arith.constant 0 : i32
    return %c0_i32, %c0_i32_0 : i32, i32
  }
  func.func @transform_6(%arg0: i32) -> (i32, i32) {
    %c0_i32 = arith.constant 0 : i32
    %c0_i32_0 = arith.constant 0 : i32
    %c0_i32_1 = arith.constant 0 : i32
    return %c0_i32, %c0_i32_0 : i32, i32
  }
  func.func @transform_7(%arg0: i32) -> (i32, i32) {
    %c0_i32 = arith.constant 0 : i32
    %c0_i32_0 = arith.constant 0 : i32
    %c0_i32_1 = arith.constant 0 : i32
    return %c0_i32, %c0_i32_0 : i32, i32
  }
  func.func @transform_8(%arg0: i32) -> (i32, i32) {
    %c0_i32 = arith.constant 0 : i32
    %c0_i32_0 = arith.constant 0 : i32
    %c0_i32_1 = arith.constant 0 : i32
    return %c0_i32, %c0_i32_0 : i32, i32
  }
  func.func @transform_9(%arg0: i32) -> (i32, i32) {
    %c0_i32 = arith.constant 0 : i32
    %c0_i32_0 = arith.constant 0 : i32
    %c0_i32_1 = arith.constant 0 : i32
    return %c0_i32, %c0_i32_0 : i32, i32
  }
}

</mosaic_0001>

<bundles_post_ra>
// kernel: multibranch_lstm.9
= control target key start
LH: loop header
LB: loop body
LE: loop exit
PB: predicated region body
PF: predicated region fallthrough
CT: control target
= control target key end

     0   :  { %s1270_s15 = smov 0   ;;  %s1272_s16 = smov 0   ;;  %s1490_s0 = inlined_call_operand.vmem [shape: bf16[3,256,9], index: 0, kind: input, shape index: {}]   ;;  %s1491_s1 = inlined_call_operand.vmem [shape: bf16[3,9,32], index: 1, kind: input, shape index: {}]   ;;  %s1492_s2 = inlined_call_operand.vmem [shape: f32[3,1,32], index: 2, kind: input, shape index: {}]   ;;  %s1493_s3 = inlined_call_operand.vmem [shape: f32[3,1,32], index: 3, kind: input, shape index: {}]   ;;  %s1494_s4 = inlined_call_operand.vmem [shape: bf16[3,256,32], index: 4, kind: output, shape index: {}]  }
   0x1   :  { %s1274_s17 = smov 0  }
   0x2 LB: > { %s26_s18 = sadd.s32 1, %s1238_s16  ;;  %p1014_p0 = scmp.ge.s32.totalorder %s1242_s17, 1  ;;  %s1242_s17 = sphi %s1274_s17, %s14_s17   ;;  %s1238_s16 = sphi %s1272_s16, %s1496_s16   ;;  %s1234_s15 = sphi %s1270_s15, %s1495_s15  }
   0x3   : > { %p28_p1 = scmp.ge.s32.totalorder %s26_s18, 3  ;;  %p209_p2 = scmp.lt.s32.totalorder %s1242_s17, 4 }
   0x5   : > { %s1498_s18 = smov (%p28_p1, %s26_s18), 0  ;;  %p210_p3 = pnand %p1014_p0, %p209_p2 }
   0x6   : > { %p255_p4 = scmp.lt.s32.totalorder (!%p210_p3), %s1234_s15, 2 }
   0x7   : > { %213 = sbr.rel (%p210_p3) target bundleno = 257 (0x101), region = 36 }
   0xc   : > { %vm454_vm0 = vcmask 1043456   ;;  %s1500_s15 = smov (!%p255_p4, %s1234_s15), 2  ;;  %vm455_vm1 = vcmask 1044480   ;;  %v1244_v0 = vmov 65535   ;;  %vm405_vm2 = vcmask 72704  }
   0xd   : > { %v456_v1 = vsel %vm454_vm0, 4294967295, %v1244_v0  ;;  %s1090_s19 = sshll.u32 %s1500_s15, 7  ;;  %s1091_s20 = sshll.u32 %s1500_s15, 3  ;;  %vm860_vm3 = vcmask 257024  }
   0xe   : > { %s1297_s23 = scalar_lea.vmem %s1490_s0, %s1090_s19  ;;  %s268_s26 = scalar_lea.vmem %s1491_s1, %s1091_s20  ;;  %v457_v2 = vsel %vm455_vm1, %v456_v1, 0 }
   0xf   : > { %v1203_v3 = vld [vmem:[%s268_s26] sm:$0x1f]   ;;  %v1206_v7 = vld [vmem:[%s1297_s23 + $0x8] sm:$0xff]   ;;  %v1208_v9 = vld [vmem:[%s1297_s23 + $0x10] sm:$0xff]   ;;  %s271_s29 = scalar_lea.vmem %s1492_s2, %s1500_s15  ;;  %s274_s6 = scalar_lea.vmem %s1493_s3, %s1500_s15 }
  0x10   : > { %v459_v4 = vand.u32 %v1203_v3, %v457_v2  ;;  %v1204_v5 = vld [vmem:[%s1297_s23] sm:$0xff]   ;;  %v1207_v8 = vld [vmem:[%s1297_s23 + $0x48] sm:$0xff]   ;;  %v1209_v10 = vld [vmem:[%s1297_s23 + $0x50] sm:$0xff]   ;;  %s1359_s9 = scalar_lea.vmem %s1494_s4, %s1090_s19 }
  0x11   : > { %v1205_v6 = vld [vmem:[%s1297_s23 + $0x40] sm:$0xff]   ;;  %1144 = vmatprep.mubr.msk.bf16.mxu0 %vm405_vm2, %v1204_v5  ;;  %v1210_v11 = vld [vmem:[%s1297_s23 + $0x18] sm:$0xff]   ;;  %v1214_v15 = vld [vmem:[%s1297_s23 + $0x28] sm:$0xff]  }
  0x12   : > { %1142 = vmatprep.subr.bf16.mxu0 %v459_v4  ;;  %1176 = vmatprep.subr.bf16.mxu1 %v459_v4  ;;  %v1211_v12 = vld [vmem:[%s1297_s23 + $0x58] sm:$0xff]   ;;  %v1212_v13 = vld [vmem:[%s1297_s23 + $0x20] sm:$0xff]   ;;  %v1215_v16 = vld [vmem:[%s1297_s23 + $0x68] sm:$0xff]  }
  0x13   : > { %1143 = vmatpush3.bf16.msra.mxu0 %v459_v4  ;;  %1177 = vmatpush3.bf16.msra.mxu1 %v459_v4  ;;  %v1213_v14 = vld [vmem:[%s1297_s23 + $0x60] sm:$0xff]   ;;  %v1216_v17 = vld [vmem:[%s1297_s23 + $0x30] sm:$0xff]   ;;  %v1218_v19 = vld [vmem:[%s1297_s23 + $0x38] sm:$0xff]  }
  0x14   : > { %1160 = vmatprep.mubr.msk.bf16.mxu1 %vm405_vm2, %v1205_v6  ;;  %v1217_v18 = vld [vmem:[%s1297_s23 + $0x70] sm:$0xff]   ;;  %v1219_v20 = vld [vmem:[%s1297_s23 + $0x78] sm:$0xff]   ;;  %v1342_v21 = vld [vmem:[%s271_s29] ss:$0 sm:$0xff] }
  0x15   : > { %v1344_v22 = vld [vmem:[%s274_s6] ss:$0 sm:$0xff] }
  0x16   : > { %1145 = vmatmul.mubr.msk.bf16.vlgmr.msra.gmra.mxu0 %vm405_vm2, %v1206_v7  ;;  %1161 = vmatmul.mubr.msk.bf16.vlgmr.msra.gmra.mxu1 %vm405_vm2, %v1207_v8 }
  0x17   : > { %1148 = vmatprep.mubr.msk.bf16.mxu0 %vm405_vm2, %v1208_v9  ;;  %1164 = vmatprep.mubr.msk.bf16.mxu1 %vm405_vm2, %v1209_v10 }
  0x1e   : > { %1149 = vmatmul.mubr.msk.bf16.gmra.mxu0 %vm405_vm2, %v1210_v11  ;;  %1165 = vmatmul.mubr.msk.bf16.gmra.mxu1 %vm405_vm2, %v1211_v12 }
  0x1f   : > { %1152 = vmatprep.mubr.msk.bf16.mxu0 %vm405_vm2, %v1212_v13  ;;  %1168 = vmatprep.mubr.msk.bf16.mxu1 %vm405_vm2, %v1213_v14 }
  0x26   : > { %1153 = vmatmul.mubr.msk.bf16.gmra.mxu0 %vm405_vm2, %v1214_v15  ;;  %1169 = vmatmul.mubr.msk.bf16.gmra.mxu1 %vm405_vm2, %v1215_v16 }
  0x27   : > { %1156 = vmatprep.mubr.msk.bf16.mxu0 %vm405_vm2, %v1216_v17  ;;  %1172 = vmatprep.mubr.msk.bf16.mxu1 %vm405_vm2, %v1217_v18 }
  0x2e   : > { %1157 = vmatmul.mubr.msk.bf16.gmra.mxu0 %vm405_vm2, %v1218_v19  ;;  %1173 = vmatmul.mubr.msk.bf16.gmra.mxu1 %vm405_vm2, %v1219_v20 }
  0xd6   : > { %v1146_v23 = vpop.f32.mrf.mxu0  ;;  %v1162_v24 = vpop.f32.mrf.mxu1 }
  0xd7   : > { %v631_v25 = vmul.f32 %v1146_v23, %v1342_v21  ;;  %v647_v26 = vmul.f32 %v1162_v24, %v1342_v21 }
  0xd8   : > { %v495_v27 = vpop.f32.mrf.mxu0  ;;  %v559_v28 = vpop.f32.mrf.mxu1 }
  0xd9   : > { %v670_v29 = vadd.f32 %v1344_v22, %v631_v25  ;;  %v686_v30 = vadd.f32 %v1344_v22, %v647_v26  ;;  %v629_v31 = vmul.f32 %v1342_v21, %v495_v27  ;;  %v645_v32 = vmul.f32 %v1342_v21, %v559_v28 }
  0xda   : > { %v1147_v33 = vpop.f32.mrf.mxu0  ;;  %v1163_v34 = vpop.f32.mrf.mxu1 }
  0xdb   : > { %v702_v35 = vmax.f32 %v670_v29, 0.0  ;;  %v718_v36 = vmax.f32 %v686_v30, 0.0  ;;  %v668_v37 = vadd.f32 %v1344_v22, %v629_v31  ;;  %v684_v38 = vadd.f32 %v1344_v22, %v645_v32 }
  0xdc   : > { %v632_v39 = vmul.f32 %v1147_v33, %v1342_v21  ;;  %v648_v40 = vmul.f32 %v1163_v34, %v1342_v21  ;;  %v498_v41 = vpop.f32.mrf.mxu0  ;;  %v562_v42 = vpop.f32.mrf.mxu1 }
  0xdd   : > { %v1095_v43 = vpack.c.bf16 %v702_v35, %v702_v35  ;;  %v1111_v44 = vpack.c.bf16 %v718_v36, %v718_v36  ;;  %v700_v45 = vmax.f32 %v668_v37, 0.0  ;;  %v716_v46 = vmax.f32 %v684_v38, 0.0 }
  0xde   : > { %v671_v47 = vadd.f32 %v1344_v22, %v632_v39  ;;  %v687_v48 = vadd.f32 %v1344_v22, %v648_v40  ;;  %v630_v49 = vmul.f32 %v1342_v21, %v498_v41  ;;  %v646_v50 = vmul.f32 %v1342_v21, %v562_v42  ;;  %v1150_v51 = vpop.f32.mrf.mxu0  ;;  %v1166_v52 = vpop.f32.mrf.mxu1 }
  0xdf   : > { %863 = vst.msk [vmem:[%s1359_s9 + $0x8] sm:$0xf] %vm860_vm3, %v1095_v43  ;;  %879 = vst.msk [vmem:[%s1359_s9 + $0x48] sm:$0xf] %vm860_vm3, %v1111_v44  ;;  %v1093_v53 = vpack.c.bf16 %v700_v45, %v700_v45  ;;  %v1109_v54 = vpack.c.bf16 %v716_v46, %v716_v46  ;;  %v635_v55 = vmul.f32 %v1150_v51, %v1342_v21 }
  0xe0   : > { %v651_v56 = vmul.f32 %v1166_v52, %v1342_v21  ;;  %v703_v57 = vmax.f32 %v671_v47, 0.0  ;;  %v719_v58 = vmax.f32 %v687_v48, 0.0  ;;  %v669_v59 = vadd.f32 %v1344_v22, %v630_v49  ;;  %v511_v61 = vpop.f32.mrf.mxu0  ;;  %v575_v62 = vpop.f32.mrf.mxu1 }
  0xe1   : > { %v685_v60 = vadd.f32 %v1344_v22, %v646_v50  ;;  %861 = vst.msk [vmem:[%s1359_s9] sm:$0xf] %vm860_vm3, %v1093_v53  ;;  %877 = vst.msk [vmem:[%s1359_s9 + $0x40] sm:$0xf] %vm860_vm3, %v1109_v54  ;;  %v674_v63 = vadd.f32 %v1344_v22, %v635_v55  ;;  %v633_v1 = vmul.f32 %v1342_v21, %v511_v61 }
  0xe2   : > { %v690_v0 = vadd.f32 %v1344_v22, %v651_v56  ;;  %v649_v2 = vmul.f32 %v1342_v21, %v575_v62  ;;  %v1096_v3 = vpack.c.bf16 %v703_v57, %v703_v57  ;;  %v1112_v4 = vpack.c.bf16 %v719_v58, %v719_v58  ;;  %v1151_v7 = vpop.f32.mrf.mxu0  ;;  %v1167_v8 = vpop.f32.mrf.mxu1 }
  0xe3   : > { %v701_v5 = vmax.f32 %v669_v59, 0.0  ;;  %v717_v6 = vmax.f32 %v685_v60, 0.0  ;;  %v706_v9 = vmax.f32 %v674_v63, 0.0  ;;  %v672_v11 = vadd.f32 %v1344_v22, %v633_v1 }
  0xe4   : > { %v722_v10 = vmax.f32 %v690_v0, 0.0  ;;  %v688_v12 = vadd.f32 %v1344_v22, %v649_v2  ;;  %864 = vst.msk [vmem:[%s1359_s9 + $0xc] sm:$0xf] %vm860_vm3, %v1096_v3  ;;  %880 = vst.msk [vmem:[%s1359_s9 + $0x4c] sm:$0xf] %vm860_vm3, %v1112_v4  ;;  %v636_v15 = vmul.f32 %v1151_v7, %v1342_v21  ;;  %v652_v16 = vmul.f32 %v1167_v8, %v1342_v21  ;;  %v514_v17 = vpop.f32.mrf.mxu0  ;;  %v578_v18 = vpop.f32.mrf.mxu1 }
  0xe5   : > { %v1094_v13 = vpack.c.bf16 %v701_v5, %v701_v5  ;;  %v1110_v14 = vpack.c.bf16 %v717_v6, %v717_v6  ;;  %v1099_v19 = vpack.c.bf16 %v706_v9, %v706_v9  ;;  %v704_v23 = vmax.f32 %v672_v11, 0.0 }
  0xe6   : > { %v1115_v20 = vpack.c.bf16 %v722_v10, %v722_v10  ;;  %v720_v24 = vmax.f32 %v688_v12, 0.0  ;;  %v675_v25 = vadd.f32 %v1344_v22, %v636_v15  ;;  %v691_v26 = vadd.f32 %v1344_v22, %v652_v16  ;;  %v1154_v29 = vpop.f32.mrf.mxu0  ;;  %v1170_v30 = vpop.f32.mrf.mxu1 }
  0xe7   : > { %862 = vst.msk [vmem:[%s1359_s9 + $0x4] sm:$0xf] %vm860_vm3, %v1094_v13  ;;  %878 = vst.msk [vmem:[%s1359_s9 + $0x44] sm:$0xf] %vm860_vm3, %v1110_v14  ;;  %v634_v27 = vmul.f32 %v1342_v21, %v514_v17  ;;  %v650_v28 = vmul.f32 %v1342_v21, %v578_v18  ;;  %v1097_v31 = vpack.c.bf16 %v704_v23, %v704_v23 }
  0xe8   : > { %867 = vst.msk [vmem:[%s1359_s9 + $0x18] sm:$0xf] %vm860_vm3, %v1099_v19  ;;  %883 = vst.msk [vmem:[%s1359_s9 + $0x58] sm:$0xf] %vm860_vm3, %v1115_v20  ;;  %v1113_v32 = vpack.c.bf16 %v720_v24, %v720_v24  ;;  %v639_v33 = vmul.f32 %v1154_v29, %v1342_v21  ;;  %v655_v34 = vmul.f32 %v1170_v30, %v1342_v21  ;;  %v707_v35 = vmax.f32 %v675_v25, 0.0  ;;  %v527_v39 = vpop.f32.mrf.mxu0  ;;  %v591_v40 = vpop.f32.mrf.mxu1 }
  0xe9   : > { %v723_v36 = vmax.f32 %v691_v26, 0.0  ;;  %v673_v37 = vadd.f32 %v1344_v22, %v634_v27  ;;  %v689_v38 = vadd.f32 %v1344_v22, %v650_v28  ;;  %865 = vst.msk [vmem:[%s1359_s9 + $0x10] sm:$0xf] %vm860_vm3, %v1097_v31  ;;  %v637_v43 = vmul.f32 %v1342_v21, %v527_v39 }
  0xea   : > { %881 = vst.msk [vmem:[%s1359_s9 + $0x50] sm:$0xf] %vm860_vm3, %v1113_v32  ;;  %v678_v41 = vadd.f32 %v1344_v22, %v639_v33  ;;  %v694_v42 = vadd.f32 %v1344_v22, %v655_v34  ;;  %v653_v44 = vmul.f32 %v1342_v21, %v591_v40  ;;  %v1100_v45 = vpack.c.bf16 %v707_v35, %v707_v35  ;;  %v1155_v49 = vpop.f32.mrf.mxu0  ;;  %v1171_v50 = vpop.f32.mrf.mxu1 }
  0xeb   : > { %v1116_v46 = vpack.c.bf16 %v723_v36, %v723_v36  ;;  %v705_v47 = vmax.f32 %v673_v37, 0.0  ;;  %v721_v48 = vmax.f32 %v689_v38, 0.0  ;;  %v676_v53 = vadd.f32 %v1344_v22, %v637_v43 }
  0xec   : > { %v710_v51 = vmax.f32 %v678_v41, 0.0  ;;  %v726_v52 = vmax.f32 %v694_v42, 0.0  ;;  %v692_v54 = vadd.f32 %v1344_v22, %v653_v44  ;;  %868 = vst.msk [vmem:[%s1359_s9 + $0x1c] sm:$0xf] %vm860_vm3, %v1100_v45  ;;  %v640_v57 = vmul.f32 %v1155_v49, %v1342_v21  ;;  %v530_v59 = vpop.f32.mrf.mxu0  ;;  %v594_v60 = vpop.f32.mrf.mxu1 }
  0xed   : > { %884 = vst.msk [vmem:[%s1359_s9 + $0x5c] sm:$0xf] %vm860_vm3, %v1116_v46  ;;  %v1098_v55 = vpack.c.bf16 %v705_v47, %v705_v47  ;;  %v1114_v56 = vpack.c.bf16 %v721_v48, %v721_v48  ;;  %v656_v58 = vmul.f32 %v1171_v50, %v1342_v21  ;;  %v708_v63 = vmax.f32 %v676_v53, 0.0 }
  0xee   : > { %v1103_v61 = vpack.c.bf16 %v710_v51, %v710_v51  ;;  %v1119_v62 = vpack.c.bf16 %v726_v52, %v726_v52  ;;  %v724_v0 = vmax.f32 %v692_v54, 0.0  ;;  %v679_v1 = vadd.f32 %v1344_v22, %v640_v57  ;;  %v1158_v5 = vpop.f32.mrf.mxu0  ;;  %v1174_v6 = vpop.f32.mrf.mxu1 }
  0xef   : > { %866 = vst.msk [vmem:[%s1359_s9 + $0x14] sm:$0xf] %vm860_vm3, %v1098_v55  ;;  %882 = vst.msk [vmem:[%s1359_s9 + $0x54] sm:$0xf] %vm860_vm3, %v1114_v56  ;;  %v695_v2 = vadd.f32 %v1344_v22, %v656_v58  ;;  %v638_v3 = vmul.f32 %v1342_v21, %v530_v59  ;;  %v654_v4 = vmul.f32 %v1342_v21, %v594_v60 }
  0xf0   : > { %871 = vst.msk [vmem:[%s1359_s9 + $0x28] sm:$0xf] %vm860_vm3, %v1103_v61  ;;  %887 = vst.msk [vmem:[%s1359_s9 + $0x68] sm:$0xf] %vm860_vm3, %v1119_v62  ;;  %v1101_v7 = vpack.c.bf16 %v708_v63, %v708_v63  ;;  %v1117_v8 = vpack.c.bf16 %v724_v0, %v724_v0  ;;  %v643_v9 = vmul.f32 %v1158_v5, %v1342_v21  ;;  %v711_v11 = vmax.f32 %v679_v1, 0.0  ;;  %v543_v15 = vpop.f32.mrf.mxu0  ;;  %v607_v16 = vpop.f32.mrf.mxu1 }
  0xf1   : > { %v659_v10 = vmul.f32 %v1174_v6, %v1342_v21  ;;  %v727_v12 = vmax.f32 %v695_v2, 0.0  ;;  %v677_v13 = vadd.f32 %v1344_v22, %v638_v3  ;;  %v693_v14 = vadd.f32 %v1344_v22, %v654_v4 }
  0xf2   : > { %869 = vst.msk [vmem:[%s1359_s9 + $0x20] sm:$0xf] %vm860_vm3, %v1101_v7  ;;  %885 = vst.msk [vmem:[%s1359_s9 + $0x60] sm:$0xf] %vm860_vm3, %v1117_v8  ;;  %v682_v17 = vadd.f32 %v1344_v22, %v643_v9  ;;  %v641_v19 = vmul.f32 %v1342_v21, %v543_v15  ;;  %v657_v20 = vmul.f32 %v1342_v21, %v607_v16  ;;  %v1159_v27 = vpop.f32.mrf.mxu0  ;;  %v1175_v28 = vpop.f32.mrf.mxu1 }
  0xf3   : > { %v698_v18 = vadd.f32 %v1344_v22, %v659_v10  ;;  %v1104_v23 = vpack.c.bf16 %v711_v11, %v711_v11  ;;  %v1120_v24 = vpack.c.bf16 %v727_v12, %v727_v12  ;;  %v709_v25 = vmax.f32 %v677_v13, 0.0 }
  0xf4   : > { %v725_v26 = vmax.f32 %v693_v14, 0.0  ;;  %v714_v29 = vmax.f32 %v682_v17, 0.0  ;;  %v680_v31 = vadd.f32 %v1344_v22, %v641_v19  ;;  %v696_v32 = vadd.f32 %v1344_v22, %v657_v20  ;;  %v546_v37 = vpop.f32.mrf.mxu0  ;;  %v610_v38 = vpop.f32.mrf.mxu1 }
  0xf5   : > { %v730_v30 = vmax.f32 %v698_v18, 0.0  ;;  %872 = vst.msk [vmem:[%s1359_s9 + $0x2c] sm:$0xf] %vm860_vm3, %v1104_v23  ;;  %888 = vst.msk [vmem:[%s1359_s9 + $0x6c] sm:$0xf] %vm860_vm3, %v1120_v24  ;;  %v1102_v33 = vpack.c.bf16 %v709_v25, %v709_v25  ;;  %v644_v35 = vmul.f32 %v1159_v27, %v1342_v21  ;;  %v660_v36 = vmul.f32 %v1175_v28, %v1342_v21 }
  0xf6   : > { %v1118_v34 = vpack.c.bf16 %v725_v26, %v725_v26  ;;  %v1107_v39 = vpack.c.bf16 %v714_v29, %v714_v29  ;;  %v712_v41 = vmax.f32 %v680_v31, 0.0  ;;  %v728_v42 = vmax.f32 %v696_v32, 0.0 }
  0xf7   : > { %v1123_v40 = vpack.c.bf16 %v730_v30, %v730_v30  ;;  %870 = vst.msk [vmem:[%s1359_s9 + $0x24] sm:$0xf] %vm860_vm3, %v1102_v33  ;;  %v683_v43 = vadd.f32 %v1344_v22, %v644_v35  ;;  %v699_v44 = vadd.f32 %v1344_v22, %v660_v36  ;;  %v642_v45 = vmul.f32 %v1342_v21, %v546_v37 }
  0xf8   : > { %886 = vst.msk [vmem:[%s1359_s9 + $0x64] sm:$0xf] %vm860_vm3, %v1118_v34  ;;  %v658_v46 = vmul.f32 %v1342_v21, %v610_v38  ;;  %875 = vst.msk [vmem:[%s1359_s9 + $0x38] sm:$0xf] %vm860_vm3, %v1107_v39  ;;  %v1105_v47 = vpack.c.bf16 %v712_v41, %v712_v41  ;;  %v1121_v48 = vpack.c.bf16 %v728_v42, %v728_v42 }
  0xf9   : > { %891 = vst.msk [vmem:[%s1359_s9 + $0x78] sm:$0xf] %vm860_vm3, %v1123_v40  ;;  %v715_v49 = vmax.f32 %v683_v43, 0.0  ;;  %v731_v50 = vmax.f32 %v699_v44, 0.0  ;;  %v681_v51 = vadd.f32 %v1344_v22, %v642_v45 }
  0xfa   : > { %v697_v52 = vadd.f32 %v1344_v22, %v658_v46  ;;  %873 = vst.msk [vmem:[%s1359_s9 + $0x30] sm:$0xf] %vm860_vm3, %v1105_v47  ;;  %889 = vst.msk [vmem:[%s1359_s9 + $0x70] sm:$0xf] %vm860_vm3, %v1121_v48 }
  0xfb   : > { %v1108_v21 = vpack.c.bf16 %v715_v49, %v715_v49  ;;  %v1124_v53 = vpack.c.bf16 %v731_v50, %v731_v50  ;;  %v713_v54 = vmax.f32 %v681_v51, 0.0 }
  0xfc   : > { %v729_v55 = vmax.f32 %v697_v52, 0.0 }
  0xfd   : > { %876 = vst.msk [vmem:[%s1359_s9 + $0x3c] sm:$0xf] %vm860_vm3, %v1108_v21  ;;  %892 = vst.msk [vmem:[%s1359_s9 + $0x7c] sm:$0xf] %vm860_vm3, %v1124_v53  ;;  %v1106_v56 = vpack.c.bf16 %v713_v54, %v713_v54 }
  0xfe   : > { %v1122_v57 = vpack.c.bf16 %v729_v55, %v729_v55 }
  0xff   : > { %874 = vst.msk [vmem:[%s1359_s9 + $0x34] sm:$0xf] %vm860_vm3, %v1106_v56 }
 0x100   : > { %890 = vst.msk [vmem:[%s1359_s9 + $0x74] sm:$0xf] %vm860_vm3, %v1122_v57 }
 0x101 PF: > { %s14_s17 = sadd.s32 1, %s1242_s17   ;;  %s1495_s15 = smov %s1238_s16 }
 0x102   : > { %p11_p5 = scmp.ge.s32.totalorder %s14_s17, 5   ;;  %s1496_s16 = smov %s1498_s18 }
 0x104   :  { %13 = sbr.rel (!%p11_p5) target bundleno = 2 (0x2), region = 75 }

// kernel: multibranch_lstm.10
= control target key start
LH: loop header
LB: loop body
LE: loop exit
PB: predicated region body
PF: predicated region fallthrough
CT: control target
= control target key end

     0   :  { %s1998_s15 = smov 0   ;;  %s2000_s16 = smov 0   ;;  %s2312_s0 = inlined_call_operand.vmem [shape: bf16[3,256,288], index: 0, kind: input, shape index: {}]   ;;  %s2313_s1 = inlined_call_operand.vmem [shape: bf16[3,288,64], index: 1, kind: input, shape index: {}]   ;;  %s2314_s2 = inlined_call_operand.vmem [shape: f32[3,1,64], index: 2, kind: input, shape index: {}]   ;;  %s2315_s3 = inlined_call_operand.vmem [shape: f32[3,1,64], index: 3, kind: input, shape index: {}]   ;;  %s2316_s4 = inlined_call_operand.vmem [shape: bf16[3,256,64], index: 4, kind: output, shape index: {}]  }
   0x1   :  { %s2002_s17 = smov 0  }
   0x2 LB: > { %s26_s18 = sadd.s32 1, %s1967_s16  ;;  %p1503_p0 = scmp.ge.s32.totalorder %s1971_s17, 1  ;;  %s1971_s17 = sphi %s2002_s17, %s14_s17   ;;  %s1967_s16 = sphi %s2000_s16, %s2318_s16   ;;  %s1963_s15 = sphi %s1998_s15, %s2317_s15  }
   0x3   : > { %p28_p1 = scmp.ge.s32.totalorder %s26_s18, 3  ;;  %p210_p2 = scmp.lt.s32.totalorder %s1971_s17, 4 }
   0x5   : > { %s2320_s18 = smov (%p28_p1, %s26_s18), 0  ;;  %p211_p3 = pnand %p1503_p0, %p210_p2 }
   0x6   : > { %p257_p4 = scmp.lt.s32.totalorder (!%p211_p3), %s1963_s15, 2 }
   0x7   : > { %214 = sbr.rel (%p211_p3) target bundleno = 349 (0x15d), region = 36 }
   0xc   : > { %s2322_s15 = smov (!%p257_p4, %s1963_s15), 2  ;;  %vm737_vm0 = vcmask 261120   ;;  %vm1346_vm1 = vcmask 519168  }
   0xd   : > { %s1842_s19 = smul.u32 144, %s2322_s15  ;;  %s274_s29 = scalar_lea.vmem %s2314_s2, %s2322_s15 }
   0xe   : > { %s1841_s23 = smul.u32 384, %s2322_s15  ;;  %s277_s6 = scalar_lea.vmem %s2315_s3, %s2322_s15 }
   0xf   : > { %s2022_s22 = scalar_lea.vmem %s2313_s1, %s1842_s19  ;;  %s1626_s7 = sshll.u32 %s2322_s15, 7 }
  0x10   : > { %v1867_v0 = vld [vmem:[%s2022_s22 + $0x78] sm:$0xff]   ;;  %v1869_v2 = vld [vmem:[%s2022_s22 + $0x70] sm:$0xff]   ;;  %v1871_v4 = vld [vmem:[%s2022_s22 + $0x68] sm:$0xff]   ;;  %s2037_s26 = scalar_lea.vmem %s2312_s0, %s1841_s23  ;;  %s2159_s10 = scalar_lea.vmem %s2316_s4, %s1626_s7 }
  0x11   : > { %v1868_v1 = vld [vmem:[%s2022_s22 + $0x38] sm:$0xff]   ;;  %1659 = vmatprep.subr.bf16.mxu0 %v1867_v0  ;;  %1825 = vmatprep.subr.bf16.mxu1 %v1867_v0  ;;  %v1870_v3 = vld [vmem:[%s2022_s22 + $0x30] sm:$0xff]   ;;  %v1872_v5 = vld [vmem:[%s2022_s22 + $0x28] sm:$0xff]  }
  0x12   : > { %1660 = vmatpush3.bf16.msra.mxu0 %v1868_v1  ;;  %1833 = vmatpush3.bf16.msra.mxu1 %v1868_v1  ;;  %v1873_v6 = vld [vmem:[%s2022_s22 + $0x60] sm:$0xff]   ;;  %v1875_v8 = vld [vmem:[%s2022_s22 + $0x58] sm:$0xff]   ;;  %v1877_v10 = vld [vmem:[%s2022_s22 + $0x50] sm:$0xff]  }
  0x13   : > { %1661 = vmatprep.subr.bf16.mxu0 %v1869_v2  ;;  %1826 = vmatprep.subr.bf16.mxu1 %v1869_v2  ;;  %v1874_v7 = vld [vmem:[%s2022_s22 + $0x20] sm:$0xff]   ;;  %v1876_v9 = vld [vmem:[%s2022_s22 + $0x18] sm:$0xff]   ;;  %v1878_v13 = vld [vmem:[%s2022_s22 + $0x10] sm:$0xff]  }
  0x14   : > { %v1885_v11 = vld [vmem:[%s2037_s26 + $0x4] ss:$12 sps:$4 sm:$0xff]   ;;  %v1879_v14 = vld [vmem:[%s2022_s22 + $0x48] sm:$0xff]   ;;  %v1896_v26 = vld [vmem:[%s2037_s26 + $0x34] ss:$12 sps:$4 sm:$0xff]  }
  0x15   : > { %v1888_v12 = vld [vmem:[%s2037_s26 + $0x124] ss:$12 sps:$4 sm:$0xff]   ;;  %818 = vmatprep.mubr.bf16.mxu0 %v1885_v11  ;;  %v1880_v15 = vld [vmem:[%s2022_s22 + $0x8] sm:$0xff]   ;;  %v1898_v27 = vld [vmem:[%s2037_s26 + $0x154] ss:$12 sps:$4 sm:$0xff]  }
  0x16   : > { %1662 = vmatpush3.bf16.msra.mxu0 %v1870_v3  ;;  %1834 = vmatpush3.bf16.msra.mxu1 %v1870_v3  ;;  %v1881_v16 = vld [vmem:[%s2022_s22 + $0x40] sm:$0xff]   ;;  %v1889_v18 = vld [vmem:[%s2022_s22 + $0x88] sm:$0xff]   ;;  %v1900_v28 = vld [vmem:[%s2037_s26 + $0x30] ss:$12 sps:$4 sm:$0xff]  }
  0x17   : > { %1663 = vmatprep.subr.bf16.mxu0 %v1871_v4  ;;  %1827 = vmatprep.subr.bf16.mxu1 %v1871_v4  ;;  %v1882_v17 = vld [vmem:[%s2022_s22] sm:$0xff]   ;;  %v1890_v21 = vld [vmem:[%s2037_s26 + $0x1c] ss:$12 sps:$4 sm:$0xff]   ;;  %v1903_v30 = vld [vmem:[%s2037_s26 + $0x4c] ss:$12 sps:$4 sm:$0xff]  }
  0x18   : > { %914 = vmatprep.mubr.bf16.mxu1 %v1888_v12  ;;  %v1883_v19 = vld [vmem:[%s2037_s26] ss:$12 sps:$4 sm:$0xff]   ;;  %v1892_v22 = vld [vmem:[%s2037_s26 + $0x13c] ss:$12 sps:$4 sm:$0xff]   ;;  %v1894_v24 = vld [vmem:[%s2037_s26 + $0x18] ss:$12 sps:$4 sm:$0xff]  }
  0x19   : > { %v1886_v20 = vld [vmem:[%s2037_s26 + $0x120] ss:$12 sps:$4 sm:$0xff]   ;;  %v1895_v25 = vld [vmem:[%s2037_s26 + $0x138] ss:$12 sps:$4 sm:$0xff]   ;;  %v1901_v29 = vld [vmem:[%s2037_s26 + $0x150] ss:$12 sps:$4 sm:$0xff]  }
  0x1a   : > { %1664 = vmatpush3.bf16.msra.mxu0 %v1872_v5  ;;  %1835 = vmatpush3.bf16.msra.mxu1 %v1872_v5  ;;  %v1902_v23 = vld [vmem:[%s2022_s22 + $0x80] sm:$0xff]   ;;  %v1905_v31 = vld [vmem:[%s2037_s26 + $0x16c] ss:$12 sps:$4 sm:$0xff]   ;;  %v1907_v32 = vld [vmem:[%s2037_s26 + $0x48] ss:$12 sps:$4 sm:$0xff]  }
  0x1b   : > { %1665 = vmatprep.subr.bf16.mxu0 %v1873_v6  ;;  %1828 = vmatprep.subr.bf16.mxu1 %v1873_v6  ;;  %v1908_v33 = vld [vmem:[%s2037_s26 + $0x168] ss:$12 sps:$4 sm:$0xff]   ;;  %v1909_v34 = vld [vmem:[%s2037_s26 + $0x64] ss:$12 sps:$4 sm:$0xff]   ;;  %v1912_v36 = vld [vmem:[%s2037_s26 + $0x60] ss:$12 sps:$4 sm:$0xff]  }
  0x1c   : > { %v1911_v35 = vld [vmem:[%s2037_s26 + $0x8] ss:$12 sps:$4 sm:$0xff]   ;;  %v1913_v37 = vld [vmem:[%s2037_s26 + $0x20] ss:$12 sps:$4 sm:$0xff]   ;;  %v1916_v39 = vld [vmem:[%s2037_s26 + $0x38] ss:$12 sps:$4 sm:$0xff]  }
  0x1d   : > { %v1914_v38 = vld [vmem:[%s2037_s26 + $0x7c] ss:$12 sps:$4 sm:$0xff]   ;;  %v1917_v40 = vld [vmem:[%s2037_s26 + $0x78] ss:$12 sps:$4 sm:$0xff]   ;;  %v1919_v42 = vld [vmem:[%s2037_s26 + $0x94] ss:$12 sps:$4 sm:$0xff]  }
  0x1e   : > { %1666 = vmatpush3.bf16.msra.mxu0 %v1874_v7  ;;  %1836 = vmatpush3.bf16.msra.mxu1 %v1874_v7  ;;  %v1918_v41 = vld [vmem:[%s2037_s26 + $0x50] ss:$12 sps:$4 sm:$0xff]   ;;  %v1921_v43 = vld [vmem:[%s2037_s26 + $0x68] ss:$12 sps:$4 sm:$0xff]   ;;  %v1923_v45 = vld [vmem:[%s2037_s26 + $0x80] ss:$12 sps:$4 sm:$0xff]  }
  0x1f   : > { %1667 = vmatprep.subr.bf16.mxu0 %v1875_v8  ;;  %1829 = vmatprep.subr.bf16.mxu1 %v1875_v8  ;;  %v1922_v44 = vld [vmem:[%s2037_s26 + $0x90] ss:$12 sps:$4 sm:$0xff]   ;;  %v1924_v46 = vld [vmem:[%s2037_s26 + $0xac] ss:$12 sps:$4 sm:$0xff]   ;;  %v1927_v48 = vld [vmem:[%s2037_s26 + $0xa8] ss:$12 sps:$4 sm:$0xff]  }
  0x20   : > { %v1926_v47 = vld [vmem:[%s2037_s26 + $0x98] ss:$12 sps:$4 sm:$0xff]   ;;  %v1928_v49 = vld [vmem:[%s2037_s26 + $0xb0] ss:$12 sps:$4 sm:$0xff]   ;;  %v1931_v51 = vld [vmem:[%s2037_s26 + $0xc8] ss:$12 sps:$4 sm:$0xff]  }
  0x21   : > { %v1929_v50 = vld [vmem:[%s2037_s26 + $0xc4] ss:$12 sps:$4 sm:$0xff]   ;;  %v1932_v52 = vld [vmem:[%s2037_s26 + $0xc0] ss:$12 sps:$4 sm:$0xff]   ;;  %v1934_v54 = vld [vmem:[%s2037_s26 + $0xdc] ss:$12 sps:$4 sm:$0xff]  }
  0x22   : > { %1668 = vmatpush3.bf16.msra.mxu0 %v1876_v9  ;;  %1837 = vmatpush3.bf16.msra.mxu1 %v1876_v9  ;;  %v1933_v53 = vld [vmem:[%s2037_s26 + $0xe0] ss:$12 sps:$4 sm:$0xff]   ;;  %v1936_v55 = vld [vmem:[%s2037_s26 + $0xf8] ss:$12 sps:$4 sm:$0xff]   ;;  %v1938_v57 = vld [vmem:[%s2037_s26 + $0x110] ss:$12 sps:$4 sm:$0xff]  }
  0x23   : > { %1669 = vmatprep.subr.bf16.mxu0 %v1877_v10  ;;  %1830 = vmatprep.subr.bf16.mxu1 %v1877_v10  ;;  %v1937_v56 = vld [vmem:[%s2037_s26 + $0xd8] ss:$12 sps:$4 sm:$0xff]   ;;  %v1939_v58 = vld [vmem:[%s2037_s26 + $0xf4] ss:$12 sps:$4 sm:$0xff]   ;;  %v1942_v60 = vld [vmem:[%s2037_s26 + $0xf0] ss:$12 sps:$4 sm:$0xff]  }
  0x24   : > { %v1941_v59 = vld [vmem:[%s2037_s26 + $0x128] ss:$12 sps:$4 sm:$0xff]   ;;  %v1943_v61 = vld [vmem:[%s2037_s26 + $0x140] ss:$12 sps:$4 sm:$0xff]   ;;  %v1946_v63 = vld [vmem:[%s2037_s26 + $0x158] ss:$12 sps:$4 sm:$0xff]  }
  0x25   : > { %v1944_v62 = vld [vmem:[%s2037_s26 + $0x10c] ss:$12 sps:$4 sm:$0xff]   ;;  %v1947_v0 = vld [vmem:[%s2037_s26 + $0x108] ss:$12 sps:$4 sm:$0xff]   ;;  %v1948_v1 = vld [vmem:[%s2037_s26 + $0x170] ss:$12 sps:$4 sm:$0xff]  }
  0x26   : > { %1670 = vmatpush3.bf16.msra.mxu0 %v1878_v13  ;;  %1838 = vmatpush3.bf16.msra.mxu1 %v1878_v13 }
  0x27   : > { %1671 = vmatprep.subr.bf16.mxu0 %v1879_v14  ;;  %1831 = vmatprep.subr.bf16.mxu1 %v1879_v14 }
  0x2a   : > { %1672 = vmatpush3.bf16.msra.mxu0 %v1880_v15  ;;  %1839 = vmatpush3.bf16.msra.mxu1 %v1880_v15 }
  0x2b   : > { %1673 = vmatprep.subr.bf16.mxu0 %v1881_v16  ;;  %1832 = vmatprep.subr.bf16.mxu1 %v1881_v16 }
  0x2e   : > { %1674 = vmatpush3.bf16.msra.mxu0 %v1882_v17  ;;  %1840 = vmatpush3.bf16.msra.mxu1 %v1882_v17 }
  0x2f   : > { %1789 = vmatprep.subr.bf16.mxu1 %v1889_v18 }
  0x31   : > { %819 = vmatmul.mubr.bf16.vlgmr.msra.gmra.mxu0 %v1883_v19  ;;  %915 = vmatmul.mubr.bf16.vlgmr.msra.gmra.mxu1 %v1886_v20 }
  0x32   : > { %1790 = vmatpush3.bf16.msra.mxu1 %v1889_v18  ;;  %826 = vmatprep.mubr.bf16.mxu0 %v1890_v21 }
  0x33   : > { %922 = vmatprep.mubr.bf16.mxu1 %v1892_v22  ;;  %1791 = vmatprep.subr.bf16.mxu1 %v1902_v23 }
  0x36   : > { %1792 = vmatpush3.bf16.msra.mxu1 %v1902_v23 }
  0x39   : > { %827 = vmatmul.mubr.bf16.gmra.mxu0 %v1894_v24  ;;  %923 = vmatmul.mubr.bf16.gmra.mxu1 %v1895_v25 }
  0x3a   : > { %834 = vmatprep.mubr.bf16.mxu0 %v1896_v26  ;;  %930 = vmatprep.mubr.bf16.mxu1 %v1898_v27 }
  0x41   : > { %835 = vmatmul.mubr.bf16.gmra.mxu0 %v1900_v28  ;;  %931 = vmatmul.mubr.bf16.gmra.mxu1 %v1901_v29 }
  0x42   : > { %842 = vmatprep.mubr.bf16.mxu0 %v1903_v30  ;;  %938 = vmatprep.mubr.bf16.mxu1 %v1905_v31 }
  0x49   : > { %843 = vmatmul.mubr.bf16.gmra.mxu0 %v1907_v32  ;;  %939 = vmatmul.mubr.bf16.gmra.mxu1 %v1908_v33 }
  0x4a   : > { %850 = vmatprep.mubr.bf16.mxu0 %v1909_v34  ;;  %1793 = vmatprep.mubr.msk.bf16.mxu1 %vm737_vm0, %v1911_v35 }
  0x51   : > { %851 = vmatmul.mubr.bf16.gmra.mxu0 %v1912_v36  ;;  %1794 = vmatmul.mubr.msk.bf16.vlgmr.msra.gmra.mxu1 %vm737_vm0, %v1913_v37 }
  0x52   : > { %858 = vmatprep.mubr.bf16.mxu0 %v1914_v38  ;;  %1797 = vmatprep.mubr.msk.bf16.mxu1 %vm737_vm0, %v1916_v39 }
  0x59   : > { %859 = vmatmul.mubr.bf16.gmra.mxu0 %v1917_v40  ;;  %1798 = vmatmul.mubr.msk.bf16.gmra.mxu1 %vm737_vm0, %v1918_v41 }
  0x5a   : > { %866 = vmatprep.mubr.bf16.mxu0 %v1919_v42  ;;  %1801 = vmatprep.mubr.msk.bf16.mxu1 %vm737_vm0, %v1921_v43  ;;  %v2142_v43 = vld [vmem:[%s274_s29] ss:$0 sm:$0xff] }
  0x61   : > { %867 = vmatmul.mubr.bf16.gmra.mxu0 %v1922_v44  ;;  %1802 = vmatmul.mubr.msk.bf16.gmra.mxu1 %vm737_vm0, %v1923_v45 }
  0x62   : > { %874 = vmatprep.mubr.bf16.mxu0 %v1924_v46  ;;  %1805 = vmatprep.mubr.msk.bf16.mxu1 %vm737_vm0, %v1926_v47  ;;  %v2144_v46 = vld [vmem:[%s277_s6] ss:$0 sm:$0xff] }
  0x69   : > { %875 = vmatmul.mubr.bf16.gmra.mxu0 %v1927_v48  ;;  %1806 = vmatmul.mubr.msk.bf16.gmra.mxu1 %vm737_vm0, %v1928_v49 }
  0x6a   : > { %882 = vmatprep.mubr.bf16.mxu0 %v1929_v50  ;;  %1809 = vmatprep.mubr.msk.bf16.mxu1 %vm737_vm0, %v1931_v51 }
  0x71   : > { %883 = vmatmul.mubr.bf16.gmra.mxu0 %v1932_v52  ;;  %1810 = vmatmul.mubr.msk.bf16.gmra.mxu1 %vm737_vm0, %v1933_v53 }
  0x72   : > { %890 = vmatprep.mubr.bf16.mxu0 %v1934_v54  ;;  %1813 = vmatprep.mubr.msk.bf16.mxu1 %vm737_vm0, %v1936_v55 }
  0x79   : > { %891 = vmatmul.mubr.bf16.gmra.mxu0 %v1937_v56  ;;  %1814 = vmatmul.mubr.msk.bf16.gmra.mxu1 %vm737_vm0, %v1938_v57 }
  0x7a   : > { %898 = vmatprep.mubr.bf16.mxu0 %v1939_v58  ;;  %1817 = vmatprep.mubr.msk.bf16.mxu1 %vm737_vm0, %v1941_v59 }
  0x81   : > { %899 = vmatmul.mubr.bf16.gmra.mxu0 %v1942_v60  ;;  %1818 = vmatmul.mubr.msk.bf16.gmra.mxu1 %vm737_vm0, %v1943_v61 }
  0x82   : > { %906 = vmatprep.mubr.bf16.mxu0 %v1944_v62  ;;  %1821 = vmatprep.mubr.msk.bf16.mxu1 %vm737_vm0, %v1946_v63 }
  0x89   : > { %907 = vmatmul.mubr.bf16.gmra.mxu0 %v1947_v0  ;;  %1822 = vmatmul.mubr.msk.bf16.gmra.mxu1 %vm737_vm0, %v1948_v1 }
  0xf1   : > { %v1675_v2 = vpop.f32.mrf.mxu0  ;;  %v1747_v3 = vpop.f32.mrf.mxu1 }
  0xf3   : > { %v1676_v4 = vpop.f32.mrf.mxu0  ;;  %v1748_v5 = vpop.f32.mrf.mxu1 }
  0xf4   : > { %v2112_v6 = vadd.f32 %v1748_v5, %v1747_v3  ;;  %v1677_v44 = vadd.f32 %v1676_v4, %v1675_v2 }
  0xf5   : > { %v1678_v7 = vpop.f32.mrf.mxu0  ;;  %v1750_v8 = vpop.f32.mrf.mxu1 }
  0xf7   : > { %v1679_v9 = vpop.f32.mrf.mxu0  ;;  %v1751_v10 = vpop.f32.mrf.mxu1 }
  0xf8   : > { %v2114_v11 = vadd.f32 %v1751_v10, %v1750_v8  ;;  %v1680_v57 = vadd.f32 %v1679_v9, %v1678_v7 }
  0xf9   : > { %v1681_v12 = vpop.f32.mrf.mxu0  ;;  %v1753_v13 = vpop.f32.mrf.mxu1 }
  0xfb   : > { %v1682_v14 = vpop.f32.mrf.mxu0  ;;  %v1754_v15 = vpop.f32.mrf.mxu1 }
  0xfc   : > { %v2116_v16 = vadd.f32 %v1754_v15, %v1753_v13  ;;  %v1683_v40 = vadd.f32 %v1682_v14, %v1681_v12 }
  0xfd   : > { %v1684_v17 = vpop.f32.mrf.mxu0  ;;  %v1756_v18 = vpop.f32.mrf.mxu1 }
  0xff   : > { %v1685_v19 = vpop.f32.mrf.mxu0  ;;  %v1757_v20 = vpop.f32.mrf.mxu1 }
 0x100   : > { %v2118_v21 = vadd.f32 %v1757_v20, %v1756_v18  ;;  %v1686_v49 = vadd.f32 %v1685_v19, %v1684_v17 }
 0x101   : > { %v1687_v22 = vpop.f32.mrf.mxu0  ;;  %v1759_v23 = vpop.f32.mrf.mxu1 }
 0x103   : > { %v1688_v24 = vpop.f32.mrf.mxu0  ;;  %v1760_v25 = vpop.f32.mrf.mxu1 }
 0x104   : > { %v2120_v26 = vadd.f32 %v1760_v25, %v1759_v23  ;;  %v1689_v8 = vadd.f32 %v1688_v24, %v1687_v22 }
 0x105   : > { %v1690_v27 = vpop.f32.mrf.mxu0  ;;  %v1762_v28 = vpop.f32.mrf.mxu1 }
 0x107   : > { %v1691_v29 = vpop.f32.mrf.mxu0  ;;  %v1763_v30 = vpop.f32.mrf.mxu1 }
 0x108   : > { %v2122_v31 = vadd.f32 %v1763_v30, %v1762_v28  ;;  %v1692_v25 = vadd.f32 %v1691_v29, %v1690_v27 }
 0x109   : > { %v1693_v32 = vpop.f32.mrf.mxu0  ;;  %v2124_v33 = vpop.f32.mrf.mxu1 }
 0x10b   : > { %v1694_v34 = vpop.f32.mrf.mxu0  ;;  %v2126_v35 = vpop.f32.mrf.mxu1 }
 0x10c   : > { %v1695_v60 = vadd.f32 %v1694_v34, %v1693_v32 }
 0x10d   : > { %v1696_v36 = vpop.f32.mrf.mxu0  ;;  %v2128_v37 = vpop.f32.mrf.mxu1 }
 0x10f   : > { %v1697_v38 = vpop.f32.mrf.mxu0  ;;  %v2134_v39 = vpop.f32.mrf.mxu1 }
 0x110   : > { %v1698_v13 = vadd.f32 %v1697_v38, %v1696_v36 }
 0x111   : > { %v2140_v41 = vpop.f32.mrf.mxu0  ;;  %v1795_v42 = vpop.f32.mrf.mxu1 }
 0x112   : > { %v990_v45 = vadd.f32 %v1795_v42, %v1683_v40 }
 0x113   : > { %v1700_v47 = vpop.f32.mrf.mxu0  ;;  %v981_v48 = vpop.f32.mrf.mxu1 }
 0x114   : > { %v1117_v50 = vmul.f32 %v2142_v43, %v990_v45  ;;  %v982_v51 = vadd.f32 %v1677_v44, %v981_v48 }
 0x115   : > { %v2147_v52 = vpop.f32.mrf.mxu0  ;;  %v1796_v53 = vpop.f32.mrf.mxu1 }
 0x116   : > { %v1156_v54 = vadd.f32 %v2144_v46, %v1117_v50  ;;  %v1115_v55 = vmul.f32 %v2142_v43, %v982_v51  ;;  %v993_v56 = vadd.f32 %v1796_v53, %v1686_v49 }
 0x117   : > { %v2152_v58 = vpop.f32.mrf.mxu0  ;;  %v984_v59 = vpop.f32.mrf.mxu1 }
 0x118   : > { %v1188_v61 = vmax.f32 %v1156_v54, 0.0  ;;  %v1154_v62 = vadd.f32 %v2144_v46, %v1115_v55  ;;  %v1118_v63 = vmul.f32 %v2142_v43, %v993_v56  ;;  %v985_v0 = vadd.f32 %v1680_v57, %v984_v59 }
 0x119   : > { %v1705_v1 = vpop.f32.mrf.mxu0  ;;  %v1799_v2 = vpop.f32.mrf.mxu1  ;;  %v1701_v54 = vadd.f32 %v1700_v47, %v2140_v41 }
 0x11a   : > { %v1629_v3 = vpack.c.bf16 %v1188_v61, %v1188_v61  ;;  %v1186_v4 = vmax.f32 %v1154_v62, 0.0  ;;  %v1157_v5 = vadd.f32 %v2144_v46, %v1118_v63  ;;  %v1006_v7 = vadd.f32 %v1799_v2, %v1695_v60 }
 0x11b   : > { %v1116_v9 = vmul.f32 %v2142_v43, %v985_v0  ;;  %v1706_v10 = vpop.f32.mrf.mxu0  ;;  %v997_v12 = vpop.f32.mrf.mxu1 }
 0x11c   : > { %1349 = vst.msk [vmem:[%s2159_s10 + $0x8] sm:$0xf] %vm1346_vm1, %v1629_v3  ;;  %v1627_v14 = vpack.c.bf16 %v1186_v4, %v1186_v4  ;;  %v1189_v15 = vmax.f32 %v1157_v5, 0.0  ;;  %v1121_v17 = vmul.f32 %v2142_v43, %v1006_v7  ;;  %v998_v19 = vadd.f32 %v1689_v8, %v997_v12 }
 0x11d   : > { %v1155_v18 = vadd.f32 %v2144_v46, %v1116_v9  ;;  %v1708_v20 = vpop.f32.mrf.mxu0  ;;  %v1800_v23 = vpop.f32.mrf.mxu1  ;;  %v1707_v40 = vadd.f32 %v1706_v10, %v1705_v1  ;;  %v1704_v5 = vadd.f32 %v2152_v58, %v2147_v52 }
 0x11e   : > { %1347 = vst.msk [vmem:[%s2159_s10] sm:$0xf] %vm1346_vm1, %v1627_v14  ;;  %v1630_v22 = vpack.c.bf16 %v1189_v15, %v1189_v15  ;;  %v1160_v24 = vadd.f32 %v2144_v46, %v1121_v17  ;;  %v1009_v28 = vadd.f32 %v1800_v23, %v1698_v13  ;;  %v1119_v32 = vmul.f32 %v2142_v43, %v998_v19 }
 0x11f   : > { %v1187_v30 = vmax.f32 %v1155_v18, 0.0  ;;  %v1709_v34 = vpop.f32.mrf.mxu0  ;;  %v1000_v36 = vpop.f32.mrf.mxu1 }
 0x120   : > { %1350 = vst.msk [vmem:[%s2159_s10 + $0xc] sm:$0xf] %vm1346_vm1, %v1630_v22  ;;  %v1192_v38 = vmax.f32 %v1160_v24, 0.0  ;;  %v1122_v42 = vmul.f32 %v2142_v43, %v1009_v28  ;;  %v1001_v27 = vadd.f32 %v1692_v25, %v1000_v36  ;;  %v1158_v44 = vadd.f32 %v2144_v46, %v1119_v32 }
 0x121   : > { %v1628_v29 = vpack.c.bf16 %v1187_v30, %v1187_v30  ;;  %v1711_v45 = vpop.f32.mrf.mxu0  ;;  %v1803_v48 = vpop.f32.mrf.mxu1  ;;  %v1710_v60 = vadd.f32 %v1709_v34, %v1708_v20 }
 0x122   : > { %v1633_v49 = vpack.c.bf16 %v1192_v38, %v1192_v38  ;;  %v1161_v50 = vadd.f32 %v2144_v46, %v1122_v42  ;;  %v1120_v51 = vmul.f32 %v2142_v43, %v1001_v27  ;;  %v1022_v53 = vadd.f32 %v1803_v48, %v1707_v40 }
 0x123   : > { %1348 = vst.msk [vmem:[%s2159_s10 + $0x4] sm:$0xf] %vm1346_vm1, %v1628_v29  ;;  %v1190_v55 = vmax.f32 %v1158_v44, 0.0  ;;  %v1712_v56 = vpop.f32.mrf.mxu0  ;;  %v1013_v57 = vpop.f32.mrf.mxu1 }
 0x124   : > { %1353 = vst.msk [vmem:[%s2159_s10 + $0x18] sm:$0xf] %vm1346_vm1, %v1633_v49  ;;  %v1193_v59 = vmax.f32 %v1161_v50, 0.0  ;;  %v1159_v61 = vadd.f32 %v2144_v46, %v1120_v51  ;;  %v1125_v62 = vmul.f32 %v2142_v43, %v1022_v53  ;;  %v1014_v0 = vadd.f32 %v1701_v54, %v1013_v57 }
 0x125   : > { %v1631_v63 = vpack.c.bf16 %v1190_v55, %v1190_v55  ;;  %v1714_v1 = vpop.f32.mrf.mxu0  ;;  %v1804_v2 = vpop.f32.mrf.mxu1  ;;  %v1713_v58 = vadd.f32 %v1712_v56, %v1711_v45 }
 0x126   : > { %v1634_v41 = vpack.c.bf16 %v1193_v59, %v1193_v59  ;;  %v1191_v47 = vmax.f32 %v1159_v61, 0.0  ;;  %v1164_v3 = vadd.f32 %v2144_v46, %v1125_v62  ;;  %v1025_v4 = vadd.f32 %v1804_v2, %v1710_v60 }
 0x127   : > { %1351 = vst.msk [vmem:[%s2159_s10 + $0x10] sm:$0xf] %vm1346_vm1, %v1631_v63  ;;  %v1123_v7 = vmul.f32 %v2142_v43, %v1014_v0  ;;  %v1715_v8 = vpop.f32.mrf.mxu0  ;;  %v1016_v9 = vpop.f32.mrf.mxu1 }
 0x128   : > { %1354 = vst.msk [vmem:[%s2159_s10 + $0x1c] sm:$0xf] %vm1346_vm1, %v1634_v41  ;;  %v1632_v10 = vpack.c.bf16 %v1191_v47, %v1191_v47  ;;  %v1196_v12 = vmax.f32 %v1164_v3, 0.0  ;;  %v1126_v13 = vmul.f32 %v2142_v43, %v1025_v4  ;;  %v1017_v15 = vadd.f32 %v1704_v5, %v1016_v9 }
 0x129   : > { %v1162_v14 = vadd.f32 %v2144_v46, %v1123_v7  ;;  %v1717_v17 = vpop.f32.mrf.mxu0  ;;  %v1807_v18 = vpop.f32.mrf.mxu1  ;;  %v1716_v42 = vadd.f32 %v1715_v8, %v1714_v1 }
 0x12a   : > { %1352 = vst.msk [vmem:[%s2159_s10 + $0x14] sm:$0xf] %vm1346_vm1, %v1632_v10  ;;  %v1637_v52 = vpack.c.bf16 %v1196_v12, %v1196_v12  ;;  %v1165_v19 = vadd.f32 %v2144_v46, %v1126_v13  ;;  %v1124_v23 = vmul.f32 %v2142_v43, %v1017_v15 }
 0x12b   : > { %v1194_v20 = vmax.f32 %v1162_v14, 0.0  ;;  %v1718_v25 = vpop.f32.mrf.mxu0  ;;  %v1029_v22 = vpop.f32.mrf.mxu1 }
 0x12c   : > { %1357 = vst.msk [vmem:[%s2159_s10 + $0x28] sm:$0xf] %vm1346_vm1, %v1637_v52  ;;  %v1197_v24 = vmax.f32 %v1165_v19, 0.0  ;;  %v1719_v28 = vadd.f32 %v1718_v25, %v1717_v17  ;;  %v1030_v30 = vadd.f32 %v1713_v58, %v1029_v22  ;;  %v1163_v34 = vadd.f32 %v2144_v46, %v1124_v23 }
 0x12d   : > { %v1635_v32 = vpack.c.bf16 %v1194_v20, %v1194_v20  ;;  %v1720_v36 = vpop.f32.mrf.mxu0  ;;  %v1808_v38 = vpop.f32.mrf.mxu1 }
 0x12e   : > { %v1638_v40 = vpack.c.bf16 %v1197_v24, %v1197_v24  ;;  %v1038_v27 = vadd.f32 %v1807_v18, %v1719_v28  ;;  %v1127_v29 = vmul.f32 %v2142_v43, %v1030_v30  ;;  %v1195_v44 = vmax.f32 %v1163_v34, 0.0 }
 0x12f   : > { %1355 = vst.msk [vmem:[%s2159_s10 + $0x20] sm:$0xf] %vm1346_vm1, %v1635_v32  ;;  %v1721_v45 = vpop.f32.mrf.mxu0  ;;  %v1032_v48 = vpop.f32.mrf.mxu1 }
 0x130   : > { %1358 = vst.msk [vmem:[%s2159_s10 + $0x2c] sm:$0xf] %vm1346_vm1, %v1638_v40  ;;  %v1129_v49 = vmul.f32 %v2142_v43, %v1038_v27  ;;  %v1166_v50 = vadd.f32 %v2144_v46, %v1127_v29  ;;  %v1722_v51 = vadd.f32 %v1721_v45, %v1720_v36  ;;  %v1033_v53 = vadd.f32 %v1716_v42, %v1032_v48 }
 0x131   : > { %v1636_v54 = vpack.c.bf16 %v1195_v44, %v1195_v44  ;;  %v1723_v55 = vpop.f32.mrf.mxu0  ;;  %v1811_v56 = vpop.f32.mrf.mxu1 }
 0x132   : > { %v1168_v57 = vadd.f32 %v2144_v46, %v1129_v49  ;;  %v1198_v59 = vmax.f32 %v1166_v50, 0.0  ;;  %v1041_v60 = vadd.f32 %v1808_v38, %v1722_v51  ;;  %v1128_v61 = vmul.f32 %v2142_v43, %v1033_v53 }
 0x133   : > { %1356 = vst.msk [vmem:[%s2159_s10 + $0x24] sm:$0xf] %vm1346_vm1, %v1636_v54  ;;  %v1724_v62 = vpop.f32.mrf.mxu0  ;;  %v1045_v63 = vpop.f32.mrf.mxu1 }
 0x134   : > { %v1200_v0 = vmax.f32 %v1168_v57, 0.0  ;;  %v1639_v1 = vpack.c.bf16 %v1198_v59, %v1198_v59  ;;  %v1130_v2 = vmul.f32 %v2142_v43, %v1041_v60  ;;  %v1167_v41 = vadd.f32 %v2144_v46, %v1128_v61 }
 0x135   : > { %v1725_v47 = vadd.f32 %v1724_v62, %v1723_v55  ;;  %v1726_v3 = vpop.f32.mrf.mxu0  ;;  %v1812_v4 = vpop.f32.mrf.mxu1 }
 0x136   : > { %v1641_v5 = vpack.c.bf16 %v1200_v0, %v1200_v0  ;;  %1359 = vst.msk [vmem:[%s2159_s10 + $0x30] sm:$0xf] %vm1346_vm1, %v1639_v1  ;;  %v1169_v7 = vadd.f32 %v2144_v46, %v1130_v2  ;;  %v1199_v8 = vmax.f32 %v1167_v41, 0.0  ;;  %v1767_v41 = vadd.f32 %v2126_v35, %v2124_v33 }
 0x137   : > { %v1046_v9 = vadd.f32 %v1725_v47, %v1045_v63  ;;  %v1727_v10 = vpop.f32.mrf.mxu0  ;;  %v1048_v12 = vpop.f32.mrf.mxu1 }
 0x138   : > { %1361 = vst.msk [vmem:[%s2159_s10 + $0x38] sm:$0xf] %vm1346_vm1, %v1641_v5  ;;  %v1201_v13 = vmax.f32 %v1169_v7, 0.0  ;;  %v1640_v14 = vpack.c.bf16 %v1199_v8, %v1199_v8  ;;  %v1728_v15 = vadd.f32 %v1727_v10, %v1726_v3  ;;  %v1770_v10 = vadd.f32 %v2134_v39, %v2128_v37 }
 0x139   : > { %v1131_v17 = vmul.f32 %v2142_v43, %v1046_v9  ;;  %v1729_v18 = vpop.f32.mrf.mxu0  ;;  %v2220_v52 = vpop.f32.mrf.mxu1 }
 0x13a   : > { %v1642_v58 = vpack.c.bf16 %v1201_v13, %v1201_v13  ;;  %1360 = vst.msk [vmem:[%s2159_s10 + $0x34] sm:$0xf] %vm1346_vm1, %v1640_v14  ;;  %v1049_v19 = vadd.f32 %v1728_v15, %v1048_v12 }
 0x13b   : > { %v1170_v20 = vadd.f32 %v2144_v46, %v1131_v17  ;;  %v1730_v23 = vpop.f32.mrf.mxu0  ;;  %v1061_v25 = vpop.f32.mrf.mxu1 }
 0x13c   : > { %1362 = vst.msk [vmem:[%s2159_s10 + $0x3c] sm:$0xf] %vm1346_vm1, %v1642_v58  ;;  %v1132_v22 = vmul.f32 %v2142_v43, %v1049_v19  ;;  %v1731_v24 = vadd.f32 %v1730_v23, %v1729_v18 }
 0x13d   : > { %v1202_v28 = vmax.f32 %v1170_v20, 0.0  ;;  %v1732_v30 = vpop.f32.mrf.mxu0  ;;  %v2228_v32 = vpop.f32.mrf.mxu1 }
 0x13e   : > { %v1171_v34 = vadd.f32 %v2144_v46, %v1132_v22  ;;  %v1054_v36 = vadd.f32 %v1811_v56, %v1731_v24 }
 0x13f   : > { %v1643_v38 = vpack.c.bf16 %v1202_v28, %v1202_v28  ;;  %v1733_v40 = vpop.f32.mrf.mxu0  ;;  %v1064_v42 = vpop.f32.mrf.mxu1 }
 0x140   : > { %v1203_v27 = vmax.f32 %v1171_v34, 0.0  ;;  %v1133_v29 = vmul.f32 %v2142_v43, %v1054_v36  ;;  %v1734_v44 = vadd.f32 %v1733_v40, %v1732_v30 }
 0x141   : > { %1363 = vst.msk [vmem:[%s2159_s10 + $0x40] sm:$0xf] %vm1346_vm1, %v1643_v38  ;;  %v1735_v45 = vpop.f32.mrf.mxu0  ;;  %v1819_v48 = vpop.f32.mrf.mxu1 }
 0x142   : > { %v1644_v49 = vpack.c.bf16 %v1203_v27, %v1203_v27  ;;  %v1172_v50 = vadd.f32 %v2144_v46, %v1133_v29  ;;  %v1057_v51 = vadd.f32 %v1812_v4, %v1734_v44  ;;  %v1086_v53 = vadd.f32 %v1819_v48, %v2116_v16 }
 0x143   : > { %v1736_v54 = vpop.f32.mrf.mxu0  ;;  %v1077_v55 = vpop.f32.mrf.mxu1 }
 0x144   : > { %1364 = vst.msk [vmem:[%s2159_s10 + $0x44] sm:$0xf] %vm1346_vm1, %v1644_v49  ;;  %v1204_v56 = vmax.f32 %v1172_v50, 0.0  ;;  %v1134_v57 = vmul.f32 %v2142_v43, %v1057_v51  ;;  %v1141_v59 = vmul.f32 %v2142_v43, %v1086_v53  ;;  %v1737_v60 = vadd.f32 %v1736_v54, %v1735_v45 }
 0x145   : > { %v1078_v61 = vadd.f32 %v2112_v6, %v1077_v55  ;;  %v1738_v62 = vpop.f32.mrf.mxu0  ;;  %v1820_v63 = vpop.f32.mrf.mxu1 }
 0x146   : > { %v1645_v0 = vpack.c.bf16 %v1204_v56, %v1204_v56  ;;  %v1173_v1 = vadd.f32 %v2144_v46, %v1134_v57  ;;  %v1180_v16 = vadd.f32 %v2144_v46, %v1141_v59  ;;  %v1062_v2 = vadd.f32 %v1737_v60, %v1061_v25 }
 0x147   : > { %v1139_v47 = vmul.f32 %v2142_v43, %v1078_v61  ;;  %v1089_v3 = vadd.f32 %v1820_v63, %v2118_v21  ;;  %v1739_v4 = vpop.f32.mrf.mxu0  ;;  %v1080_v5 = vpop.f32.mrf.mxu1 }
 0x148   : > { %1365 = vst.msk [vmem:[%s2159_s10 + $0x48] sm:$0xf] %vm1346_vm1, %v1645_v0  ;;  %v1205_v6 = vmax.f32 %v1173_v1, 0.0  ;;  %v1212_v7 = vmax.f32 %v1180_v16, 0.0  ;;  %v1135_v8 = vmul.f32 %v2142_v43, %v1062_v2  ;;  %v1740_v9 = vadd.f32 %v1739_v4, %v1738_v62 }
 0x149   : > { %v1178_v12 = vadd.f32 %v2144_v46, %v1139_v47  ;;  %v1142_v33 = vmul.f32 %v2142_v43, %v1089_v3  ;;  %v1081_v21 = vadd.f32 %v2114_v11, %v1080_v5  ;;  %v1741_v35 = vpop.f32.mrf.mxu0  ;;  %v1823_v13 = vpop.f32.mrf.mxu1 }
 0x14a   : > { %v1646_v14 = vpack.c.bf16 %v1205_v6, %v1205_v6  ;;  %v1653_v15 = vpack.c.bf16 %v1212_v7, %v1212_v7  ;;  %v1174_v17 = vadd.f32 %v2144_v46, %v1135_v8  ;;  %v1065_v18 = vadd.f32 %v1740_v9, %v1064_v42 }
 0x14b   : > { %v1210_v58 = vmax.f32 %v1178_v12, 0.0  ;;  %v1181_v19 = vadd.f32 %v2144_v46, %v1142_v33  ;;  %v1140_v37 = vmul.f32 %v2142_v43, %v1081_v21  ;;  %v1102_v39 = vadd.f32 %v1823_v13, %v1767_v41  ;;  %v1742_v20 = vpop.f32.mrf.mxu0  ;;  %v1093_v23 = vpop.f32.mrf.mxu1 }
 0x14c   : > { %1366 = vst.msk [vmem:[%s2159_s10 + $0x4c] sm:$0xf] %vm1346_vm1, %v1646_v14  ;;  %1373 = vst.msk [vmem:[%s2159_s10 + $0x68] sm:$0xf] %vm1346_vm1, %v1653_v15  ;;  %v1206_v11 = vmax.f32 %v1174_v17, 0.0  ;;  %v1136_v25 = vmul.f32 %v2142_v43, %v1065_v18  ;;  %v1743_v22 = vadd.f32 %v1742_v20, %v1741_v35  ;;  %v1094_v24 = vadd.f32 %v2120_v26, %v1093_v23 }
 0x14d   : > { %v1651_v28 = vpack.c.bf16 %v1210_v58, %v1210_v58  ;;  %v1213_v30 = vmax.f32 %v1181_v19, 0.0  ;;  %v1179_v34 = vadd.f32 %v2144_v46, %v1140_v37  ;;  %v1145_v36 = vmul.f32 %v2142_v43, %v1102_v39  ;;  %v1744_v38 = vpop.f32.mrf.mxu0  ;;  %v1824_v40 = vpop.f32.mrf.mxu1 }
 0x14e   : > { %v1647_v42 = vpack.c.bf16 %v1206_v11, %v1206_v11  ;;  %v1175_v27 = vadd.f32 %v2144_v46, %v1136_v25  ;;  %v1070_v29 = vadd.f32 %v2220_v52, %v1743_v22  ;;  %v1143_v44 = vmul.f32 %v2142_v43, %v1094_v24 }
 0x14f   : > { %1371 = vst.msk [vmem:[%s2159_s10 + $0x60] sm:$0xf] %vm1346_vm1, %v1651_v28  ;;  %v1654_v26 = vpack.c.bf16 %v1213_v30, %v1213_v30  ;;  %v1211_v45 = vmax.f32 %v1179_v34, 0.0  ;;  %v1184_v48 = vadd.f32 %v2144_v46, %v1145_v36  ;;  %v1105_v49 = vadd.f32 %v1824_v40, %v1770_v10  ;;  %v1745_v50 = vpop.f32.mrf.mxu0  ;;  %v1096_v51 = vpop.f32.mrf.mxu1 }
 0x150   : > { %1367 = vst.msk [vmem:[%s2159_s10 + $0x50] sm:$0xf] %vm1346_vm1, %v1647_v42  ;;  %v1207_v53 = vmax.f32 %v1175_v27, 0.0  ;;  %v1137_v54 = vmul.f32 %v2142_v43, %v1070_v29  ;;  %v1182_v52 = vadd.f32 %v2144_v46, %v1143_v44  ;;  %v1746_v55 = vadd.f32 %v1745_v50, %v1744_v38 }
 0x151   : > { %1374 = vst.msk [vmem:[%s2159_s10 + $0x6c] sm:$0xf] %vm1346_vm1, %v1654_v26  ;;  %v1652_v56 = vpack.c.bf16 %v1211_v45, %v1211_v45  ;;  %v1216_v57 = vmax.f32 %v1184_v48, 0.0  ;;  %v1146_v59 = vmul.f32 %v2142_v43, %v1105_v49  ;;  %v1097_v60 = vadd.f32 %v2122_v31, %v1096_v51 }
 0x152   : > { %v1648_v61 = vpack.c.bf16 %v1207_v53, %v1207_v53  ;;  %v1176_v62 = vadd.f32 %v2144_v46, %v1137_v54  ;;  %v1214_v63 = vmax.f32 %v1182_v52, 0.0  ;;  %v1073_v0 = vadd.f32 %v2228_v32, %v1746_v55 }
 0x153   : > { %1372 = vst.msk [vmem:[%s2159_s10 + $0x64] sm:$0xf] %vm1346_vm1, %v1652_v56  ;;  %v1657_v1 = vpack.c.bf16 %v1216_v57, %v1216_v57  ;;  %v1185_v16 = vadd.f32 %v2144_v46, %v1146_v59  ;;  %v1144_v2 = vmul.f32 %v2142_v43, %v1097_v60 }
 0x154   : > { %1368 = vst.msk [vmem:[%s2159_s10 + $0x54] sm:$0xf] %vm1346_vm1, %v1648_v61  ;;  %v1208_v41 = vmax.f32 %v1176_v62, 0.0  ;;  %v1655_v31 = vpack.c.bf16 %v1214_v63, %v1214_v63  ;;  %v1138_v47 = vmul.f32 %v2142_v43, %v1073_v0 }
 0x155   : > { %1377 = vst.msk [vmem:[%s2159_s10 + $0x78] sm:$0xf] %vm1346_vm1, %v1657_v1  ;;  %v1217_v32 = vmax.f32 %v1185_v16, 0.0  ;;  %v1183_v3 = vadd.f32 %v2144_v46, %v1144_v2 }
 0x156   : > { %v1649_v4 = vpack.c.bf16 %v1208_v41, %v1208_v41  ;;  %1375 = vst.msk [vmem:[%s2159_s10 + $0x70] sm:$0xf] %vm1346_vm1, %v1655_v31  ;;  %v1177_v5 = vadd.f32 %v2144_v46, %v1138_v47 }
 0x157   : > { %v1658_v6 = vpack.c.bf16 %v1217_v32, %v1217_v32  ;;  %v1215_v7 = vmax.f32 %v1183_v3, 0.0 }
 0x158   : > { %1369 = vst.msk [vmem:[%s2159_s10 + $0x58] sm:$0xf] %vm1346_vm1, %v1649_v4  ;;  %v1209_v8 = vmax.f32 %v1177_v5, 0.0 }
 0x159   : > { %1378 = vst.msk [vmem:[%s2159_s10 + $0x7c] sm:$0xf] %vm1346_vm1, %v1658_v6  ;;  %v1656_v9 = vpack.c.bf16 %v1215_v7, %v1215_v7 }
 0x15a   : > { %v1650_v10 = vpack.c.bf16 %v1209_v8, %v1209_v8 }
 0x15b   : > { %1376 = vst.msk [vmem:[%s2159_s10 + $0x74] sm:$0xf] %vm1346_vm1, %v1656_v9 }
 0x15c   : > { %1370 = vst.msk [vmem:[%s2159_s10 + $0x5c] sm:$0xf] %vm1346_vm1, %v1650_v10 }
 0x15d PF: > { %s14_s17 = sadd.s32 1, %s1971_s17   ;;  %s2317_s15 = smov %s1967_s16 }
 0x15e   : > { %p11_p5 = scmp.ge.s32.totalorder %s14_s17, 5   ;;  %s2318_s16 = smov %s2320_s18 }
 0x160   :  { %13 = sbr.rel (!%p11_p5) target bundleno = 2 (0x2), region = 75 }

// kernel: multibranch_lstm.12
= control target key start
LH: loop header
LB: loop body
LE: loop exit
PB: predicated region body
PF: predicated region fallthrough
CT: control target
= control target key end

     0   :  { %s431_s6 = smov 0   ;;  %s433_s7 = smov 0   ;;  %s500_s0 = inlined_call_operand.vmem [shape: bf16[3,2,16,8,128], index: 0, kind: input, shape index: {}]   ;;  %s501_s1 = inlined_call_operand.vmem [shape: f32[3,2,8,128], index: 1, kind: output, shape index: {}]  }
   0x1   :  { %s435_s8 = smov 0   ;;  %s437_s9 = smov 0  }
   0x2   :  { %s439_s10 = smov 0  }
   0x3 LB: > { %s20_s11 = sadd.s32 1, %s411_s8  ;;  %s23_s12 = sadd.s32 1, %s415_s9  ;;  %s419_s10 = sphi %s439_s10, %s11_s10   ;;  %s415_s9 = sphi %s437_s9, %s505_s9   ;;  %s411_s8 = sphi %s435_s8, %s504_s8   ;;  %s407_s7 = sphi %s433_s7, %s503_s7   ;;  %s403_s6 = sphi %s431_s6, %s502_s6  }
   0x4   : > { %p21_p0 = scmp.ge.s32.totalorder %s20_s11, 2  ;;  %p294_p1 = scmp.ge.s32.totalorder %s419_s10, 1 }
   0x5   : > { %p107_p2 = scmp.lt.s32.totalorder %s419_s10, 7 }
   0x6   : > { %s507_s11 = smov (%p21_p0, %s20_s11), 0  ;;  %s509_s12 = smov (!%p21_p0, %s23_s12), %s415_s9 }
   0x7   : > { %p108_p3 = pnand %p294_p1, %p107_p2  ;;  %p25_p4 = scmp.ge.s32.totalorder %s509_s12, 3 }
   0x8   : > { %p134_p5 = scmp.lt.s32.totalorder (!%p108_p3), %s407_s7, 2  ;;  %p136_p6 = scmp.lt.s32.totalorder (!%p108_p3), %s403_s6, 1 }
   0x9   : > { %s511_s12 = smov (%p25_p4, %s509_s12), 0  ;;  %111 = sbr.rel (%p108_p3) target bundleno = 55 (0x37), region = 24 }
   0xe   : > { %s513_s7 = smov (!%p134_p5, %s407_s7), 2  ;;  %s515_s6 = smov (!%p136_p6, %s403_s6), 1 }
   0xf   : > { %s296_s13 = sshll.u32 %s513_s7, 5  ;;  %s295_s14 = sshll.u32 %s515_s6, 4 }
  0x10   : > { %s140_s15 = sadd.s32 %s296_s13, %s295_s14  ;;  %s298_s20 = sshll.u32 %s513_s7, 1 }
  0x11   : > { %s297_s16 = sshll.u32 %s140_s15, 2  ;;  %s148_s21 = sadd.s32 %s298_s20, %s515_s6 }
  0x12   : > { %s470_s19 = scalar_lea.vmem %s500_s0, %s297_s16  ;;  %s299_s22 = sshll.u32 %s148_s21, 3 }
  0x13   : > { %v303_v0 = vld [vmem:[%s470_s19] sm:$0xff]   ;;  %v334_v1 = vld [vmem:[%s470_s19 + $0x8] sm:$0xff]   ;;  %v335_v5 = vld [vmem:[%s470_s19 + $0x10] sm:$0xff]   ;;  %s150_s25 = scalar_lea.vmem %s501_s1, %s299_s22 }
  0x14   : > { %v304_v2 = vunpack.c.l.bf16 %v303_v0  ;;  %v305_v3 = vunpack.c.h.bf16 %v303_v0  ;;  %v308_v4 = vunpack.c.l.bf16 %v334_v1  ;;  %v309_v6 = vunpack.c.h.bf16 %v334_v1  ;;  %v336_v10 = vld [vmem:[%s470_s19 + $0x18] sm:$0xff]   ;;  %v337_v15 = vld [vmem:[%s470_s19 + $0x20] sm:$0xff]   ;;  %v338_v20 = vld [vmem:[%s470_s19 + $0x28] sm:$0xff]  }
  0x15   : > { %v312_v8 = vunpack.c.l.bf16 %v335_v5  ;;  %v313_v11 = vunpack.c.h.bf16 %v335_v5  ;;  %v316_v13 = vunpack.c.l.bf16 %v336_v10  ;;  %v317_v16 = vunpack.c.h.bf16 %v336_v10  ;;  %v339_v25 = vld [vmem:[%s470_s19 + $0x30] sm:$0xff]   ;;  %v340_v30 = vld [vmem:[%s470_s19 + $0x38] sm:$0xff]  }
  0x16   : > { %v183_v7 = vadd.f32 %v305_v3, %v304_v2  ;;  %v320_v18 = vunpack.c.l.bf16 %v337_v15  ;;  %v321_v21 = vunpack.c.h.bf16 %v337_v15  ;;  %v324_v23 = vunpack.c.l.bf16 %v338_v20 }
  0x17   : > { %v325_v26 = vunpack.c.h.bf16 %v338_v20  ;;  %v328_v28 = vunpack.c.l.bf16 %v339_v25  ;;  %v329_v31 = vunpack.c.h.bf16 %v339_v25  ;;  %v332_v33 = vunpack.c.l.bf16 %v340_v30 }
  0x18   : > { %v184_v9 = vadd.f32 %v308_v4, %v183_v7  ;;  %v333_v35 = vunpack.c.h.bf16 %v340_v30 }
  0x1a   : > { %v185_v12 = vadd.f32 %v309_v6, %v184_v9 }
  0x1c   : > { %v186_v14 = vadd.f32 %v312_v8, %v185_v12 }
  0x1e   : > { %v187_v17 = vadd.f32 %v313_v11, %v186_v14 }
  0x20   : > { %v188_v19 = vadd.f32 %v316_v13, %v187_v17 }
  0x22   : > { %v189_v22 = vadd.f32 %v317_v16, %v188_v19 }
  0x24   : > { %v190_v24 = vadd.f32 %v320_v18, %v189_v22 }
  0x26   : > { %v191_v27 = vadd.f32 %v321_v21, %v190_v24 }
  0x28   : > { %v192_v29 = vadd.f32 %v324_v23, %v191_v27 }
  0x2a   : > { %v193_v32 = vadd.f32 %v325_v26, %v192_v29 }
  0x2c   : > { %v194_v34 = vadd.f32 %v328_v28, %v193_v32 }
  0x2e   : > { %v195_v36 = vadd.f32 %v329_v31, %v194_v34 }
  0x30   : > { %v196_v37 = vadd.f32 %v332_v33, %v195_v36 }
  0x32   : > { %v197_v38 = vadd.f32 %v333_v35, %v196_v37 }
  0x34   : > { %v199_v39 = vmul.f32 0.0625, %v197_v38 }
  0x36   : > { %200 = vst [vmem:[%s150_s25] sm:$0xff] %v199_v39 }
  0x37 PF: > { %s11_s10 = sadd.s32 1, %s419_s10   ;;  %s502_s6 = smov %s411_s8 }
  0x38   : > { %p8_p7 = scmp.ge.s32.totalorder %s11_s10, 8   ;;  %s503_s7 = smov %s415_s9 }
  0x39   : > { %s504_s8 = smov %s507_s11  ;;  %s505_s9 = smov %s511_s12 }
  0x3a   :  { %10 = sbr.rel (!%p8_p7) target bundleno = 3 (0x3), region = 54 }

// kernel: multibranch_lstm.13
= control target key start
LH: loop header
LB: loop body
LE: loop exit
PB: predicated region body
PF: predicated region fallthrough
CT: control target
= control target key end

     0   :  { %s852_s12 = smov 0   ;;  %s854_s13 = smov 0   ;;  %s931_s0 = inlined_call_operand.vmem [shape: bf16[3,16,128], index: 0, kind: input, shape index: {}]   ;;  %s932_s1 = inlined_call_operand.vmem [shape: bf16[3,128,512], index: 1, kind: input, shape index: {}]   ;;  %s933_s2 = inlined_call_operand.vmem [shape: f32[3,1,512], index: 2, kind: input, shape index: {}]   ;;  %s934_s3 = inlined_call_operand.vmem [shape: f32[3,16,512], index: 3, kind: output, shape index: {}]  }
   0x1   :  { %s856_s14 = smov 0  }
   0x2 LB: > { %s25_s15 = sadd.s32 1, %s825_s13  ;;  %p687_p0 = scmp.ge.s32.totalorder %s829_s14, 1  ;;  %s829_s14 = sphi %s856_s14, %s13_s14   ;;  %s825_s13 = sphi %s854_s13, %s936_s13   ;;  %s821_s12 = sphi %s852_s12, %s935_s12  }
   0x3   : > { %p27_p1 = scmp.ge.s32.totalorder %s25_s15, 3  ;;  %p177_p2 = scmp.lt.s32.totalorder %s829_s14, 4 }
   0x5   : > { %s938_s15 = smov (%p27_p1, %s25_s15), 0  ;;  %p178_p3 = pnand %p687_p0, %p177_p2 }
   0x6   : > { %p220_p4 = scmp.lt.s32.totalorder (!%p178_p3), %s821_s12, 2 }
   0x7   : > { %181 = sbr.rel (%p178_p3) target bundleno = 250 (0xfa), region = 32 }
   0xc   : > { %v831_v0 = vmov 0   ;;  %s940_s12 = smov (!%p220_p4, %s821_s12), 2  ;;  %v286_v34 = vlaneseq }
   0xd   : > { %504 = vmatprep.mubr.bf16.mxu0 %v831_v0  ;;  %547 = vmatprep.mubr.bf16.mxu1 %v831_v0  ;;  %s731_s16 = sshll.u32 %s940_s12, 8  ;;  %s730_s20 = sshll.u32 %s940_s12, 3 }
   0xe   : > { %s876_s19 = scalar_lea.vmem %s932_s1, %s731_s16  ;;  %s227_s23 = scalar_lea.vmem %s931_s0, %s730_s20  ;;  %v287_v35 = vshrl.u32 %v286_v34, 7 }
   0xf   : > { %v758_v1 = vld [vmem:[%s876_s19 + $0xe4] ss:$16 sps:$4 sm:$0xff]   ;;  %v760_v2 = vld [vmem:[%s876_s19 + $0xec] ss:$16 sps:$4 sm:$0xff]   ;;  %v762_v3 = vld [vmem:[%s876_s19 + $0xe0] ss:$16 sps:$4 sm:$0xff]  }
  0x10   : > { %472 = vmatprep.subr.bf16.mxu0 %v758_v1  ;;  %v763_v4 = vld [vmem:[%s876_s19 + $0xe8] ss:$16 sps:$4 sm:$0xff]   ;;  %515 = vmatprep.subr.bf16.mxu1 %v760_v2  ;;  %v764_v5 = vld [vmem:[%s876_s19 + $0xc4] ss:$16 sps:$4 sm:$0xff]   ;;  %v766_v6 = vld [vmem:[%s876_s19 + $0xcc] ss:$16 sps:$4 sm:$0xff]  }
  0x11   : > { %473 = vmatpush1.bf16.msra.mxu0 %v762_v3  ;;  %516 = vmatpush1.bf16.msra.mxu1 %v763_v4  ;;  %v768_v7 = vld [vmem:[%s876_s19 + $0xc0] ss:$16 sps:$4 sm:$0xff]   ;;  %v769_v8 = vld [vmem:[%s876_s19 + $0xc8] ss:$16 sps:$4 sm:$0xff]   ;;  %v770_v9 = vld [vmem:[%s876_s19 + $0xa4] ss:$16 sps:$4 sm:$0xff]  }
  0x12   : > { %474 = vmatprep.subr.bf16.mxu0 %v764_v5  ;;  %517 = vmatprep.subr.bf16.mxu1 %v766_v6  ;;  %v772_v10 = vld [vmem:[%s876_s19 + $0xac] ss:$16 sps:$4 sm:$0xff]   ;;  %v774_v11 = vld [vmem:[%s876_s19 + $0xa0] ss:$16 sps:$4 sm:$0xff]   ;;  %v775_v12 = vld [vmem:[%s876_s19 + $0xa8] ss:$16 sps:$4 sm:$0xff]  }
  0x13   : > { %v776_v13 = vld [vmem:[%s876_s19 + $0x84] ss:$16 sps:$4 sm:$0xff]   ;;  %v778_v14 = vld [vmem:[%s876_s19 + $0x8c] ss:$16 sps:$4 sm:$0xff]   ;;  %v780_v15 = vld [vmem:[%s876_s19 + $0x80] ss:$16 sps:$4 sm:$0xff]  }
  0x14   : > { %v781_v16 = vld [vmem:[%s876_s19 + $0x88] ss:$16 sps:$4 sm:$0xff]   ;;  %v782_v17 = vld [vmem:[%s876_s19 + $0x64] ss:$16 sps:$4 sm:$0xff]   ;;  %v784_v18 = vld [vmem:[%s876_s19 + $0x6c] ss:$16 sps:$4 sm:$0xff]  }
  0x15   : > { %475 = vmatpush1.bf16.msra.mxu0 %v768_v7  ;;  %518 = vmatpush1.bf16.msra.mxu1 %v769_v8  ;;  %v786_v19 = vld [vmem:[%s876_s19 + $0x60] ss:$16 sps:$4 sm:$0xff]   ;;  %v787_v20 = vld [vmem:[%s876_s19 + $0x68] ss:$16 sps:$4 sm:$0xff]   ;;  %v788_v21 = vld [vmem:[%s876_s19 + $0x44] ss:$16 sps:$4 sm:$0xff]  }
  0x16   : > { %476 = vmatprep.subr.bf16.mxu0 %v770_v9  ;;  %519 = vmatprep.subr.bf16.mxu1 %v772_v10  ;;  %v790_v22 = vld [vmem:[%s876_s19 + $0x4c] ss:$16 sps:$4 sm:$0xff]   ;;  %v792_v23 = vld [vmem:[%s876_s19 + $0x40] ss:$16 sps:$4 sm:$0xff]   ;;  %v793_v24 = vld [vmem:[%s876_s19 + $0x48] ss:$16 sps:$4 sm:$0xff]  }
  0x17   : > { %v794_v25 = vld [vmem:[%s876_s19 + $0x24] ss:$16 sps:$4 sm:$0xff]   ;;  %v796_v26 = vld [vmem:[%s876_s19 + $0x2c] ss:$16 sps:$4 sm:$0xff]   ;;  %v798_v27 = vld [vmem:[%s876_s19 + $0x20] ss:$16 sps:$4 sm:$0xff]  }
  0x18   : > { %v799_v28 = vld [vmem:[%s876_s19 + $0x28] ss:$16 sps:$4 sm:$0xff]   ;;  %v800_v29 = vld [vmem:[%s876_s19 + $0x4] ss:$16 sps:$4 sm:$0xff]   ;;  %v802_v30 = vld [vmem:[%s876_s19 + $0xc] ss:$16 sps:$4 sm:$0xff]  }
  0x19   : > { %477 = vmatpush1.bf16.msra.mxu0 %v774_v11  ;;  %520 = vmatpush1.bf16.msra.mxu1 %v775_v12  ;;  %v804_v31 = vld [vmem:[%s876_s19] ss:$16 sps:$4 sm:$0xff]   ;;  %v805_v32 = vld [vmem:[%s876_s19 + $0x8] ss:$16 sps:$4 sm:$0xff]   ;;  %s692_s24 = sshll.u32 %s940_s12, 2  ;;  %v288_v36 = vsub.s32 0, %v287_v35 }
  0x1a   : > { %478 = vmatprep.subr.bf16.mxu0 %v776_v13  ;;  %521 = vmatprep.subr.bf16.mxu1 %v778_v14  ;;  %v806_v33 = vld [vmem:[%s227_s23] sm:$0xff]   ;;  %s237_s27 = scalar_lea.vmem %s933_s2, %s692_s24  ;;  %v296_v37 = vsub.s32 2, %v287_v35  ;;  %v292_v39 = vsub.s32 1, %v287_v35  ;;  %v300_v40 = vsub.s32 3, %v287_v35  ;;  %s732_s28 = sshll.u32 %s940_s12, 6 }
  0x1b   : > { %v284_v38 = vld [vmem:[%s237_s27] sm:$0xf]  ;;  %s247_s4 = scalar_lea.vmem %s934_s3, %s732_s28 }
  0x1c   : > { %v289_v41 = vrot.slane %v284_v38, %v288_v36  ;;  %v297_v42 = vrot.slane %v284_v38, %v296_v37  ;;  %v293_v43 = vrot.slane %v284_v38, %v292_v39  ;;  %v301_v44 = vrot.slane %v284_v38, %v300_v40 }
  0x1d   : > { %479 = vmatpush1.bf16.msra.mxu0 %v780_v15  ;;  %522 = vmatpush1.bf16.msra.mxu1 %v781_v16 }
  0x1e   : > { %480 = vmatprep.subr.bf16.mxu0 %v782_v17  ;;  %523 = vmatprep.subr.bf16.mxu1 %v784_v18 }
  0x21   : > { %481 = vmatpush1.bf16.msra.mxu0 %v786_v19  ;;  %524 = vmatpush1.bf16.msra.mxu1 %v787_v20 }
  0x22   : > { %482 = vmatprep.subr.bf16.mxu0 %v788_v21  ;;  %525 = vmatprep.subr.bf16.mxu1 %v790_v22 }
  0x25   : > { %483 = vmatpush1.bf16.msra.mxu0 %v792_v23  ;;  %526 = vmatpush1.bf16.msra.mxu1 %v793_v24 }
  0x26   : > { %484 = vmatprep.subr.bf16.mxu0 %v794_v25  ;;  %527 = vmatprep.subr.bf16.mxu1 %v796_v26 }
  0x29   : > { %485 = vmatpush1.bf16.msra.mxu0 %v798_v27  ;;  %528 = vmatpush1.bf16.msra.mxu1 %v799_v28 }
  0x2a   : > { %486 = vmatprep.subr.bf16.mxu0 %v800_v29  ;;  %529 = vmatprep.subr.bf16.mxu1 %v802_v30 }
  0x2d   : > { %487 = vmatpush1.bf16.msra.mxu0 %v804_v31  ;;  %530 = vmatpush1.bf16.msra.mxu1 %v805_v32 }
  0x30   : > { %505 = vmatmul.mubr.bf16.vlgmr.msra.gmra.mxu0 %v806_v33  ;;  %548 = vmatmul.mubr.bf16.vlgmr.msra.gmra.mxu1 %v806_v33 }
  0xf0   : > { %v506_v45 = vpop.f32.mrf.mxu0  ;;  %v549_v46 = vpop.f32.mrf.mxu1 }
  0xf1   : > { %v507_v47 = vadd.f32 %v506_v45, %v289_v41  ;;  %v550_v48 = vadd.f32 %v549_v46, %v297_v42 }
  0xf2   : > { %v508_v49 = vpop.f32.mrf.mxu0  ;;  %v551_v50 = vpop.f32.mrf.mxu1 }
  0xf3   : > { %558 = vst [vmem:[%s247_s4] sm:$0xff] %v507_v47  ;;  %560 = vst [vmem:[%s247_s4 + $0x10] sm:$0xff] %v550_v48  ;;  %v509_v51 = vadd.f32 %v508_v49, %v293_v43  ;;  %v552_v52 = vadd.f32 %v551_v50, %v301_v44 }
  0xf4   : > { %v510_v53 = vpop.f32.mrf.mxu0  ;;  %v553_v54 = vpop.f32.mrf.mxu1 }
  0xf5   : > { %559 = vst [vmem:[%s247_s4 + $0x8] sm:$0xff] %v509_v51  ;;  %561 = vst [vmem:[%s247_s4 + $0x18] sm:$0xff] %v552_v52  ;;  %v511_v55 = vadd.f32 %v510_v53, %v289_v41  ;;  %v554_v56 = vadd.f32 %v553_v54, %v297_v42 }
  0xf6   : > { %v512_v57 = vpop.f32.mrf.mxu0  ;;  %v555_v58 = vpop.f32.mrf.mxu1 }
  0xf7   : > { %562 = vst [vmem:[%s247_s4 + $0x20] sm:$0xff] %v511_v55  ;;  %564 = vst [vmem:[%s247_s4 + $0x30] sm:$0xff] %v554_v56  ;;  %v513_v59 = vadd.f32 %v512_v57, %v293_v43  ;;  %v556_v60 = vadd.f32 %v555_v58, %v301_v44 }
  0xf9   : > { %563 = vst [vmem:[%s247_s4 + $0x28] sm:$0xff] %v513_v59  ;;  %565 = vst [vmem:[%s247_s4 + $0x38] sm:$0xff] %v556_v60 }
  0xfa PF: > { %s13_s14 = sadd.s32 1, %s829_s14   ;;  %s935_s12 = smov %s825_s13 }
  0xfb   : > { %p10_p5 = scmp.ge.s32.totalorder %s13_s14, 5   ;;  %s936_s13 = smov %s938_s15 }
  0xfd   :  { %12 = sbr.rel (!%p10_p5) target bundleno = 2 (0x2), region = 68 }

// kernel: multibranch_lstm.11
= control target key start
LH: loop header
LB: loop body
LE: loop exit
PB: predicated region body
PF: predicated region fallthrough
CT: control target
= control target key end

     0   :  { %s2823_s15 = smov 0   ;;  %s2825_s16 = smov 0   ;;  %s3313_s0 = inlined_call_operand.vmem [shape: bf16[3,256,576], index: 0, kind: input, shape index: {}]   ;;  %s3314_s1 = inlined_call_operand.vmem [shape: bf16[3,576,128], index: 1, kind: input, shape index: {}]   ;;  %s3315_s2 = inlined_call_operand.vmem [shape: f32[3,1,128], index: 2, kind: input, shape index: {}]   ;;  %s3316_s3 = inlined_call_operand.vmem [shape: f32[3,1,128], index: 3, kind: input, shape index: {}]   ;;  %s3317_s4 = inlined_call_operand.vmem [shape: bf16[3,256,128], index: 4, kind: output, shape index: {}]  }
   0x1   :  { %s2827_s17 = smov 0  }
   0x2 LB: > { %s26_s18 = sadd.s32 1, %s2792_s16  ;;  %p1999_p0 = scmp.ge.s32.totalorder %s2796_s17, 1  ;;  %s2796_s17 = sphi %s2827_s17, %s14_s17   ;;  %s2792_s16 = sphi %s2825_s16, %s3359_s16   ;;  %s2788_s15 = sphi %s2823_s15, %s3358_s15  }
   0x3   : > { %p28_p1 = scmp.ge.s32.totalorder %s26_s18, 3  ;;  %p210_p2 = scmp.lt.s32.totalorder %s2796_s17, 4 }
   0x5   : > { %s3361_s18 = smov (%p28_p1, %s26_s18), 0  ;;  %p211_p3 = pnand %p1999_p0, %p210_p2 }
   0x7   : > { %214 = sbr.rel (%p211_p3) target bundleno = 417 (0x1a1), region = 36 }
   0xc   : > { %p257_p4 = scmp.lt.s32.totalorder %s2788_s15, 2  ;;  %vm1073_vm0 = vcmask 523264  }
   0xe   : > { %s3363_s15 = smov (!%p257_p4, %s2788_s15), 2 }
   0xf   : > { %s2601_s19 = smul.u32 288, %s3363_s15  ;;  %s274_s29 = scalar_lea.vmem %s3315_s2, %s3363_s15 }
  0x10   : > { %s2600_s23 = smul.u32 640, %s3363_s15  ;;  %s277_s6 = scalar_lea.vmem %s3316_s3, %s3363_s15 }
  0x11   : > { %s2847_s22 = scalar_lea.vmem %s3314_s1, %s2601_s19  ;;  %s2172_s7 = sshll.u32 %s3363_s15, 7 }
  0x12   : > { %v2626_v0 = vld [vmem:[%s2847_s22 + $0x78] sm:$0xff]   ;;  %v2628_v2 = vld [vmem:[%s2847_s22 + $0x70] sm:$0xff]   ;;  %v2630_v4 = vld [vmem:[%s2847_s22 + $0x68] sm:$0xff]   ;;  %s2862_s26 = scalar_lea.vmem %s3313_s0, %s2600_s23  ;;  %s3158_s10 = scalar_lea.vmem %s3317_s4, %s2172_s7 }
  0x13   : > { %v2627_v1 = vld [vmem:[%s2847_s22 + $0x38] sm:$0xff]   ;;  %2300 = vmatprep.subr.bf16.mxu0 %v2626_v0  ;;  %2584 = vmatprep.subr.bf16.mxu1 %v2626_v0  ;;  %v2629_v3 = vld [vmem:[%s2847_s22 + $0x30] sm:$0xff]   ;;  %v2631_v5 = vld [vmem:[%s2847_s22 + $0x28] sm:$0xff]  }
  0x14   : > { %2301 = vmatpush3.bf16.msra.mxu0 %v2627_v1  ;;  %2592 = vmatpush3.bf16.msra.mxu1 %v2627_v1  ;;  %v2632_v6 = vld [vmem:[%s2847_s22 + $0x60] sm:$0xff]   ;;  %v2634_v8 = vld [vmem:[%s2847_s22 + $0x58] sm:$0xff]   ;;  %v2636_v10 = vld [vmem:[%s2847_s22 + $0x50] sm:$0xff]  }
  0x15   : > { %2302 = vmatprep.subr.bf16.mxu0 %v2628_v2  ;;  %2585 = vmatprep.subr.bf16.mxu1 %v2628_v2  ;;  %v2633_v7 = vld [vmem:[%s2847_s22 + $0x20] sm:$0xff]   ;;  %v2635_v9 = vld [vmem:[%s2847_s22 + $0x18] sm:$0xff]   ;;  %v2637_v13 = vld [vmem:[%s2847_s22 + $0x10] sm:$0xff]  }
  0x16   : > { %v2644_v11 = vld [vmem:[%s2862_s26 + $0x4] ss:$20 sps:$4 sm:$0xff]   ;;  %v2638_v14 = vld [vmem:[%s2847_s22 + $0x48] sm:$0xff]   ;;  %v2642_v20 = vld [vmem:[%s2862_s26] ss:$20 sps:$4 sm:$0xff]  }
  0x17   : > { %v2647_v12 = vld [vmem:[%s2862_s26 + $0x1e4] ss:$20 sps:$4 sm:$0xff]   ;;  %1154 = vmatprep.mubr.bf16.mxu0 %v2644_v11  ;;  %v2639_v15 = vld [vmem:[%s2847_s22 + $0x8] sm:$0xff]   ;;  %v2645_v21 = vld [vmem:[%s2862_s26 + $0x1e0] ss:$20 sps:$4 sm:$0xff]  }
  0x18   : > { %2303 = vmatpush3.bf16.msra.mxu0 %v2629_v3  ;;  %2593 = vmatpush3.bf16.msra.mxu1 %v2629_v3  ;;  %v2640_v16 = vld [vmem:[%s2847_s22 + $0x40] sm:$0xff]   ;;  %v2648_v18 = vld [vmem:[%s2847_s22 + $0xf8] sm:$0xff]   ;;  %v2650_v23 = vld [vmem:[%s2847_s22 + $0xf0] sm:$0xff]  }
  0x19   : > { %2304 = vmatprep.subr.bf16.mxu0 %v2630_v4  ;;  %2586 = vmatprep.subr.bf16.mxu1 %v2630_v4  ;;  %v2641_v17 = vld [vmem:[%s2847_s22] sm:$0xff]   ;;  %v2651_v19 = vld [vmem:[%s2847_s22 + $0x118] sm:$0xff]   ;;  %v2652_v26 = vld [vmem:[%s2847_s22 + $0xb0] sm:$0xff]  }
  0x1a   : > { %1250 = vmatprep.mubr.bf16.mxu1 %v2647_v12  ;;  %v2649_v22 = vld [vmem:[%s2847_s22 + $0xb8] sm:$0xff]   ;;  %v2653_v24 = vld [vmem:[%s2862_s26 + $0x2c] ss:$20 sps:$4 sm:$0xff]   ;;  %v2663_v32 = vld [vmem:[%s2862_s26 + $0x54] ss:$20 sps:$4 sm:$0xff]  }
  0x1b   : > { %v2655_v25 = vld [vmem:[%s2862_s26 + $0x20c] ss:$20 sps:$4 sm:$0xff]   ;;  %v2657_v27 = vld [vmem:[%s2862_s26 + $0x28] ss:$20 sps:$4 sm:$0xff]   ;;  %v2682_v35 = vld [vmem:[%s2847_s22 + $0x110] sm:$0xff]  }
  0x1c   : > { %2305 = vmatpush3.bf16.msra.mxu0 %v2631_v5  ;;  %2594 = vmatpush3.bf16.msra.mxu1 %v2631_v5  ;;  %v2659_v28 = vld [vmem:[%s2847_s22 + $0xe8] sm:$0xff]   ;;  %v2661_v31 = vld [vmem:[%s2847_s22 + $0xe0] sm:$0xff]   ;;  %v2669_v37 = vld [vmem:[%s2847_s22 + $0xd8] sm:$0xff]  }
  0x1d   : > { %2306 = vmatprep.subr.bf16.mxu0 %v2632_v6  ;;  %2587 = vmatprep.subr.bf16.mxu1 %v2632_v6  ;;  %v2658_v29 = vld [vmem:[%s2862_s26 + $0x208] ss:$20 sps:$4 sm:$0xff]   ;;  %v2662_v34 = vld [vmem:[%s2847_s22 + $0xa0] sm:$0xff]   ;;  %v2671_v40 = vld [vmem:[%s2847_s22 + $0xd0] sm:$0xff]  }
  0x1e   : > { %v2660_v30 = vld [vmem:[%s2847_s22 + $0xa8] sm:$0xff]   ;;  %v2667_v36 = vld [vmem:[%s2862_s26 + $0x50] ss:$20 sps:$4 sm:$0xff]   ;;  %v2670_v39 = vld [vmem:[%s2847_s22 + $0x98] sm:$0xff]  }
  0x1f   : > { %v2665_v33 = vld [vmem:[%s2862_s26 + $0x234] ss:$20 sps:$4 sm:$0xff]   ;;  %v2668_v38 = vld [vmem:[%s2862_s26 + $0x230] ss:$20 sps:$4 sm:$0xff]   ;;  %v2677_v44 = vld [vmem:[%s2862_s26 + $0x78] ss:$20 sps:$4 sm:$0xff]  }
  0x20   : > { %2307 = vmatpush3.bf16.msra.mxu0 %v2633_v7  ;;  %2595 = vmatpush3.bf16.msra.mxu1 %v2633_v7  ;;  %v2673_v41 = vld [vmem:[%s2862_s26 + $0x7c] ss:$20 sps:$4 sm:$0xff]   ;;  %v2678_v45 = vld [vmem:[%s2862_s26 + $0x258] ss:$20 sps:$4 sm:$0xff]   ;;  %v2681_v49 = vld [vmem:[%s2847_s22 + $0xc0] sm:$0xff]  }
  0x21   : > { %2308 = vmatprep.subr.bf16.mxu0 %v2634_v8  ;;  %2588 = vmatprep.subr.bf16.mxu1 %v2634_v8  ;;  %v2675_v42 = vld [vmem:[%s2862_s26 + $0x25c] ss:$20 sps:$4 sm:$0xff]   ;;  %v2679_v46 = vld [vmem:[%s2847_s22 + $0xc8] sm:$0xff]   ;;  %v2684_v50 = vld [vmem:[%s2862_s26 + $0xa4] ss:$20 sps:$4 sm:$0xff]  }
  0x22   : > { %v2672_v43 = vld [vmem:[%s2847_s22 + $0x90] sm:$0xff]   ;;  %v2702_v47 = vld [vmem:[%s2847_s22 + $0x108] sm:$0xff]   ;;  %v2683_v52 = vld [vmem:[%s2847_s22 + $0x80] sm:$0xff]  }
  0x23   : > { %v2680_v48 = vld [vmem:[%s2847_s22 + $0x88] sm:$0xff]   ;;  %v2689_v54 = vld [vmem:[%s2862_s26 + $0xa0] ss:$20 sps:$4 sm:$0xff]   ;;  %v2695_v59 = vld [vmem:[%s2862_s26 + $0x30] ss:$20 sps:$4 sm:$0xff]  }
  0x24   : > { %2309 = vmatpush3.bf16.msra.mxu0 %v2635_v9  ;;  %2596 = vmatpush3.bf16.msra.mxu1 %v2635_v9  ;;  %v2688_v51 = vld [vmem:[%s2862_s26 + $0xc] ss:$20 sps:$4 sm:$0xff]   ;;  %v2686_v53 = vld [vmem:[%s2862_s26 + $0x8] ss:$20 sps:$4 sm:$0xff]   ;;  %v2700_v62 = vld [vmem:[%s2862_s26 + $0xf0] ss:$20 sps:$4 sm:$0xff]  }
  0x25   : > { %2310 = vmatprep.subr.bf16.mxu0 %v2636_v10  ;;  %2589 = vmatprep.subr.bf16.mxu1 %v2636_v10  ;;  %v2690_v55 = vld [vmem:[%s2862_s26 + $0xcc] ss:$20 sps:$4 sm:$0xff]   ;;  %v2692_v57 = vld [vmem:[%s2862_s26 + $0x34] ss:$20 sps:$4 sm:$0xff]   ;;  %v2698_v61 = vld [vmem:[%s2862_s26 + $0x5c] ss:$20 sps:$4 sm:$0xff]  }
  0x26   : > { %v2721_v56 = vld [vmem:[%s2847_s22 + $0x100] sm:$0xff]   ;;  %v2694_v58 = vld [vmem:[%s2862_s26 + $0xc8] ss:$20 sps:$4 sm:$0xff]   ;;  %v2701_v63 = vld [vmem:[%s2862_s26 + $0x58] ss:$20 sps:$4 sm:$0xff]  }
  0x27   : > { %v2696_v60 = vld [vmem:[%s2862_s26 + $0xf4] ss:$20 sps:$4 sm:$0xff]   ;;  %v2703_v0 = vld [vmem:[%s2862_s26 + $0x11c] ss:$20 sps:$4 sm:$0xff]   ;;  %v2705_v1 = vld [vmem:[%s2862_s26 + $0x84] ss:$20 sps:$4 sm:$0xff]  }
  0x28   : > { %2311 = vmatpush3.bf16.msra.mxu0 %v2637_v13  ;;  %2597 = vmatpush3.bf16.msra.mxu1 %v2637_v13  ;;  %v2707_v2 = vld [vmem:[%s2862_s26 + $0x118] ss:$20 sps:$4 sm:$0xff]   ;;  %v2708_v3 = vld [vmem:[%s2862_s26 + $0x80] ss:$20 sps:$4 sm:$0xff]   ;;  %v2714_v7 = vld [vmem:[%s2862_s26 + $0xa8] ss:$20 sps:$4 sm:$0xff]  }
  0x29   : > { %2312 = vmatprep.subr.bf16.mxu0 %v2638_v14  ;;  %2590 = vmatprep.subr.bf16.mxu1 %v2638_v14  ;;  %v2709_v4 = vld [vmem:[%s2862_s26 + $0x144] ss:$20 sps:$4 sm:$0xff]   ;;  %v2711_v5 = vld [vmem:[%s2862_s26 + $0xac] ss:$20 sps:$4 sm:$0xff]   ;;  %v2717_v9 = vld [vmem:[%s2862_s26 + $0xd4] ss:$20 sps:$4 sm:$0xff]  }
  0x2a   : > { %v2713_v6 = vld [vmem:[%s2862_s26 + $0x140] ss:$20 sps:$4 sm:$0xff]   ;;  %v2719_v10 = vld [vmem:[%s2862_s26 + $0x168] ss:$20 sps:$4 sm:$0xff]   ;;  %v2720_v11 = vld [vmem:[%s2862_s26 + $0xd0] ss:$20 sps:$4 sm:$0xff]  }
  0x2b   : > { %v2715_v8 = vld [vmem:[%s2862_s26 + $0x16c] ss:$20 sps:$4 sm:$0xff]   ;;  %v2722_v12 = vld [vmem:[%s2862_s26 + $0x194] ss:$20 sps:$4 sm:$0xff]   ;;  %v2724_v13 = vld [vmem:[%s2862_s26 + $0xfc] ss:$20 sps:$4 sm:$0xff]  }
  0x2c   : > { %2313 = vmatpush3.bf16.msra.mxu0 %v2639_v15  ;;  %2598 = vmatpush3.bf16.msra.mxu1 %v2639_v15  ;;  %v2726_v14 = vld [vmem:[%s2862_s26 + $0x190] ss:$20 sps:$4 sm:$0xff]   ;;  %v2727_v15 = vld [vmem:[%s2862_s26 + $0xf8] ss:$20 sps:$4 sm:$0xff]  }
  0x2d   : > { %2314 = vmatprep.subr.bf16.mxu0 %v2640_v16  ;;  %2591 = vmatprep.subr.bf16.mxu1 %v2640_v16  ;;  %v2728_v16 = vld [vmem:[%s2862_s26 + $0x1bc] ss:$20 sps:$4 sm:$0xff]  }
  0x30   : > { %2315 = vmatpush3.bf16.msra.mxu0 %v2641_v17  ;;  %2599 = vmatpush3.bf16.msra.mxu1 %v2641_v17  ;;  %v2730_v17 = vld [vmem:[%s2862_s26 + $0x124] ss:$20 sps:$4 sm:$0xff]  }
  0x31   : > { %2412 = vmatprep.subr.bf16.mxu1 %v2648_v18  ;;  %2544 = vmatprep.subr.bf16.mxu0 %v2651_v19  ;;  %v2732_v18 = vld [vmem:[%s2862_s26 + $0x1b8] ss:$20 sps:$4 sm:$0xff]  }
  0x33   : > { %1155 = vmatmul.mubr.bf16.vlgmr.msra.gmra.mxu0 %v2642_v20  ;;  %1251 = vmatmul.mubr.bf16.vlgmr.msra.gmra.mxu1 %v2645_v21  ;;  %v2734_v20 = vld [vmem:[%s2862_s26 + $0x14c] ss:$20 sps:$4 sm:$0xff]   ;;  %v2736_v21 = vld [vmem:[%s2862_s26 + $0x10] ss:$20 sps:$4 sm:$0xff]  }
  0x34   : > { %2413 = vmatpush3.bf16.msra.mxu1 %v2649_v22  ;;  %2545 = vmatpush3.bf16.msra.mxu0 %v2651_v19  ;;  %v2733_v19 = vld [vmem:[%s2862_s26 + $0x120] ss:$20 sps:$4 sm:$0xff]   ;;  %v2737_v22 = vld [vmem:[%s2862_s26 + $0x148] ss:$20 sps:$4 sm:$0xff]  }
  0x35   : > { %2414 = vmatprep.subr.bf16.mxu1 %v2650_v23  ;;  %1162 = vmatprep.mubr.bf16.mxu0 %v2653_v24  ;;  %v2738_v23 = vld [vmem:[%s2862_s26 + $0x38] ss:$20 sps:$4 sm:$0xff]   ;;  %v2739_v24 = vld [vmem:[%s2862_s26 + $0x174] ss:$20 sps:$4 sm:$0xff]  }
  0x36   : > { %1258 = vmatprep.mubr.bf16.mxu1 %v2655_v25  ;;  %2546 = vmatprep.subr.bf16.mxu0 %v2682_v35  ;;  %v2741_v25 = vld [vmem:[%s2862_s26 + $0x60] ss:$20 sps:$4 sm:$0xff]  }
  0x38   : > { %2415 = vmatpush3.bf16.msra.mxu1 %v2652_v26  ;;  %2547 = vmatpush3.bf16.msra.mxu0 %v2682_v35  ;;  %v2742_v26 = vld [vmem:[%s2862_s26 + $0x170] ss:$20 sps:$4 sm:$0xff]   ;;  %v2753_v35 = vld [vmem:[%s2862_s26 + $0x128] ss:$20 sps:$4 sm:$0xff]  }
  0x39   : > { %2416 = vmatprep.subr.bf16.mxu1 %v2659_v28  ;;  %2548 = vmatprep.subr.bf16.mxu0 %v2702_v47  ;;  %v2744_v28 = vld [vmem:[%s2862_s26 + $0x19c] ss:$20 sps:$4 sm:$0xff]  }
  0x3b   : > { %1163 = vmatmul.mubr.bf16.gmra.mxu0 %v2657_v27  ;;  %1259 = vmatmul.mubr.bf16.gmra.mxu1 %v2658_v29  ;;  %v2743_v27 = vld [vmem:[%s2862_s26 + $0x88] ss:$20 sps:$4 sm:$0xff]   ;;  %v2746_v29 = vld [vmem:[%s2862_s26 + $0xb0] ss:$20 sps:$4 sm:$0xff]  }
  0x3c   : > { %2417 = vmatpush3.bf16.msra.mxu1 %v2660_v30  ;;  %1170 = vmatprep.mubr.bf16.mxu0 %v2663_v32  ;;  %v2747_v30 = vld [vmem:[%s2862_s26 + $0x198] ss:$20 sps:$4 sm:$0xff]  }
  0x3d   : > { %2418 = vmatprep.subr.bf16.mxu1 %v2661_v31  ;;  %1266 = vmatprep.mubr.bf16.mxu1 %v2665_v33  ;;  %v2748_v31 = vld [vmem:[%s2862_s26 + $0xd8] ss:$20 sps:$4 sm:$0xff]   ;;  %v2751_v33 = vld [vmem:[%s2862_s26 + $0x100] ss:$20 sps:$4 sm:$0xff]  }
  0x3e   : > { %2549 = vmatpush3.bf16.msra.mxu0 %v2702_v47  ;;  %v2749_v32 = vld [vmem:[%s2862_s26 + $0x1c4] ss:$20 sps:$4 sm:$0xff]  }
  0x3f   : > { %2550 = vmatprep.subr.bf16.mxu0 %v2721_v56  ;;  %v2768_v47 = vld [vmem:[%s2862_s26 + $0x218] ss:$20 sps:$4 sm:$0xff]  }
  0x40   : > { %2419 = vmatpush3.bf16.msra.mxu1 %v2662_v34  ;;  %v2752_v34 = vld [vmem:[%s2862_s26 + $0x1c0] ss:$20 sps:$4 sm:$0xff]  }
  0x41   : > { %2420 = vmatprep.subr.bf16.mxu1 %v2669_v37  ;;  %v2756_v37 = vld [vmem:[%s2862_s26 + $0x150] ss:$20 sps:$4 sm:$0xff]  }
  0x42   : > { %2551 = vmatpush3.bf16.msra.mxu0 %v2721_v56 }
  0x43   : > { %1171 = vmatmul.mubr.bf16.gmra.mxu0 %v2667_v36  ;;  %1267 = vmatmul.mubr.bf16.gmra.mxu1 %v2668_v38  ;;  %v2754_v36 = vld [vmem:[%s2862_s26 + $0x1ec] ss:$20 sps:$4 sm:$0xff]   ;;  %v2757_v38 = vld [vmem:[%s2862_s26 + $0x1e8] ss:$20 sps:$4 sm:$0xff]  }
  0x44   : > { %2421 = vmatpush3.bf16.msra.mxu1 %v2670_v39  ;;  %1178 = vmatprep.mubr.bf16.mxu0 %v2673_v41  ;;  %v2758_v39 = vld [vmem:[%s2862_s26 + $0x178] ss:$20 sps:$4 sm:$0xff]   ;;  %v2761_v41 = vld [vmem:[%s2862_s26 + $0x1a0] ss:$20 sps:$4 sm:$0xff]  }
  0x45   : > { %2422 = vmatprep.subr.bf16.mxu1 %v2671_v40  ;;  %1274 = vmatprep.mubr.bf16.mxu1 %v2675_v42  ;;  %v2759_v40 = vld [vmem:[%s2862_s26 + $0x214] ss:$20 sps:$4 sm:$0xff]   ;;  %v2762_v42 = vld [vmem:[%s2862_s26 + $0x210] ss:$20 sps:$4 sm:$0xff]  }
  0x48   : > { %2423 = vmatpush3.bf16.msra.mxu1 %v2672_v43  ;;  %v2763_v43 = vld [vmem:[%s2862_s26 + $0x1c8] ss:$20 sps:$4 sm:$0xff]  }
  0x49   : > { %2424 = vmatprep.subr.bf16.mxu1 %v2679_v46  ;;  %v2767_v46 = vld [vmem:[%s2862_s26 + $0x238] ss:$20 sps:$4 sm:$0xff]  }
  0x4b   : > { %1179 = vmatmul.mubr.bf16.gmra.mxu0 %v2677_v44  ;;  %1275 = vmatmul.mubr.bf16.gmra.mxu1 %v2678_v45  ;;  %v2764_v44 = vld [vmem:[%s2862_s26 + $0x23c] ss:$20 sps:$4 sm:$0xff]  }
  0x4c   : > { %2425 = vmatpush3.bf16.msra.mxu1 %v2680_v48  ;;  %1186 = vmatprep.mubr.bf16.mxu0 %v2684_v50  ;;  %v2766_v45 = vld [vmem:[%s2862_s26 + $0x1f0] ss:$20 sps:$4 sm:$0xff]   ;;  %v2772_v50 = vld [vmem:[%s2862_s26 + $0x260] ss:$20 sps:$4 sm:$0xff]  }
  0x4d   : > { %2426 = vmatprep.subr.bf16.mxu1 %v2681_v49  ;;  %1315 = vmatprep.mubr.bf16.mxu1 %v2688_v51  ;;  %v2769_v48 = vld [vmem:[%s2862_s26 + $0x264] ss:$20 sps:$4 sm:$0xff]   ;;  %v2771_v49 = vld [vmem:[%s2862_s26 + $0x240] ss:$20 sps:$4 sm:$0xff]   ;;  %v2773_v51 = vld [vmem:[%s2862_s26 + $0x268] ss:$20 sps:$4 sm:$0xff]  }
  0x50   : > { %2427 = vmatpush3.bf16.msra.mxu1 %v2683_v52 }
  0x53   : > { %1187 = vmatmul.mubr.bf16.gmra.mxu0 %v2689_v54  ;;  %1316 = vmatmul.mubr.bf16.vlgmr.msra.gmra.mxu1 %v2686_v53 }
  0x54   : > { %1194 = vmatprep.mubr.bf16.mxu0 %v2690_v55  ;;  %1323 = vmatprep.mubr.bf16.mxu1 %v2692_v57 }
  0x5b   : > { %1195 = vmatmul.mubr.bf16.gmra.mxu0 %v2694_v58  ;;  %1324 = vmatmul.mubr.bf16.gmra.mxu1 %v2695_v59 }
  0x5c   : > { %1202 = vmatprep.mubr.bf16.mxu0 %v2696_v60  ;;  %1331 = vmatprep.mubr.bf16.mxu1 %v2698_v61 }
  0x63   : > { %1203 = vmatmul.mubr.bf16.gmra.mxu0 %v2700_v62  ;;  %1332 = vmatmul.mubr.bf16.gmra.mxu1 %v2701_v63 }
  0x64   : > { %1210 = vmatprep.mubr.bf16.mxu0 %v2703_v0  ;;  %1339 = vmatprep.mubr.bf16.mxu1 %v2705_v1 }
  0x6b   : > { %1211 = vmatmul.mubr.bf16.gmra.mxu0 %v2707_v2  ;;  %1340 = vmatmul.mubr.bf16.gmra.mxu1 %v2708_v3 }
  0x6c   : > { %1218 = vmatprep.mubr.bf16.mxu0 %v2709_v4  ;;  %1347 = vmatprep.mubr.bf16.mxu1 %v2711_v5 }
  0x73   : > { %1219 = vmatmul.mubr.bf16.gmra.mxu0 %v2713_v6  ;;  %1348 = vmatmul.mubr.bf16.gmra.mxu1 %v2714_v7 }
  0x74   : > { %1226 = vmatprep.mubr.bf16.mxu0 %v2715_v8  ;;  %1355 = vmatprep.mubr.bf16.mxu1 %v2717_v9 }
  0x7b   : > { %1227 = vmatmul.mubr.bf16.gmra.mxu0 %v2719_v10  ;;  %1356 = vmatmul.mubr.bf16.gmra.mxu1 %v2720_v11 }
  0x7c   : > { %1234 = vmatprep.mubr.bf16.mxu0 %v2722_v12  ;;  %1363 = vmatprep.mubr.bf16.mxu1 %v2724_v13 }
  0x83   : > { %1235 = vmatmul.mubr.bf16.gmra.mxu0 %v2726_v14  ;;  %1364 = vmatmul.mubr.bf16.gmra.mxu1 %v2727_v15 }
  0x84   : > { %1242 = vmatprep.mubr.bf16.mxu0 %v2728_v16  ;;  %1371 = vmatprep.mubr.bf16.mxu1 %v2730_v17 }
  0x8b   : > { %1243 = vmatmul.mubr.bf16.gmra.mxu0 %v2732_v18  ;;  %1372 = vmatmul.mubr.bf16.gmra.mxu1 %v2733_v19 }
  0x8c   : > { %1379 = vmatprep.mubr.bf16.mxu1 %v2734_v20  ;;  %2552 = vmatprep.mubr.msk.bf16.mxu0 %vm1073_vm0, %v2736_v21 }
  0x93   : > { %1380 = vmatmul.mubr.bf16.gmra.mxu1 %v2737_v22  ;;  %2553 = vmatmul.mubr.msk.bf16.vlgmr.msra.gmra.mxu0 %vm1073_vm0, %v2738_v23 }
  0x94   : > { %1387 = vmatprep.mubr.bf16.mxu1 %v2739_v24  ;;  %2556 = vmatprep.mubr.msk.bf16.mxu0 %vm1073_vm0, %v2741_v25 }
  0x9b   : > { %1388 = vmatmul.mubr.bf16.gmra.mxu1 %v2742_v26  ;;  %2557 = vmatmul.mubr.msk.bf16.gmra.mxu0 %vm1073_vm0, %v2743_v27 }
  0x9c   : > { %1395 = vmatprep.mubr.bf16.mxu1 %v2744_v28  ;;  %2560 = vmatprep.mubr.msk.bf16.mxu0 %vm1073_vm0, %v2746_v29 }
  0xa3   : > { %1396 = vmatmul.mubr.bf16.gmra.mxu1 %v2747_v30  ;;  %2561 = vmatmul.mubr.msk.bf16.gmra.mxu0 %vm1073_vm0, %v2748_v31 }
  0xa4   : > { %1403 = vmatprep.mubr.bf16.mxu1 %v2749_v32  ;;  %2564 = vmatprep.mubr.msk.bf16.mxu0 %vm1073_vm0, %v2751_v33 }
  0xab   : > { %1404 = vmatmul.mubr.bf16.gmra.mxu1 %v2752_v34  ;;  %2565 = vmatmul.mubr.msk.bf16.gmra.mxu0 %vm1073_vm0, %v2753_v35 }
  0xac   : > { %1411 = vmatprep.mubr.bf16.mxu1 %v2754_v36  ;;  %2568 = vmatprep.mubr.msk.bf16.mxu0 %vm1073_vm0, %v2756_v37 }
  0xb3   : > { %1412 = vmatmul.mubr.bf16.gmra.mxu1 %v2757_v38  ;;  %2569 = vmatmul.mubr.msk.bf16.gmra.mxu0 %vm1073_vm0, %v2758_v39 }
  0xb4   : > { %1419 = vmatprep.mubr.bf16.mxu1 %v2759_v40  ;;  %2572 = vmatprep.mubr.msk.bf16.mxu0 %vm1073_vm0, %v2761_v41 }
  0xbb   : > { %1420 = vmatmul.mubr.bf16.gmra.mxu1 %v2762_v42  ;;  %2573 = vmatmul.mubr.msk.bf16.gmra.mxu0 %vm1073_vm0, %v2763_v43 }
  0xbc   : > { %1427 = vmatprep.mubr.bf16.mxu1 %v2764_v44  ;;  %2576 = vmatprep.mubr.msk.bf16.mxu0 %vm1073_vm0, %v2766_v45 }
  0xc3   : > { %1428 = vmatmul.mubr.bf16.gmra.mxu1 %v2767_v46  ;;  %2577 = vmatmul.mubr.msk.bf16.gmra.mxu0 %vm1073_vm0, %v2768_v47 }
  0xc4   : > { %1435 = vmatprep.mubr.bf16.mxu1 %v2769_v48  ;;  %2580 = vmatprep.mubr.msk.bf16.mxu0 %vm1073_vm0, %v2771_v49 }
  0xcb   : > { %1436 = vmatmul.mubr.bf16.gmra.mxu1 %v2772_v50  ;;  %2581 = vmatmul.mubr.msk.bf16.gmra.mxu0 %vm1073_vm0, %v2773_v51 }
  0xf3   : > { %v2316_v52 = vpop.f32.mrf.mxu0  ;;  %v2388_v53 = vpop.f32.mrf.mxu1 }
  0xf5   : > { %v2317_v54 = vpop.f32.mrf.mxu0  ;;  %v2389_v55 = vpop.f32.mrf.mxu1 }
  0xf6   : > { %v2318_v56 = vadd.f32 %v2317_v54, %v2316_v52  ;;  %v2987_v57 = vadd.f32 %v2389_v55, %v2388_v53 }
  0xf7   : > { %v2319_v58 = vpop.f32.mrf.mxu0  ;;  %v2391_v59 = vpop.f32.mrf.mxu1 }
  0xf8   : > { %3318 = vst [vmem:[#allocation2_spill] sm:$0xff] %v2987_v57 }
  0xf9   : > { %v2320_v60 = vpop.f32.mrf.mxu0  ;;  %v2392_v61 = vpop.f32.mrf.mxu1 }
  0xfa   : > { %v2989_v62 = vadd.f32 %v2320_v60, %v2319_v58  ;;  %v2991_v63 = vadd.f32 %v2392_v61, %v2391_v59 }
  0xfb   : > { %v2322_v0 = vpop.f32.mrf.mxu0  ;;  %v2394_v1 = vpop.f32.mrf.mxu1 }
  0xfc   : > { %3319 = vst [vmem:[#allocation3_spill] sm:$0xff] %v2991_v63 }
  0xfd   : > { %v2323_v2 = vpop.f32.mrf.mxu0  ;;  %v2395_v3 = vpop.f32.mrf.mxu1 }
  0xfe   : > { %v2993_v4 = vadd.f32 %v2323_v2, %v2322_v0  ;;  %v2995_v5 = vadd.f32 %v2395_v3, %v2394_v1 }
  0xff   : > { %v2325_v6 = vpop.f32.mrf.mxu0  ;;  %v2397_v7 = vpop.f32.mrf.mxu1 }
 0x100   : > { %3320 = vst [vmem:[#allocation4_spill] sm:$0xff] %v2995_v5 }
 0x101   : > { %v2326_v8 = vpop.f32.mrf.mxu0  ;;  %v2398_v9 = vpop.f32.mrf.mxu1 }
 0x102   : > { %v2997_v10 = vadd.f32 %v2326_v8, %v2325_v6  ;;  %v2999_v11 = vadd.f32 %v2398_v9, %v2397_v7 }
 0x103   : > { %v2328_v12 = vpop.f32.mrf.mxu0  ;;  %v2400_v13 = vpop.f32.mrf.mxu1 }
 0x104   : > { %3321 = vst [vmem:[#allocation5_spill] sm:$0xff] %v2999_v11 }
 0x105   : > { %v2329_v14 = vpop.f32.mrf.mxu0  ;;  %v2401_v15 = vpop.f32.mrf.mxu1 }
 0x106   : > { %v3001_v16 = vadd.f32 %v2329_v14, %v2328_v12  ;;  %v3003_v17 = vadd.f32 %v2401_v15, %v2400_v13 }
 0x107   : > { %v2331_v18 = vpop.f32.mrf.mxu0  ;;  %v2403_v19 = vpop.f32.mrf.mxu1 }
 0x108   : > { %3322 = vst [vmem:[#allocation6_spill] sm:$0xff] %v3003_v17 }
 0x109   : > { %v2332_v20 = vpop.f32.mrf.mxu0  ;;  %v2404_v21 = vpop.f32.mrf.mxu1 }
 0x10a   : > { %v3005_v22 = vadd.f32 %v2332_v20, %v2331_v18  ;;  %v3007_v23 = vadd.f32 %v2404_v21, %v2403_v19 }
 0x10b   : > { %v2334_v24 = vpop.f32.mrf.mxu0  ;;  %v2406_v25 = vpop.f32.mrf.mxu1 }
 0x10c   : > { %3323 = vst [vmem:[#allocation7_spill] sm:$0xff] %v3007_v23 }
 0x10d   : > { %v2335_v26 = vpop.f32.mrf.mxu0  ;;  %v2407_v27 = vpop.f32.mrf.mxu1 }
 0x10e   : > { %v3009_v28 = vadd.f32 %v2335_v26, %v2334_v24  ;;  %v3011_v29 = vadd.f32 %v2407_v27, %v2406_v25 }
 0x10f   : > { %v2337_v30 = vpop.f32.mrf.mxu0  ;;  %v2409_v31 = vpop.f32.mrf.mxu1 }
 0x110   : > { %3324 = vst [vmem:[#allocation8_spill] sm:$0xff] %v3011_v29 }
 0x111   : > { %v2338_v32 = vpop.f32.mrf.mxu0  ;;  %v2410_v33 = vpop.f32.mrf.mxu1 }
 0x112   : > { %v3013_v34 = vadd.f32 %v2338_v32, %v2337_v30  ;;  %v3015_v35 = vadd.f32 %v2410_v33, %v2409_v31 }
 0x113   : > { %v2340_v36 = vpop.f32.mrf.mxu0  ;;  %v2428_v37 = vpop.f32.mrf.mxu1 }
 0x114   : > { %3325 = vst [vmem:[#allocation9_spill] sm:$0xff] %v3015_v35 }
 0x115   : > { %v2341_v38 = vpop.f32.mrf.mxu0  ;;  %v2429_v39 = vpop.f32.mrf.mxu1 }
 0x116   : > { %v3017_v40 = vadd.f32 %v2341_v38, %v2340_v36  ;;  %v2430_v41 = vadd.f32 %v2429_v39, %v2428_v37 }
 0x117   : > { %v2343_v42 = vpop.f32.mrf.mxu0  ;;  %v3019_v43 = vpop.f32.mrf.mxu1 }
 0x118   : > { %v3021_v44 = vadd.f32 %v2430_v41, %v2318_v56 }
 0x119   : > { %v2344_v45 = vpop.f32.mrf.mxu0  ;;  %v3023_v46 = vpop.f32.mrf.mxu1 }
 0x11a   : > { %v3025_v47 = vadd.f32 %v2344_v45, %v2343_v42 }
 0x11b   : > { %v2346_v48 = vpop.f32.mrf.mxu0  ;;  %v2434_v49 = vpop.f32.mrf.mxu1 }
 0x11d   : > { %v2347_v50 = vpop.f32.mrf.mxu0  ;;  %v2435_v51 = vpop.f32.mrf.mxu1 }
 0x11e   : > { %v3027_v52 = vadd.f32 %v2347_v50, %v2346_v48  ;;  %v2436_v17 = vadd.f32 %v2435_v51, %v2434_v49  ;;  %v2433_v51 = vadd.f32 %v3023_v46, %v3019_v43 }
 0x11f   : > { %v2349_v53 = vpop.f32.mrf.mxu0  ;;  %v2437_v54 = vpop.f32.mrf.mxu1 }
 0x121   : > { %v2350_v55 = vpop.f32.mrf.mxu0  ;;  %v2438_v58 = vpop.f32.mrf.mxu1 }
 0x122   : > { %v3029_v59 = vadd.f32 %v2350_v55, %v2349_v53 }
 0x123   : > { %v2352_v60 = vpop.f32.mrf.mxu0  ;;  %v3031_v56 = vpop.f32.mrf.mxu1 }
 0x125   : > { %v2353_v61 = vpop.f32.mrf.mxu0  ;;  %v3033_v0 = vpop.f32.mrf.mxu1 }
 0x126   : > { %v3035_v1 = vadd.f32 %v2353_v61, %v2352_v60 }
 0x127   : > { %v2355_v2 = vpop.f32.mrf.mxu0  ;;  %v3037_v3 = vpop.f32.mrf.mxu1 }
 0x129   : > { %v2356_v6 = vpop.f32.mrf.mxu0  ;;  %v3039_v7 = vpop.f32.mrf.mxu1 }
 0x12a   : > { %v3041_v8 = vadd.f32 %v2356_v6, %v2355_v2 }
 0x12b   : > { %v3043_v9 = vpop.f32.mrf.mxu0  ;;  %v2446_v12 = vpop.f32.mrf.mxu1 }
 0x12d   : > { %v3045_v13 = vpop.f32.mrf.mxu0  ;;  %v2447_v14 = vpop.f32.mrf.mxu1 }
 0x12f   : > { %v3047_v15 = vpop.f32.mrf.mxu0  ;;  %v2449_v18 = vpop.f32.mrf.mxu1 }
 0x131   : > { %v3049_v19 = vpop.f32.mrf.mxu0  ;;  %v2450_v20 = vpop.f32.mrf.mxu1 }
 0x132   : > { %v2451_v46 = vadd.f32 %v2450_v20, %v2449_v18 }
 0x133   : > { %v2364_v21 = vpop.f32.mrf.mxu0  ;;  %v3051_v24 = vpop.f32.mrf.mxu1 }
 0x135   : > { %v2365_v25 = vpop.f32.mrf.mxu0  ;;  %v3053_v26 = vpop.f32.mrf.mxu1 }
 0x136   : > { %v3055_v27 = vadd.f32 %v2365_v25, %v2364_v21 }
 0x137   : > { %v3057_v30 = vpop.f32.mrf.mxu0  ;;  %v3059_v31 = vpop.f32.mrf.mxu1 }
 0x138   : > { %3326 = vst [vmem:[#allocation10_spill] sm:$0xff] %v3055_v27  ;;  %3327 = vst [vmem:[#allocation11_spill] sm:$0xff] %v3057_v30 }
 0x139   : > { %v3061_v32 = vpop.f32.mrf.mxu0  ;;  %v3063_v33 = vpop.f32.mrf.mxu1 }
 0x13a   : > { %3328 = vst [vmem:[#allocation12_spill] sm:$0xff] %v3061_v32 }
 0x13b   : > { %v3065_v36 = vpop.f32.mrf.mxu0  ;;  %v2458_v37 = vpop.f32.mrf.mxu1 }
 0x13d   : > { %v3067_v38 = vpop.f32.mrf.mxu0  ;;  %v2459_v39 = vpop.f32.mrf.mxu1 }
 0x13e   : > { %v2460_v20 = vadd.f32 %v2459_v39, %v2458_v37  ;;  %v2454_v39 = vadd.f32 %v3053_v26, %v3051_v24 }
 0x13f   : > { %v3069_v41 = vpop.f32.mrf.mxu0  ;;  %v3071_v42 = vpop.f32.mrf.mxu1 }
 0x140   : > { %v1358_v26 = vadd.f32 %v2460_v20, %v3027_v52 }
 0x141   : > { %v3073_v45 = vpop.f32.mrf.mxu0  ;;  %v3075_v48 = vpop.f32.mrf.mxu1 }
 0x143   : > { %v3077_v50 = vpop.f32.mrf.mxu0  ;;  %v3079_v53 = vpop.f32.mrf.mxu1 }
 0x144   : > { %3329 = vst [vmem:[#allocation13_spill] sm:$0xff] %v3077_v50 }
 0x145   : > { %v3081_v55 = vpop.f32.mrf.mxu0  ;;  %v3083_v60 = vpop.f32.mrf.mxu1 }
 0x146   : > { %3330 = vst [vmem:[#allocation14_spill] sm:$0xff] %v3081_v55 }
 0x147   : > { %v3085_v61 = vpop.f32.mrf.mxu0  ;;  %v3087_v2 = vpop.f32.mrf.mxu1 }
 0x148   : > { %3331 = vst [vmem:[#allocation15_spill] sm:$0xff] %v3085_v61  ;;  %v1326_v61 = vadd.f32 %v2436_v17, %v2993_v4 }
 0x149   : > { %v3089_v6 = vpop.f32.mrf.mxu0  ;;  %v3091_v21 = vpop.f32.mrf.mxu1 }
 0x14a   : > { %3332 = vst [vmem:[#allocation16_spill] sm:$0xff] %v3089_v6  ;;  %v2439_v6 = vadd.f32 %v2438_v58, %v2437_v54  ;;  %v3129_v58 = vld [vmem:[%s277_s6] ss:$0 sm:$0xff] }
 0x14b   : > { %v3093_v25 = vpop.f32.mrf.mxu0  ;;  %v3095_v35 = vpop.f32.mrf.mxu1 }
 0x14c   : > { %3333 = vst [vmem:[#allocation17_spill] sm:$0xff] %v3093_v25  ;;  %v2448_v25 = vadd.f32 %v2447_v14, %v2446_v12  ;;  %v1329_v17 = vadd.f32 %v2439_v6, %v2997_v10  ;;  %v1321_v14 = vadd.f32 %v2433_v51, %v2989_v62 }
 0x14d   : > { %v3097_v23 = vpop.f32.mrf.mxu0  ;;  %v3099_v29 = vpop.f32.mrf.mxu1 }
 0x14e   : > { %3334 = vst [vmem:[#allocation18_spill] sm:$0xff] %v3097_v23  ;;  %v3116_v23 = vld [vmem:[%s274_s29] ss:$0 sm:$0xff]  ;;  %v1342_v6 = vadd.f32 %v2448_v25, %v3009_v28  ;;  %v1345_v25 = vadd.f32 %v2451_v46, %v3013_v34  ;;  %v2463_v46 = vadd.f32 %v3075_v48, %v3071_v42  ;;  %v2457_v48 = vadd.f32 %v3063_v33, %v3059_v31 }
 0x14f   : > { %v3101_v63 = vpop.f32.mrf.mxu0  ;;  %v3103_v11 = vpop.f32.mrf.mxu1 }
 0x150   : > { %3335 = vst [vmem:[#allocation19_spill] sm:$0xff] %v3101_v63 }
 0x151   : > { %v3109_v57 = vpop.f32.mrf.mxu0  ;;  %v3111_v5 = vpop.f32.mrf.mxu1 }
 0x152   : > { %3336 = vst [vmem:[#allocation20_spill] sm:$0xff] %v3109_v57 }
 0x153   : > { %v3114_v55 = vpop.f32.mrf.mxu1  ;;  %v2554_v50 = vpop.f32.mrf.mxu0 }
 0x154   : > { %v1487_v49 = vadd.f32 %v2554_v50, %v1326_v61  ;;  %v2442_v50 = vadd.f32 %v3033_v0, %v3031_v56  ;;  %v2445_v56 = vadd.f32 %v3039_v7, %v3037_v3 }
 0x155   : > { %v3124_v63 = vpop.f32.mrf.mxu1  ;;  %v1478_v57 = vpop.f32.mrf.mxu0 }
 0x156   : > { %v1614_v54 = vmul.f32 %v3116_v23, %v1487_v49  ;;  %v1479_v4 = vadd.f32 %v1478_v57, %v3021_v44  ;;  %v1334_v62 = vadd.f32 %v2442_v50, %v3001_v16 }
 0x157   : > { %v3131_v27 = vpop.f32.mrf.mxu1  ;;  %v2555_v32 = vpop.f32.mrf.mxu0 }
 0x158   : > { %3337 = vst [vmem:[#allocation21_spill] sm:$0xff] %v3131_v27  ;;  %v1490_v43 = vadd.f32 %v2555_v32, %v1329_v17  ;;  %v1612_v61 = vmul.f32 %v3116_v23, %v1479_v4  ;;  %v1653_v10 = vadd.f32 %v3129_v58, %v1614_v54 }
 0x159   : > { %v3136_v12 = vpop.f32.mrf.mxu1  ;;  %v1481_v57 = vpop.f32.mrf.mxu0 }
 0x15a   : > { %v1615_v44 = vmul.f32 %v3116_v23, %v1490_v43  ;;  %v1482_v49 = vadd.f32 %v1481_v57, %v1321_v14  ;;  %v1651_v32 = vadd.f32 %v3129_v58, %v1612_v61  ;;  %v1685_v4 = vmax.f32 %v1653_v10, 0.0 }
 0x15b   : > { %v3142_v30 = vpop.f32.mrf.mxu1  ;;  %v2558_v27 = vpop.f32.mrf.mxu0  ;;  %v1337_v43 = vadd.f32 %v2445_v56, %v3005_v22 }
 0x15c   : > { %v1654_v0 = vadd.f32 %v3129_v58, %v1615_v44  ;;  %v1503_v18 = vadd.f32 %v2558_v27, %v1342_v6  ;;  %v1613_v51 = vmul.f32 %v3116_v23, %v1482_v49  ;;  %v1683_v61 = vmax.f32 %v1651_v32, 0.0 }
 0x15d   : > { %v3151_v54 = vpop.f32.mrf.mxu1  ;;  %v1494_v28 = vpop.f32.mrf.mxu0  ;;  %v2472_v32 = vadd.f32 %v3099_v29, %v3095_v35 }
 0x15e   : > { %v1686_v17 = vmax.f32 %v1654_v0, 0.0  ;;  %v1618_v3 = vmul.f32 %v3116_v23, %v1503_v18  ;;  %v1495_v7 = vadd.f32 %v1494_v28, %v1334_v62  ;;  %v1652_v16 = vadd.f32 %v3129_v58, %v1613_v51 }
 0x15f   : > { %v3161_v27 = vpop.f32.mrf.mxu1  ;;  %v2559_v37 = vpop.f32.mrf.mxu0  ;;  %v1350_v62 = vadd.f32 %v2454_v39, %v3017_v40  ;;  %v2360_v40 = vadd.f32 %v3045_v13, %v3043_v9  ;;  %v2475_v39 = vadd.f32 %v3111_v5, %v3103_v11 }
 0x160   : > { %v2213_v34 = vpack.c.bf16 %v1686_v17, %v1685_v4  ;;  %v1506_v50 = vadd.f32 %v2559_v37, %v1345_v25  ;;  %v1684_v14 = vmax.f32 %v1652_v16, 0.0  ;;  %v1616_v57 = vmul.f32 %v3116_v23, %v1495_v7 }
 0x161   : > { %v3169_v10 = vpop.f32.mrf.mxu1  ;;  %v1497_v44 = vpop.f32.mrf.mxu0  ;;  %v1657_v6 = vadd.f32 %v3129_v58, %v1618_v3  ;;  %v1361_v25 = vadd.f32 %v2463_v46, %v3029_v59  ;;  %v2466_v7 = vadd.f32 %v3083_v60, %v3079_v53  ;;  %v1353_v59 = vadd.f32 %v2457_v48, %v3025_v47 }
 0x162   : > { %2285 = vst [vmem:[%s3158_s10 + $0x8] sm:$0xff] %v2213_v34   ;;  %v1619_v24 = vmul.f32 %v3116_v23, %v1506_v50  ;;  %v2208_v49 = vpack.c.bf16 %v1684_v14, %v1683_v61  ;;  %v1498_v22 = vadd.f32 %v1497_v44, %v1337_v43  ;;  %v1655_v51 = vadd.f32 %v3129_v58, %v1616_v57 }
 0x163   : > { %v3175_v56 = vpop.f32.mrf.mxu1  ;;  %v2562_v42 = vpop.f32.mrf.mxu0  ;;  %v1689_v4 = vmax.f32 %v1657_v6, 0.0  ;;  %v1374_v60 = vadd.f32 %v2472_v32, %v2360_v40  ;;  %v2363_v47 = vadd.f32 %v3049_v19, %v3047_v15  ;;  %v2469_v57 = vadd.f32 %v3091_v21, %v3087_v2 }
 0x164   : > { %v1658_v0 = vadd.f32 %v3129_v58, %v1619_v24  ;;  %v1519_v18 = vadd.f32 %v2562_v42, %v1358_v26  ;;  %2209 = vst [vmem:[%s3158_s10] sm:$0xff] %v2208_v49   ;;  %v1617_v52 = vmul.f32 %v3116_v23, %v1498_v22  ;;  %v1687_v34 = vmax.f32 %v1655_v51, 0.0 }
 0x165   : > { %v3186_v20 = vpop.f32.mrf.mxu1  ;;  %v1510_v28 = vpop.f32.mrf.mxu0  ;;  %v1366_v24 = vadd.f32 %v2466_v7, %v3035_v1  ;;  %v2484_v26 = vadd.f32 %v3151_v54, %v3142_v30  ;;  %v1377_v42 = vadd.f32 %v2475_v39, %v2363_v47  ;;  %v2372_v1 = vadd.f32 %v3067_v38, %v3065_v36  ;;  %v3339_v7 = vld [vmem:[#allocation11_spill] sm:$0xff] }
 0x166   : > { %v1690_v31 = vmax.f32 %v1658_v0, 0.0  ;;  %v1622_v33 = vmul.f32 %v3116_v23, %v1519_v18  ;;  %v1511_v17 = vadd.f32 %v1510_v28, %v1350_v62  ;;  %v1656_v29 = vadd.f32 %v3129_v58, %v1617_v52 }
 0x167   : > { %v3193_v35 = vpop.f32.mrf.mxu1  ;;  %v2563_v3 = vpop.f32.mrf.mxu0  ;;  %v2478_v62 = vadd.f32 %v3124_v63, %v3114_v55  ;;  %v1369_v52 = vadd.f32 %v2469_v57, %v3041_v8  ;;  %v2487_v28 = vadd.f32 %v3169_v10, %v3161_v27  ;;  %v1390_v63 = vadd.f32 %v2484_v26, %v2372_v1  ;;  %v3338_v8 = vld [vmem:[#allocation21_spill] sm:$0xff] }
 0x168   : > { %v2223_v16 = vpack.c.bf16 %v1690_v31, %v1689_v4  ;;  %v1522_v37 = vadd.f32 %v2563_v3, %v1361_v25  ;;  %v1688_v50 = vmax.f32 %v1656_v29, 0.0  ;;  %v1620_v43 = vmul.f32 %v3116_v23, %v1511_v17  ;;  %v3344_v1 = vld [vmem:[#allocation13_spill] sm:$0xff] }
 0x169   : > { %v3201_v9 = vpop.f32.mrf.mxu1  ;;  %v1513_v13 = vpop.f32.mrf.mxu0  ;;  %v1661_v46 = vadd.f32 %v3129_v58, %v1622_v33  ;;  %v2375_v55 = vadd.f32 %v3073_v45, %v3069_v41  ;;  %v2481_v40 = vadd.f32 %v3136_v12, %v3338_v8  ;;  %v2490_v26 = vadd.f32 %v3186_v20, %v3175_v56  ;;  %v3346_v56 = vld [vmem:[#allocation15_spill] sm:$0xff]  ;;  %v3347_v20 = vld [vmem:[#allocation16_spill] sm:$0xff] }
 0x16a   : > { %2287 = vst [vmem:[%s3158_s10 + $0x18] sm:$0xff] %v2223_v16   ;;  %v1623_v53 = vmul.f32 %v3116_v23, %v1522_v37  ;;  %v2218_v61 = vpack.c.bf16 %v1688_v50, %v1687_v34  ;;  %v1514_v14 = vadd.f32 %v1513_v13, %v1353_v59  ;;  %v1659_v49 = vadd.f32 %v3129_v58, %v1620_v43  ;;  %v3340_v16 = vld [vmem:[#allocation12_spill] sm:$0xff]  ;;  %v3341_v34 = vld [vmem:[#allocation10_spill] sm:$0xff] }
 0x16b   : > { %v2494_v5 = vpop.f32.mrf.mxu1  ;;  %v2566_v11 = vpop.f32.mrf.mxu0  ;;  %v1693_v48 = vmax.f32 %v1661_v46, 0.0  ;;  %v2369_v37 = vadd.f32 %v3340_v16, %v3339_v7  ;;  %v1382_v50 = vadd.f32 %v2478_v62, %v3341_v34  ;;  %v1393_v46 = vadd.f32 %v2487_v28, %v2375_v55 }
 0x16c   : > { %v1662_v44 = vadd.f32 %v3129_v58, %v1623_v53  ;;  %v1535_v6 = vadd.f32 %v2566_v11, %v1374_v60  ;;  %2286 = vst [vmem:[%s3158_s10 + $0x10] sm:$0xff] %v2218_v61   ;;  %v1621_v15 = vmul.f32 %v3116_v23, %v1514_v14  ;;  %v1691_v25 = vmax.f32 %v1659_v49, 0.0  ;;  %v3342_v14 = vld [vmem:[#allocation17_spill] sm:$0xff]  ;;  %v3343_v11 = vld [vmem:[#allocation18_spill] sm:$0xff] }
 0x16d   : > { %v2495_v19 = vpop.f32.mrf.mxu1  ;;  %v1526_v22 = vpop.f32.mrf.mxu0  ;;  %v2384_v57 = vadd.f32 %v3343_v11, %v3342_v14  ;;  %v3350_v11 = vld [vmem:[#allocation4_spill] sm:$0xff] }
 0x16e   : > { %v1694_v0 = vmax.f32 %v1662_v44, 0.0  ;;  %v1626_v2 = vmul.f32 %v3116_v23, %v1535_v6  ;;  %v1527_v21 = vadd.f32 %v1526_v22, %v1366_v24  ;;  %v1660_v18 = vadd.f32 %v3129_v58, %v1621_v15 }
 0x16f   : > { %v2497_v30 = vpop.f32.mrf.mxu1  ;;  %v2567_v54 = vpop.f32.mrf.mxu0  ;;  %v2496_v43 = vadd.f32 %v2495_v19, %v2494_v5  ;;  %v1385_v24 = vadd.f32 %v2481_v40, %v2369_v37 }
 0x170   : > { %v2233_v32 = vpack.c.bf16 %v1694_v0, %v1693_v48  ;;  %v1538_v51 = vadd.f32 %v2567_v54, %v1377_v42  ;;  %v1692_v4 = vmax.f32 %v1660_v18, 0.0  ;;  %v1624_v31 = vmul.f32 %v3116_v23, %v1527_v21  ;;  %v3345_v18 = vld [vmem:[#allocation14_spill] sm:$0xff] }
 0x171   : > { %v2498_v33 = vpop.f32.mrf.mxu1  ;;  %v1529_v36 = vpop.f32.mrf.mxu0  ;;  %v1665_v38 = vadd.f32 %v3129_v58, %v1626_v2  ;;  %v2378_v54 = vadd.f32 %v3345_v18, %v3344_v1 }
 0x172   : > { %2289 = vst [vmem:[%s3158_s10 + $0x28] sm:$0xff] %v2233_v32   ;;  %v1627_v17 = vmul.f32 %v3116_v23, %v1538_v51  ;;  %v2228_v27 = vpack.c.bf16 %v1692_v4, %v1691_v25  ;;  %v1530_v10 = vadd.f32 %v1529_v36, %v1369_v52  ;;  %v1663_v13 = vadd.f32 %v3129_v58, %v1624_v31  ;;  %v3348_v51 = vld [vmem:[#allocation19_spill] sm:$0xff]  ;;  %v3349_v52 = vld [vmem:[#allocation20_spill] sm:$0xff] }
 0x173   : > { %v2500_v29 = vpop.f32.mrf.mxu1  ;;  %v2570_v3 = vpop.f32.mrf.mxu0  ;;  %v1697_v53 = vmax.f32 %v1665_v38, 0.0  ;;  %v2499_v15 = vadd.f32 %v2498_v33, %v2497_v30  ;;  %v1406_v32 = vadd.f32 %v2496_v43, %v2384_v57  ;;  %v2381_v30 = vadd.f32 %v3347_v20, %v3346_v56 }
 0x174   : > { %v1666_v59 = vadd.f32 %v3129_v58, %v1627_v17  ;;  %v1551_v39 = vadd.f32 %v2570_v3, %v1390_v63  ;;  %2288 = vst [vmem:[%s3158_s10 + $0x20] sm:$0xff] %v2228_v27   ;;  %v1625_v41 = vmul.f32 %v3116_v23, %v1530_v10  ;;  %v1695_v22 = vmax.f32 %v1663_v13, 0.0 }
 0x175   : > { %v2501_v45 = vpop.f32.mrf.mxu1  ;;  %v1542_v12 = vpop.f32.mrf.mxu0  ;;  %v2387_v28 = vadd.f32 %v3349_v52, %v3348_v51  ;;  %v2493_v36 = vadd.f32 %v3201_v9, %v3193_v35  ;;  %v1398_v63 = vadd.f32 %v2490_v26, %v2378_v54 }
 0x176   : > { %v1698_v60 = vmax.f32 %v1666_v59, 0.0  ;;  %v1630_v47 = vmul.f32 %v3116_v23, %v1551_v39  ;;  %v1543_v61 = vadd.f32 %v1542_v12, %v1382_v50  ;;  %v1664_v44 = vadd.f32 %v3129_v58, %v1625_v41 }
 0x177   : > { %v2503_v6 = vpop.f32.mrf.mxu1  ;;  %v2571_v5 = vpop.f32.mrf.mxu0  ;;  %v1409_v3 = vadd.f32 %v2499_v15, %v2387_v28  ;;  %v2502_v34 = vadd.f32 %v2501_v45, %v2500_v29  ;;  %v1401_v13 = vadd.f32 %v2493_v36, %v2381_v30 }
 0x178   : > { %v2243_v49 = vpack.c.bf16 %v1698_v60, %v1697_v53  ;;  %v1554_v19 = vadd.f32 %v2571_v5, %v1393_v46  ;;  %v1696_v42 = vmax.f32 %v1664_v44, 0.0  ;;  %v1669_v48 = vadd.f32 %v3129_v58, %v1630_v47 }
 0x179   : > { %v1628_v0 = vmul.f32 %v3116_v23, %v1543_v61  ;;  %v2504_v2 = vpop.f32.mrf.mxu1  ;;  %v1545_v21 = vpop.f32.mrf.mxu0 }
 0x17a   : > { %2291 = vst [vmem:[%s3158_s10 + $0x38] sm:$0xff] %v2243_v49   ;;  %v1631_v62 = vmul.f32 %v3116_v23, %v1554_v19  ;;  %v2238_v25 = vpack.c.bf16 %v1696_v42, %v1695_v22  ;;  %v1546_v4 = vadd.f32 %v1545_v21, %v1385_v24  ;;  %v1701_v55 = vmax.f32 %v1669_v48, 0.0  ;;  %v3351_v49 = vld [vmem:[#allocation2_spill] sm:$0xff] }
 0x17b   : > { %v2506_v31 = vpop.f32.mrf.mxu1  ;;  %v2574_v33 = vpop.f32.mrf.mxu0  ;;  %v1667_v8 = vadd.f32 %v3129_v58, %v1628_v0  ;;  %v1414_v15 = vadd.f32 %v2502_v34, %v3351_v49  ;;  %v2505_v19 = vadd.f32 %v2504_v2, %v2503_v6 }
 0x17c   : > { %v1670_v38 = vadd.f32 %v3129_v58, %v1631_v62  ;;  %v1567_v17 = vadd.f32 %v2574_v33, %v1406_v32  ;;  %2290 = vst [vmem:[%s3158_s10 + $0x30] sm:$0xff] %v2238_v25   ;;  %v1629_v40 = vmul.f32 %v3116_v23, %v1546_v4  ;;  %v3352_v62 = vld [vmem:[#allocation5_spill] sm:$0xff] }
 0x17d   : > { %v2507_v27 = vpop.f32.mrf.mxu1  ;;  %v1558_v10 = vpop.f32.mrf.mxu0  ;;  %v1699_v41 = vmax.f32 %v1667_v8, 0.0 }
 0x17e   : > { %v1702_v7 = vmax.f32 %v1670_v38, 0.0  ;;  %v1634_v16 = vmul.f32 %v3116_v23, %v1567_v17  ;;  %v2508_v37 = vadd.f32 %v2507_v27, %v2506_v31  ;;  %v1559_v59 = vadd.f32 %v1558_v10, %v1398_v63  ;;  %v3353_v31 = vld [vmem:[#allocation3_spill] sm:$0xff] }
 0x17f   : > { %v1668_v35 = vadd.f32 %v3129_v58, %v1629_v40  ;;  %v2509_v9 = vpop.f32.mrf.mxu1  ;;  %v2575_v39 = vpop.f32.mrf.mxu0  ;;  %v1417_v33 = vadd.f32 %v2505_v19, %v3353_v31 }
 0x180   : > { %v2253_v50 = vpack.c.bf16 %v1702_v7, %v1701_v55  ;;  %v1570_v43 = vadd.f32 %v2575_v39, %v1409_v3  ;;  %v1673_v46 = vadd.f32 %v3129_v58, %v1634_v16  ;;  %v1632_v53 = vmul.f32 %v3116_v23, %v1559_v59  ;;  %v3354_v3 = vld [vmem:[#allocation6_spill] sm:$0xff] }
 0x181   : > { %v1700_v12 = vmax.f32 %v1668_v35, 0.0  ;;  %v2510_v60 = vpop.f32.mrf.mxu1  ;;  %v1561_v47 = vpop.f32.mrf.mxu0  ;;  %v1422_v57 = vadd.f32 %v2508_v37, %v3350_v11 }
 0x182   : > { %2293 = vst [vmem:[%s3158_s10 + $0x48] sm:$0xff] %v2253_v50   ;;  %v1635_v61 = vmul.f32 %v3116_v23, %v1570_v43  ;;  %v2511_v14 = vadd.f32 %v2510_v60, %v2509_v9  ;;  %v1562_v29 = vadd.f32 %v1561_v47, %v1401_v13  ;;  %v1705_v22 = vmax.f32 %v1673_v46, 0.0  ;;  %v3355_v46 = vld [vmem:[#allocation8_spill] sm:$0xff]  ;;  %v3356_v47 = vld [vmem:[#allocation7_spill] sm:$0xff] }
 0x183   : > { %v2248_v44 = vpack.c.bf16 %v1700_v12, %v1699_v41  ;;  %v2512_v45 = vpop.f32.mrf.mxu1  ;;  %v2578_v5 = vpop.f32.mrf.mxu0  ;;  %v1671_v42 = vadd.f32 %v3129_v58, %v1632_v53 }
 0x184   : > { %v1674_v24 = vadd.f32 %v3129_v58, %v1635_v61  ;;  %v1583_v26 = vadd.f32 %v2578_v5, %v1422_v57  ;;  %v1633_v48 = vmul.f32 %v3116_v23, %v1562_v29  ;;  %v1425_v32 = vadd.f32 %v2511_v14, %v3352_v62 }
 0x185   : > { %2292 = vst [vmem:[%s3158_s10 + $0x40] sm:$0xff] %v2248_v44   ;;  %v2513_v0 = vpop.f32.mrf.mxu1  ;;  %v1574_v21 = vpop.f32.mrf.mxu0  ;;  %v1703_v52 = vmax.f32 %v1671_v42, 0.0 }
 0x186   : > { %v1706_v1 = vmax.f32 %v1674_v24, 0.0  ;;  %v1638_v18 = vmul.f32 %v3116_v23, %v1583_v26  ;;  %v1575_v54 = vadd.f32 %v1574_v21, %v1414_v15  ;;  %v1672_v56 = vadd.f32 %v3129_v58, %v1633_v48  ;;  %v3357_v15 = vld [vmem:[#allocation9_spill] sm:$0xff] }
 0x187   : > { %v2515_v20 = vpop.f32.mrf.mxu1  ;;  %v2579_v30 = vpop.f32.mrf.mxu0  ;;  %v2514_v2 = vadd.f32 %v2513_v0, %v2512_v45 }
 0x188   : > { %v2263_v6 = vpack.c.bf16 %v1706_v1, %v1705_v22  ;;  %v1586_v51 = vadd.f32 %v2579_v30, %v1425_v32  ;;  %v1704_v28 = vmax.f32 %v1672_v56, 0.0  ;;  %v1636_v25 = vmul.f32 %v3116_v23, %v1575_v54 }
 0x189   : > { %v2516_v4 = vpop.f32.mrf.mxu1  ;;  %v1577_v36 = vpop.f32.mrf.mxu0  ;;  %v1677_v38 = vadd.f32 %v3129_v58, %v1638_v18  ;;  %v1430_v7 = vadd.f32 %v2514_v2, %v3354_v3 }
 0x18a   : > { %2295 = vst [vmem:[%s3158_s10 + $0x58] sm:$0xff] %v2263_v6   ;;  %v1639_v17 = vmul.f32 %v3116_v23, %v1586_v51  ;;  %v2258_v63 = vpack.c.bf16 %v1704_v28, %v1703_v52  ;;  %v1578_v55 = vadd.f32 %v1577_v36, %v1417_v33  ;;  %v2517_v10 = vadd.f32 %v2516_v4, %v2515_v20 }
 0x18b   : > { %v2518_v8 = vpop.f32.mrf.mxu1  ;;  %v2582_v40 = vpop.f32.mrf.mxu0  ;;  %v1675_v16 = vadd.f32 %v3129_v58, %v1636_v25  ;;  %v1709_v9 = vmax.f32 %v1677_v38, 0.0 }
 0x18c   : > { %v1678_v27 = vadd.f32 %v3129_v58, %v1639_v17  ;;  %2294 = vst [vmem:[%s3158_s10 + $0x50] sm:$0xff] %v2258_v63   ;;  %v1637_v37 = vmul.f32 %v3116_v23, %v1578_v55  ;;  %v1433_v61 = vadd.f32 %v2517_v10, %v3356_v47 }
 0x18d   : > { %v2519_v59 = vpop.f32.mrf.mxu1  ;;  %v1590_v35 = vpop.f32.mrf.mxu0  ;;  %v1707_v14 = vmax.f32 %v1675_v16, 0.0 }
 0x18e   : > { %v1710_v39 = vmax.f32 %v1678_v27, 0.0  ;;  %v2520_v34 = vadd.f32 %v2519_v59, %v2518_v8  ;;  %v1591_v50 = vadd.f32 %v1590_v35, %v1430_v7  ;;  %v1676_v43 = vadd.f32 %v3129_v58, %v1637_v37 }
 0x18f   : > { %v2521_v13 = vpop.f32.mrf.mxu1  ;;  %v2583_v41 = vpop.f32.mrf.mxu0 }
 0x190   : > { %v2273_v12 = vpack.c.bf16 %v1710_v39, %v1709_v9  ;;  %v1438_v53 = vadd.f32 %v2520_v34, %v3355_v46  ;;  %v1640_v60 = vmul.f32 %v3116_v23, %v1591_v50  ;;  %v1708_v11 = vmax.f32 %v1676_v43, 0.0 }
 0x191   : > { %v2522_v57 = vpop.f32.mrf.mxu1  ;;  %v1593_v44 = vpop.f32.mrf.mxu0 }
 0x192   : > { %2297 = vst [vmem:[%s3158_s10 + $0x68] sm:$0xff] %v2273_v12   ;;  %v1599_v29 = vadd.f32 %v2582_v40, %v1438_v53  ;;  %v2523_v45 = vadd.f32 %v2522_v57, %v2521_v13  ;;  %v1594_v5 = vadd.f32 %v1593_v44, %v1433_v61  ;;  %v2268_v24 = vpack.c.bf16 %v1708_v11, %v1707_v14 }
 0x193   : > { %v1679_v49 = vadd.f32 %v3129_v58, %v1640_v60 }
 0x194   : > { %v1642_v26 = vmul.f32 %v3116_v23, %v1599_v29  ;;  %v1441_v19 = vadd.f32 %v2523_v45, %v3357_v15  ;;  %v1641_v22 = vmul.f32 %v3116_v23, %v1594_v5  ;;  %2296 = vst [vmem:[%s3158_s10 + $0x60] sm:$0xff] %v2268_v24  }
 0x195   : > { %v1711_v21 = vmax.f32 %v1679_v49, 0.0 }
 0x196   : > { %v1602_v42 = vadd.f32 %v2583_v41, %v1441_v19  ;;  %v1680_v48 = vadd.f32 %v3129_v58, %v1641_v22  ;;  %v1681_v0 = vadd.f32 %v3129_v58, %v1642_v26 }
 0x198   : > { %v1643_v1 = vmul.f32 %v3116_v23, %v1602_v42  ;;  %v1712_v18 = vmax.f32 %v1680_v48, 0.0  ;;  %v1713_v32 = vmax.f32 %v1681_v0, 0.0 }
 0x19a   : > { %v1682_v54 = vadd.f32 %v3129_v58, %v1643_v1  ;;  %v2278_v62 = vpack.c.bf16 %v1712_v18, %v1711_v21 }
 0x19c   : > { %v1714_v56 = vmax.f32 %v1682_v54, 0.0  ;;  %2298 = vst [vmem:[%s3158_s10 + $0x70] sm:$0xff] %v2278_v62  }
 0x19e   : > { %v2283_v20 = vpack.c.bf16 %v1714_v56, %v1713_v32 }
 0x1a0   : > { %2299 = vst [vmem:[%s3158_s10 + $0x78] sm:$0xff] %v2283_v20  }
 0x1a1 PF: > { %s14_s17 = sadd.s32 1, %s2796_s17   ;;  %s3358_s15 = smov %s2792_s16 }
 0x1a2   : > { %p11_p5 = scmp.ge.s32.totalorder %s14_s17, 5   ;;  %s3359_s16 = smov %s3361_s18 }
 0x1a4   :  { %13 = sbr.rel (!%p11_p5) target bundleno = 2 (0x2), region = 75 }

// kernel: multibranch_lstm.14
= control target key start
LH: loop header
LB: loop body
LE: loop exit
PB: predicated region body
PF: predicated region fallthrough
CT: control target
= control target key end

     0   :  { %s847_s9 = smov 0   ;;  %s1101_s0 = inlined_call_operand.vmem [shape: f32[3,8,2,512], index: 0, kind: input, shape index: {}]   ;;  %s1102_s1 = inlined_call_operand.vmem [shape: bf16[3,128,512], index: 1, kind: input, shape index: {}]   ;;  %s1103_s2 = inlined_call_operand.vmem [shape: f32[3,8,2,128], index: 2, kind: output, shape index: {}]  }
   0x1 LB: > { %s687_s10 = sadd.s32 4294967295, %s816_s9   ;;  %p691_p0 = scmp.ge.s32.totalorder %s816_s9, 1  ;;  %s816_s9 = sphi %s847_s9, %s12_s9  }
   0x2   : > { %p122_p1 = scmp.lt.s32.totalorder %s816_s9, 4 }
   0x4   : > { %p123_p2 = pnand %p691_p0, %p122_p1 }
   0x5   : > { %p149_p3 = scmp.lt.s32.totalorder (!%p123_p2), %s687_s10, 2  ;;  %s989_s23 = smov (!%p123_p2), 0  }
   0x6   : > { %126 = sbr.rel (%p123_p2) target bundleno = 319 (0x13f), region = 28 }
   0xb   : > { %v197_v0 = vlaneseq  ;;  %s1111_s10 = smov (!%p149_p3, %s687_s10), 2  ;;  %v985_v43 = vmov 0.0   ;;  %v987_v44 = vmov 0.0  }
   0xc   : > { %s741_s11 = sshll.u32 %s1111_s10, 6  ;;  %s742_s12 = sshll.u32 %s1111_s10, 8 }
   0xd   : > { %v856_v1 = vand.u32 127, %v197_v0  ;;  %s865_s15 = scalar_lea.vmem %s1101_s0, %s741_s11  ;;  %s870_s18 = scalar_lea.vmem %s1102_s1, %s742_s12 }
   0xe   : > { %s743_s19 = sshll.u32 %s1111_s10, 4  ;;  %v873_v5 = vld [vmem:[%s870_s18] sm:$0xff]  ;;  %v876_v6 = vld [vmem:[%s870_s18 + $0x8] sm:$0xff]  ;;  %v879_v7 = vld [vmem:[%s870_s18 + $0x10] sm:$0xff] }
   0xf   : > { %v199_v2 = vadd.s32 128, %v856_v1  ;;  %v200_v3 = vadd.s32 256, %v856_v1  ;;  %v201_v4 = vadd.s32 384, %v856_v1  ;;  %vm250_vm0 = vcmp.lt.s32.totalorder %v856_v1, 64  ;;  %s884_s22 = scalar_lea.vmem %s1103_s2, %s743_s19  ;;  %v887_v10 = vld [vmem:[%s870_s18 + $0x18] sm:$0xff]  ;;  %v890_v11 = vld [vmem:[%s870_s18 + $0x20] sm:$0xff] }
  0x10   : > { %v893_v12 = vld [vmem:[%s870_s18 + $0x28] sm:$0xff]  ;;  %v896_v14 = vld [vmem:[%s870_s18 + $0x30] sm:$0xff]  ;;  %v899_v15 = vld [vmem:[%s870_s18 + $0x38] sm:$0xff] }
  0x11   : > { %v213_v8 = vand.u32 127, %v199_v2  ;;  %v220_v9 = vand.u32 127, %v200_v3  ;;  %v227_v13 = vand.u32 127, %v201_v4  ;;  %v902_v16 = vld [vmem:[%s870_s18 + $0x40] sm:$0xff]  ;;  %v913_v19 = vld [vmem:[%s870_s18 + $0x48] sm:$0xff]  ;;  %v916_v20 = vld [vmem:[%s870_s18 + $0x50] sm:$0xff] }
  0x12   : > { %v919_v21 = vld [vmem:[%s870_s18 + $0x58] sm:$0xff]  ;;  %v926_v23 = vld [vmem:[%s870_s18 + $0x60] sm:$0xff]  ;;  %v929_v24 = vld [vmem:[%s870_s18 + $0x68] sm:$0xff] }
  0x13   : > { %vm904_vm1 = vcmp.lt.s32.totalorder %v213_v8, 64  ;;  %vm908_vm2 = vcmp.lt.s32.totalorder %v220_v9, 64  ;;  %vm921_vm3 = vcmp.lt.s32.totalorder %v227_v13, 64  ;;  %v932_v25 = vld [vmem:[%s870_s18 + $0x70] sm:$0xff]  ;;  %v935_v26 = vld [vmem:[%s870_s18 + $0x78] sm:$0xff]  ;;  %v938_v27 = vld [vmem:[%s870_s18 + $0x80] sm:$0xff] }
  0x14   : > { %v941_v28 = vld [vmem:[%s870_s18 + $0x88] sm:$0xff]  ;;  %v944_v29 = vld [vmem:[%s870_s18 + $0x90] sm:$0xff]  ;;  %v947_v30 = vld [vmem:[%s870_s18 + $0x98] sm:$0xff] }
  0x15   : > { %v950_v31 = vld [vmem:[%s870_s18 + $0xa0] sm:$0xff]  ;;  %v953_v32 = vld [vmem:[%s870_s18 + $0xa8] sm:$0xff]  ;;  %v956_v33 = vld [vmem:[%s870_s18 + $0xb0] sm:$0xff] }
  0x16   : > { %v959_v34 = vld [vmem:[%s870_s18 + $0xb8] sm:$0xff]  ;;  %v962_v35 = vld [vmem:[%s870_s18 + $0xc0] sm:$0xff]  ;;  %v965_v36 = vld [vmem:[%s870_s18 + $0xc8] sm:$0xff] }
  0x17   : > { %v968_v37 = vld [vmem:[%s870_s18 + $0xd0] sm:$0xff]  ;;  %v971_v38 = vld [vmem:[%s870_s18 + $0xd8] sm:$0xff]  ;;  %v974_v39 = vld [vmem:[%s870_s18 + $0xe0] sm:$0xff] }
  0x18   : > { %v977_v40 = vld [vmem:[%s870_s18 + $0xe8] sm:$0xff]  ;;  %v980_v41 = vld [vmem:[%s870_s18 + $0xf0] sm:$0xff]  ;;  %v983_v42 = vld [vmem:[%s870_s18 + $0xf8] sm:$0xff] }
  0x19 LB: >> { %v731_v45 = vcombine.high %v974_v39, %v980_v41  ;;  %v730_v46 = vcombine.low %v974_v39, %v980_v41  ;;  %v727_v47 = vcombine.high %v962_v35, %v968_v37  ;;  %v733_v48 = vcombine.high %v977_v40, %v983_v42  ;;  %s263_s24 = ssub.s32 7, %s828_s23  ;;  %s744_s25 = sshll.u32 %s828_s23, 3  ;;  %s828_s23 = sphi %s989_s23, %s260_s23   ;;  %v824_v44 = vphi %v987_v44, %v590_v44   ;;  %v820_v43 = vphi %v985_v43, %v588_v43  }
  0x1a   : >> { %v732_v49 = vcombine.low %v977_v40, %v983_v42  ;;  %v729_v50 = vcombine.high %v965_v36, %v971_v38  ;;  %v726_v51 = vcombine.low %v962_v35, %v968_v37  ;;  %v723_v52 = vcombine.high %v950_v31, %v956_v33  ;;  %s745_s26 = sshll.u32 %s263_s24, 3  ;;  %s266_s27 = scalar_lea.vmem %s865_s15, %s744_s25 }
  0x1b   : >> { %481 = vmatprep.subr.bf16.mxu0 %v731_v45  ;;  %522 = vmatprep.subr.bf16.mxu1 %v733_v48  ;;  %v728_v53 = vcombine.low %v965_v36, %v971_v38  ;;  %v725_v54 = vcombine.high %v953_v32, %v959_v34  ;;  %v830_v55 = vmov 0   ;;  %v722_v56 = vcombine.low %v950_v31, %v956_v33  ;;  %s270_s28 = scalar_lea.vmem %s865_s15, %s745_s26  ;;  %s737_s29 = sshll.u32 %s828_s23, 1 }
  0x1c   : >> { %482 = vmatpush1.bf16.msra.mxu0 %v730_v46  ;;  %523 = vmatpush1.bf16.msra.mxu1 %v732_v49  ;;  %v719_v57 = vcombine.high %v938_v27, %v944_v29  ;;  %v724_v58 = vcombine.low %v953_v32, %v959_v34  ;;  %v721_v59 = vcombine.high %v941_v28, %v947_v30  ;;  %s592_s30 = scalar_lea.vmem %s884_s22, %s737_s29  ;;  %s738_s3 = sshll.u32 %s263_s24, 1 }
  0x1d   : >> { %483 = vmatprep.subr.bf16.mxu0 %v727_v47  ;;  %524 = vmatprep.subr.bf16.mxu1 %v729_v50  ;;  %v718_v60 = vcombine.low %v938_v27, %v944_v29  ;;  %v715_v61 = vcombine.high %v926_v23, %v932_v25  ;;  %v720_v62 = vcombine.low %v941_v28, %v947_v30  ;;  %s597_s4 = scalar_lea.vmem %s884_s22, %s738_s3  ;;  %s260_s23 = sadd.s32 1, %s828_s23  }
  0x1e   : >> { %513 = vmatprep.mubr.bf16.mxu0 %v830_v55  ;;  %554 = vmatprep.mubr.bf16.mxu1 %v830_v55  ;;  %v717_v63 = vcombine.high %v929_v24, %v935_v26  ;;  %v714_v2 = vcombine.low %v926_v23, %v932_v25  ;;  %v711_v3 = vcombine.high %v902_v16, %v916_v20  ;;  %p257_p4 = scmp.ge.s32.totalorder %s260_s23, 8  }
  0x1f   : >> { %v716_v4 = vcombine.low %v929_v24, %v935_v26  ;;  %v713_v8 = vcombine.high %v913_v19, %v919_v21  ;;  %v710_v9 = vcombine.low %v902_v16, %v916_v20  ;;  %v707_v13 = vcombine.high %v890_v11, %v896_v14 }
  0x20   : >> { %484 = vmatpush1.bf16.msra.mxu0 %v726_v51  ;;  %525 = vmatpush1.bf16.msra.mxu1 %v728_v53  ;;  %v712_v45 = vcombine.low %v913_v19, %v919_v21  ;;  %v709_v46 = vcombine.high %v893_v12, %v899_v15  ;;  %v706_v47 = vcombine.low %v890_v11, %v896_v14 }
  0x21   : >> { %485 = vmatprep.subr.bf16.mxu0 %v723_v52  ;;  %526 = vmatprep.subr.bf16.mxu1 %v725_v54  ;;  %v703_v48 = vcombine.high %v873_v5, %v879_v7  ;;  %v708_v49 = vcombine.low %v893_v12, %v899_v15  ;;  %v705_v50 = vcombine.high %v876_v6, %v887_v10  ;;  %v831_v54 = vmov 1983009808  }
  0x22   : >> { %v702_v51 = vcombine.low %v873_v5, %v879_v7  ;;  %v704_v52 = vcombine.low %v876_v6, %v887_v10  ;;  %v320_v53 = vpack.c.bf16 %v824_v44, %v824_v44  ;;  %v275_v55 = vunpack.c.l.s4 %v831_v54 }
  0x24   : >> { %486 = vmatpush1.bf16.msra.mxu0 %v722_v56  ;;  %527 = vmatpush1.bf16.msra.mxu1 %v724_v58  ;;  %v276_v56 = vunpack.c.0.s8 %v275_v55 }
  0x25   : >> { %487 = vmatprep.subr.bf16.mxu0 %v719_v57  ;;  %528 = vmatprep.subr.bf16.mxu1 %v721_v59  ;;  %v278_v57 = vshrl.u32 %v197_v0, 7  ;;  %v267_v59 = vld [vmem:[%s266_s27] sm:$0xff] }
  0x27   : >> { %v279_v58 = vsub.s32 %v276_v56, %v278_v57 }
  0x28   : >> { %488 = vmatpush1.bf16.msra.mxu0 %v718_v60  ;;  %529 = vmatpush1.bf16.msra.mxu1 %v720_v62  ;;  %v271_v60 = vld [vmem:[%s270_s28] sm:$0xff] }
  0x29   : >> { %489 = vmatprep.subr.bf16.mxu0 %v715_v61  ;;  %530 = vmatprep.subr.bf16.mxu1 %v717_v63  ;;  %v280_v61 = vrot.slane %v267_v59, %v279_v58  ;;  %v302_v44 = vrot.slane %v271_v60, %v279_v58 }
  0x2b   : >> { %v288_v62 = vcombine.high %v280_v61, %v280_v61  ;;  %v310_v63 = vcombine.high %v302_v44, %v302_v44 }
  0x2c   : >> { %490 = vmatpush1.bf16.msra.mxu0 %v714_v2  ;;  %531 = vmatpush1.bf16.msra.mxu1 %v716_v4  ;;  %v273_v2 = vcombine.high %v267_v59, %v267_v59  ;;  %v316_v4 = vsel %vm250_vm0, %v280_v61, %v302_v44 }
  0x2d   : >> { %491 = vmatprep.subr.bf16.mxu0 %v711_v3  ;;  %532 = vmatprep.subr.bf16.mxu1 %v713_v8  ;;  %v295_v3 = vcombine.high %v271_v60, %v271_v60 }
  0x30   : >> { %492 = vmatpush1.bf16.msra.mxu0 %v710_v9  ;;  %533 = vmatpush1.bf16.msra.mxu1 %v712_v45  ;;  %v317_v9 = vsel %vm904_vm1, %v288_v62, %v310_v63  ;;  %v287_v45 = vrot.slane %v273_v2, %v279_v58 }
  0x31   : >> { %493 = vmatprep.subr.bf16.mxu0 %v707_v13  ;;  %534 = vmatprep.subr.bf16.mxu1 %v709_v46  ;;  %v309_v46 = vrot.slane %v295_v3, %v279_v58 }
  0x32   : >> { %v289_v54 = vcombine.high %v287_v45, %v287_v45 }
  0x33   : >> { %v311_v55 = vcombine.high %v309_v46, %v309_v46  ;;  %v318_v58 = vsel %vm908_vm2, %v287_v45, %v309_v46 }
  0x34   : >> { %494 = vmatpush1.bf16.msra.mxu0 %v706_v47  ;;  %535 = vmatpush1.bf16.msra.mxu1 %v708_v49 }
  0x35   : >> { %495 = vmatprep.subr.bf16.mxu0 %v703_v48  ;;  %536 = vmatprep.subr.bf16.mxu1 %v705_v50  ;;  %v319_v60 = vsel %vm921_vm3, %v289_v54, %v311_v55 }
  0x38   : >> { %496 = vmatpush1.bf16.msra.mxu0 %v702_v51  ;;  %537 = vmatpush1.bf16.msra.mxu1 %v704_v52 }
  0x3b   : >> { %514 = vmatmul.mubr.bf16.vlgmr.msra.gmra.mxu0 %v320_v53  ;;  %555 = vmatmul.mubr.bf16.vlgmr.msra.gmra.mxu1 %v320_v53 }
  0xfb   : >> { %v515_v8 = vpop.f32.mrf.mxu0  ;;  %v556_v47 = vpop.f32.mrf.mxu1 }
  0xfc   : >> { %v563_v13 = vadd.f32 %v515_v8, %v316_v4  ;;  %v565_v44 = vadd.f32 %v556_v47, %v318_v58 }
  0xfd   : >> { %v517_v48 = vpop.f32.mrf.mxu0  ;;  %v558_v51 = vpop.f32.mrf.mxu1 }
  0xfe   : >> { %v734_v49 = vmul.f32 -1.442695, %v563_v13  ;;  %v564_v50 = vadd.f32 %v517_v48, %v317_v9  ;;  %v566_v61 = vadd.f32 %v558_v51, %v319_v60  ;;  %v593_v51 = vld [vmem:[%s592_s30] sm:$0x3] }
  0xff   : >> { %v519_v52 = vpop.f32.mrf.mxu0  ;;  %v560_v56 = vpop.f32.mrf.mxu1 }
 0x100   : >> { %782 = vpow2.f32 %v734_v49  ;;  %v735_v53 = vmul.f32 -1.442695, %v564_v50  ;;  %v736_v62 = vmul.f32 -1.442695, %v566_v61 }
 0x101   : >> { %v520_v57 = vpop.f32.mrf.mxu0  ;;  %v561_v59 = vpop.f32.mrf.mxu1 }
 0x102   : >> { %784 = vpow2.f32 %v735_v53 }
 0x103   : >> { %786 = vtanh.f32 %v565_v44 }
 0x104   : >> { %788 = vpow2.f32 %v736_v62 }
 0x10d   : >> { %v783_v63 = vpop.eup %782 }
 0x10e   : >> { %v570_v2 = vadd.f32 1.0, %v783_v63 }
 0x10f   : >> { %v785_v3 = vpop.eup %784 }
 0x110   : >> { %790 = vrcp.f32 %v570_v2  ;;  %v576_v4 = vadd.f32 1.0, %v785_v3  ;;  %v787_v8 = vpop.eup %786 }
 0x111   : >> { %v789_v9 = vpop.eup %788 }
 0x112   : >> { %792 = vrcp.f32 %v576_v4  ;;  %v583_v45 = vadd.f32 1.0, %v789_v9 }
 0x114   : >> { %794 = vrcp.f32 %v583_v45 }
 0x11d   : >> { %v791_v13 = vpop.eup %790 }
 0x11e   : >> { %v587_v47 = vmul.f32 %v791_v13, %v787_v8 }
 0x11f   : >> { %v793_v48 = vpop.eup %792 }
 0x120   : >> { %v586_v46 = vmul.f32 %v820_v43, %v793_v48 }
 0x121   : >> { %v795_v49 = vpop.eup %794 }
 0x122   : >> { %v588_v43 = vadd.f32 %v587_v47, %v586_v46  }
 0x124   : >> { %796 = vtanh.f32 %v588_v43 }
 0x131   : >> { %v797_v50 = vpop.eup %796 }
 0x132   : >> { %v590_v44 = vmul.f32 %v797_v50, %v795_v49  }
 0x134   : >> { %v594_v52 = vsel %vm250_vm0, %v590_v44, %v593_v51 }
 0x135   : >> { %595 = vst [vmem:[%s592_s30] sm:$0x3] %v594_v52 }
 0x13a   : > { %259 = sbr.rel (!%p257_p4) target bundleno = 25 (0x19), region = 72 }
 0x13c   : >> { %v598_v53 = vld [vmem:[%s597_s4] sm:$0x3] }
 0x13d   : >> { %v599_v54 = vsel %vm250_vm0, %v598_v53, %v590_v44 }
 0x13e   : >> { %600 = vst [vmem:[%s597_s4] sm:$0x3] %v599_v54 }
 0x13f PF: > { %s12_s9 = sadd.s32 1, %s816_s9  }
 0x140   : > { %p9_p5 = scmp.ge.s32.totalorder %s12_s9, 5  }
 0x142   :  { %11 = sbr.rel (!%p9_p5) target bundleno = 1 (0x1), region = 83 }

// kernel: multibranch_lstm.17
= control target key start
LH: loop header
LB: loop body
LE: loop exit
PB: predicated region body
PF: predicated region fallthrough
CT: control target
= control target key end

     0   :  { %s2019_s0 = inlined_call_operand.vmem [shape: f32[3,8,2,128], index: 0, kind: input, shape index: {}]   ;;  %s2020_s1 = inlined_call_operand.vmem [shape: bf16[128,128], index: 1, kind: input, shape index: {}]   ;;  %s2021_s2 = inlined_call_operand.vmem [shape: f32[1,128], index: 2, kind: input, shape index: {}]   ;;  %s2022_s3 = inlined_call_operand.vmem [shape: f32[1,128], index: 3, kind: input, shape index: {}]   ;;  %s2023_s4 = inlined_call_operand.<no memory space> [shape: f32[1,1], index: 4, kind: input, shape index: {}]   ;;  %s2024_s5 = inlined_call_operand.vmem [shape: bf16[128,128], index: 5, kind: input, shape index: {}]   ;;  %s2025_s6 = inlined_call_operand.vmem [shape: f32[1,128], index: 6, kind: input, shape index: {}]   ;;  %s2026_s7 = inlined_call_operand.vmem [shape: bf16[128,8], index: 7, kind: input, shape index: {}]   ;;  %s2027_s8 = inlined_call_operand.vmem [shape: f32[1,8], index: 8, kind: input, shape index: {}]   ;;  %s2028_s9 = inlined_call_operand.hbm [shape: f32[2,8], index: 9, kind: output, shape index: {}]  }
   0x1   :  { %v14_v0 = vstv %s2023_s4 }
   0x2   :  { %15 = vst [vmem:[#allocation3] sm:$0x1] %v14_v0 }
   0x3   :  { %v1447_v1 = vld [vmem:[%s2020_s1 + $0x38] sm:$0xff]   ;;  %v1571_v2 = vmov 0.0   ;;  %v1448_v3 = vld [vmem:[%s2020_s1 + $0x30] sm:$0xff]   ;;  %vm1572_vm0 = vmmov 0   ;;  %v1449_v4 = vld [vmem:[%s2020_s1 + $0x28] sm:$0xff]   ;;  %v94_v5 = vlaneseq }
   0x4   :  { %1371 = vmatprep.subr.bf16.mxu0 %v1571_v2  ;;  %40 = vst [vmem:[#allocation2] sm:$0x3] %v1571_v2  ;;  %1399 = vmatprep.subr.bf16.mxu1 %v1571_v2  ;;  %v1450_v6 = vld [vmem:[%s2020_s1 + $0x20] sm:$0xff]   ;;  %v1573_v7 = vmov 1983009808   ;;  %v1451_v9 = vld [vmem:[%s2020_s1 + $0x18] sm:$0xff]  }
   0x5   :  { %1372 = vmatpush3.bf16.msra.mxu0 %v1447_v1  ;;  %1387 = vmatprep.mubr.msk.bf16.mxu0 %vm1572_vm0, %v1571_v2  ;;  %v92_v8 = vunpack.c.l.s4 %v1573_v7  ;;  %v1658_v10 = vld [vmem:[%s2019_s0] sm:$0x3]  ;;  %v1663_v11 = vld [vmem:[%s2019_s0 + $0x2] sm:$0x3]  ;;  %v1665_v12 = vshrl.u32 %v94_v5, 7  ;;  %v1452_v20 = vld [vmem:[%s2020_s1 + $0x10] sm:$0xff]  }
   0x6   :  { %1373 = vmatprep.subr.bf16.mxu0 %v1571_v2  ;;  %1415 = vmatprep.mubr.msk.bf16.mxu1 %vm1572_vm0, %v1571_v2  ;;  %v1670_v13 = vld [vmem:[%s2019_s0 + $0x4] sm:$0x3]  ;;  %v1675_v14 = vld [vmem:[%s2019_s0 + $0x6] sm:$0x3]  ;;  %v1680_v15 = vld [vmem:[%s2019_s0 + $0x8] sm:$0x3]  ;;  %v89_v21 = vcombine.low %v1658_v10, %v1663_v11 }
   0x7   :  { %v93_v16 = vunpack.c.0.s8 %v92_v8  ;;  %v1685_v17 = vld [vmem:[%s2019_s0 + $0xa] sm:$0x3]  ;;  %v47_v18 = vld [vmem:[%s2019_s0 + $0xc] sm:$0x3]  ;;  %v48_v19 = vld [vmem:[%s2019_s0 + $0xe] sm:$0x3]  ;;  %v90_v22 = vcombine.low %v1670_v13, %v1675_v14 }
   0x8   :  { %v106_v24 = vcombine.low %v1680_v15, %v1685_v17  ;;  %v107_v25 = vcombine.low %v47_v18, %v48_v19  ;;  %v1710_v26 = vld [vmem:[%s2019_s0 + $0x10] sm:$0x3]  ;;  %v1715_v27 = vld [vmem:[%s2019_s0 + $0x12] sm:$0x3]  ;;  %v1720_v28 = vld [vmem:[%s2019_s0 + $0x14] sm:$0x3] }
   0x9   :  { %1374 = vmatpush3.bf16.msra.mxu0 %v1448_v3  ;;  %v1702_v23 = vsub.s32 %v93_v16, %v1665_v12  ;;  %v1725_v29 = vld [vmem:[%s2019_s0 + $0x16] sm:$0x3]  ;;  %v1453_v30 = vld [vmem:[%s2020_s1 + $0x8] sm:$0xff]   ;;  %v1733_v31 = vld [vmem:[%s2019_s0 + $0x18] sm:$0x3]  ;;  %v123_v40 = vcombine.low %v1710_v26, %v1715_v27 }
   0xa   :  { %1375 = vmatprep.subr.bf16.mxu0 %v1571_v2  ;;  %v1738_v32 = vld [vmem:[%s2019_s0 + $0x1a] sm:$0x3]  ;;  %v1743_v33 = vld [vmem:[%s2019_s0 + $0x1c] sm:$0x3]  ;;  %v1748_v34 = vld [vmem:[%s2019_s0 + $0x1e] sm:$0x3]  ;;  %v124_v41 = vcombine.low %v1720_v28, %v1725_v29 }
   0xb   :  { %v97_v35 = vrot.slane %v89_v21, %v1702_v23  ;;  %v104_v36 = vrot.slane %v90_v22, %v1702_v23  ;;  %v114_v37 = vrot.slane %v106_v24, %v1702_v23  ;;  %v121_v38 = vrot.slane %v107_v25, %v1702_v23  ;;  %v1454_v39 = vld [vmem:[%s2020_s1] sm:$0xff]  }
   0xc   :  { %v140_v44 = vcombine.low %v1733_v31, %v1738_v32  ;;  %v141_v45 = vcombine.low %v1743_v33, %v1748_v34 }
   0xd   :  { %1376 = vmatpush3.bf16.msra.mxu0 %v1449_v4  ;;  %v105_v42 = vcombine.low %v97_v35, %v104_v36  ;;  %v122_v43 = vcombine.low %v114_v37, %v121_v38 }
   0xe   :  { %1377 = vmatprep.subr.bf16.mxu0 %v1571_v2 }
  0x11   :  { %1378 = vmatpush3.bf16.msra.mxu0 %v1450_v6 }
  0x12   :  { %1379 = vmatprep.subr.bf16.mxu0 %v1571_v2 }
  0x15   :  { %1380 = vmatpush3.bf16.msra.mxu0 %v1451_v9 }
  0x16   :  { %1381 = vmatprep.subr.bf16.mxu0 %v1571_v2 }
  0x19   :  { %1382 = vmatpush3.bf16.msra.mxu0 %v1452_v20 }
  0x1a   :  { %1383 = vmatprep.subr.bf16.mxu0 %v1571_v2 }
  0x1d   :  { %1384 = vmatpush3.bf16.msra.mxu0 %v1453_v30 }
  0x1e   :  { %1385 = vmatprep.subr.bf16.mxu0 %v1571_v2 }
  0x1f   :  { %16 = vsyncpa [#allocation5], 0  ;;  %v131_v46 = vrot.slane %v123_v40, %v1702_v23  ;;  %v1771_v47 = vld [vmem:[%s2019_s0 + $0x20] sm:$0x3]  ;;  %v1776_v48 = vld [vmem:[%s2019_s0 + $0x22] sm:$0x3]  ;;  %v197_v49 = vpack.c.bf16 %v122_v43, %v105_v42  ;;  %v138_v50 = vrot.slane %v124_v41, %v1702_v23  ;;  %v148_v51 = vrot.slane %v140_v44, %v1702_v23 }
  0x20   :  { %v155_v52 = vrot.slane %v141_v45, %v1702_v23  ;;  %v1784_v53 = vld [vmem:[%s2019_s0 + $0x24] sm:$0x3]  ;;  %v1789_v54 = vld [vmem:[%s2019_s0 + $0x26] sm:$0x3]  ;;  %v1794_v55 = vld [vmem:[%s2019_s0 + $0x28] sm:$0x3]  ;;  %v157_v59 = vcombine.low %v1771_v47, %v1776_v48 }
  0x21   :  { %1386 = vmatpush3.bf16.msra.mxu0 %v1454_v39  ;;  %v1799_v56 = vld [vmem:[%s2019_s0 + $0x2a] sm:$0x3]  ;;  %v1804_v57 = vld [vmem:[%s2019_s0 + $0x2c] sm:$0x3]  ;;  %v1809_v58 = vld [vmem:[%s2019_s0 + $0x2e] sm:$0x3]  ;;  %v158_v60 = vcombine.low %v1784_v53, %v1789_v54  ;;  %v139_v61 = vcombine.low %v131_v46, %v138_v50 }
  0x22   :  { %1419 = vmatprep.subr.bf16.mxu0 %v1571_v2  ;;  %v156_v62 = vcombine.low %v148_v51, %v155_v52  ;;  %v174_v63 = vcombine.low %v1794_v55, %v1799_v56  ;;  %v175_v0 = vcombine.low %v1804_v57, %v1809_v58  ;;  %v165_v1 = vrot.slane %v157_v59, %v1702_v23  ;;  %v1313_v16 = vld [vmem:[%s2021_s2] ss:$0 sm:$0xff] }
  0x23   :  { %v172_v4 = vrot.slane %v158_v60, %v1702_v23  ;;  %v1322_v38 = vld [vmem:[%s2022_s3] ss:$0 sm:$0xff]  ;;  %vm1049_vm1 = vcmask 1041408   ;;  %vm1297_vm2 = vcmask 58368  }
  0x24   :  { %1388 = vmatmul.mubr.bf16.vlgmr.msra.gmra.mxu0 %v197_v49  ;;  %v198_v3 = vpack.c.bf16 %v156_v62, %v139_v61  ;;  %v182_v5 = vrot.slane %v174_v63, %v1702_v23  ;;  %v189_v6 = vrot.slane %v175_v0, %v1702_v23 }
  0x25   :  { %1391 = vmatprep.mubr.msk.bf16.mxu0 %vm1572_vm0, %v1571_v2  ;;  %v173_v7 = vcombine.low %v165_v1, %v172_v4 }
  0x26   :  { %v190_v8 = vcombine.low %v182_v5, %v189_v6  ;;  %v1323_v5 = vld [vmem:[#allocation3] ss:$0 sm:$0xff] }
  0x28   :  { %v199_v9 = vpack.c.bf16 %v190_v8, %v173_v7 }
  0x2c   :  { %1392 = vmatmul.mubr.bf16.gmra.mxu0 %v198_v3  ;;  %v1574_v3 = vmov 0  }
  0x2d   :  { %1395 = vmatprep.mubr.msk.bf16.mxu0 %vm1572_vm0, %v1571_v2  ;;  %1445 = vset.pattern.permute.xlu1 %v1574_v3 }
  0x2e   :  { %1446 = vset.pattern.permute.xlu0 %v1574_v3 }
  0x34   :  { %1396 = vmatmul.mubr.bf16.gmra.mxu0 %v199_v9 }
  0x35   :  { %1435 = vmatprep.mubr.msk.bf16.mxu0 %vm1572_vm0, %v1571_v2 }
  0xe4   :  { %v305_v18 = vpop.f32.mrf.mxu0 }
  0xe5   :  { %v306_v19 = vadd.f32 %v1313_v16, %v305_v18 }
  0xe6   :  { %v1389_v20 = vpop.f32.mrf.mxu0 }
  0xe7   :  { %1471 = vtanh.f32 %v306_v19 }
  0xe8   :  { %v308_v21 = vpop.f32.mrf.mxu0 }
  0xe9   :  { %v309_v41 = vadd.f32 %v1313_v16, %v308_v21 }
  0xea   :  { %v1390_v22 = vpop.f32.mrf.mxu0 }
  0xec   :  { %v313_v24 = vpop.f32.mrf.mxu0 }
  0xed   :  { %v314_v25 = vadd.f32 %v1313_v16, %v313_v24 }
  0xee   :  { %v1393_v30 = vpop.f32.mrf.mxu0 }
  0xef   :  { %1473 = vtanh.f32 %v314_v25 }
  0xf0   :  { %v316_v35 = vpop.f32.mrf.mxu0 }
  0xf1   :  { %v317_v36 = vadd.f32 %v1313_v16, %v316_v35 }
  0xf2   :  { %v1394_v37 = vpop.f32.mrf.mxu0 }
  0xf3   :  { %1475 = vtanh.f32 %v317_v36 }
  0xf4   :  { %v1472_v39 = vpop.eup %1471  ;;  %v321_v40 = vpop.f32.mrf.mxu0 }
  0xf5   :  { %v322_v42 = vadd.f32 %v1313_v16, %v321_v40  ;;  %v341_v43 = vmul.f32 %v1472_v39, %v1322_v38 }
  0xf6   :  { %v1397_v44 = vpop.f32.mrf.mxu0 }
  0xf7   :  { %1477 = vtanh.f32 %v322_v42  ;;  %347 = vadd.xlane.f32.xlu0 %v341_v43 }
  0xf8   :  { %v324_v45 = vpop.f32.mrf.mxu0  ;;  %1479 = vtanh.f32 %v309_v41 }
  0xf9   :  { %v325_v46 = vadd.f32 %v1313_v16, %v324_v45 }
  0xfa   :  { %v1398_v49 = vpop.f32.mrf.mxu0 }
  0xfb   :  { %1481 = vtanh.f32 %v325_v46 }
  0xfc   :  { %v1474_v50 = vpop.eup %1473 }
  0xfd   :  { %v343_v51 = vmul.f32 %v1474_v50, %v1322_v38 }
  0xff   :  { %351 = vadd.xlane.f32.xlu0 %v343_v51 }
 0x100   :  { %v1476_v52 = vpop.eup %1475 }
 0x101   :  { %v344_v59 = vmul.f32 %v1476_v52, %v1322_v38 }
 0x103   :  { %353 = vadd.xlane.f32.xlu0 %v344_v59 }
 0x104   :  { %v1478_v60 = vpop.eup %1477 }
 0x105   :  { %v345_v61 = vmul.f32 %v1478_v60, %v1322_v38  ;;  %v1480_v62 = vpop.eup %1479 }
 0x106   :  { %v342_v63 = vmul.f32 %v1480_v62, %v1322_v38 }
 0x107   :  { %355 = vadd.xlane.f32.xlu1 %v345_v61 }
 0x108   :  { %v1482_v0 = vpop.eup %1481 }
 0x109   :  { %v346_v1 = vmul.f32 %v1482_v0, %v1322_v38 }
 0x10b   :  { %349 = vadd.xlane.f32.xlu1 %v342_v63 }
 0x10f   :  { %357 = vadd.xlane.f32.xlu1 %v346_v1 }
 0x180   :  { %v348_v4 = vpop.xlane.xlu0 %347 }
 0x181   :  { %v366_v8 = vadd.f32 %v1323_v5, %v348_v4 }
 0x183   :  { %v378_v16 = vcombine.high %v366_v8, %v366_v8  ;;  %v385_v19 = vrot.slane %v366_v8, %v1702_v23 }
 0x185   :  { %v392_v24 = vrot.slane %v378_v16, %v1702_v23  ;;  %v393_v37 = vcombine.high %v385_v19, %v385_v19 }
 0x188   :  { %v352_v6 = vpop.xlane.xlu0 %351 }
 0x189   :  { %v368_v7 = vadd.f32 %v1323_v5, %v352_v6  ;;  %v394_v6 = vcombine.high %v392_v24, %v392_v24 }
 0x18b   :  { %v412_v9 = vcombine.high %v368_v7, %v368_v7  ;;  %v419_v18 = vrot.slane %v368_v7, %v1702_v23 }
 0x18c   :  { %v354_v60 = vpop.xlane.xlu0 %353 }
 0x18d   :  { %v426_v21 = vrot.slane %v412_v9, %v1702_v23  ;;  %v427_v25 = vcombine.high %v419_v18, %v419_v18  ;;  %v504_v30 = vmax.f32 %v385_v19, %v419_v18  ;;  %v369_v7 = vadd.f32 %v1323_v5, %v354_v60 }
 0x18f   :  { %v506_v38 = vmax.f32 %v392_v24, %v426_v21  ;;  %v505_v42 = vmax.f32 %v393_v37, %v427_v25  ;;  %v428_v1 = vcombine.high %v426_v21, %v426_v21 }
 0x190   :  { %v356_v20 = vpop.xlane.xlu1 %355 }
 0x191   :  { %v370_v22 = vadd.f32 %v1323_v5, %v356_v20  ;;  %v507_v20 = vmax.f32 %v394_v6, %v428_v1 }
 0x193   :  { %v446_v35 = vcombine.high %v370_v22, %v370_v22  ;;  %v453_v36 = vrot.slane %v370_v22, %v1702_v23 }
 0x194   :  { %v350_v45 = vpop.xlane.xlu1 %349 }
 0x195   :  { %v460_v39 = vrot.slane %v446_v35, %v1702_v23  ;;  %v461_v40 = vcombine.high %v453_v36, %v453_v36  ;;  %v512_v41 = vmax.f32 %v504_v30, %v453_v36  ;;  %v367_v0 = vadd.f32 %v1323_v5, %v350_v45 }
 0x196   :  { %v436_v35 = vrot.slane %v369_v7, %v1702_v23 }
 0x197   :  { %v514_v43 = vmax.f32 %v506_v38, %v460_v39  ;;  %v520_v44 = vsub.f32 %v385_v19, %v512_v41  ;;  %v544_v46 = vsub.f32 %v419_v18, %v512_v41  ;;  %v513_v49 = vmax.f32 %v505_v42, %v461_v40 }
 0x198   :  { %v568_v59 = vsub.f32 %v453_v36, %v512_v41  ;;  %v358_v63 = vpop.xlane.xlu1 %357  ;;  %v462_v9 = vcombine.high %v460_v39, %v460_v39  ;;  %v402_v19 = vrot.slane %v367_v0, %v1702_v23  ;;  %v444_v42 = vcombine.high %v436_v35, %v436_v35 }
 0x199   :  { %v528_v50 = vmul.f32 1.442695, %v520_v44  ;;  %v546_v51 = vsub.f32 %v426_v21, %v514_v43  ;;  %v552_v52 = vmul.f32 1.442695, %v544_v46  ;;  %v569_v62 = vsub.f32 %v461_v40, %v513_v49 }
 0x19a   :  { %v521_v3 = vsub.f32 %v393_v37, %v513_v49  ;;  %v576_v4 = vmul.f32 1.442695, %v568_v59  ;;  %v371_v8 = vadd.f32 %v1323_v5, %v358_v63  ;;  %v570_v16 = vsub.f32 %v460_v39, %v514_v43 }
 0x19b   :  { %1483 = vpow2.f32 %v528_v50  ;;  %v556_v61 = vmul.f32 1.442695, %v546_v51  ;;  %v578_v18 = vmul.f32 1.442695, %v569_v62  ;;  %v545_v30 = vsub.f32 %v427_v25, %v513_v49 }
 0x19c   :  { %1485 = vpow2.f32 %v552_v52  ;;  %v530_v22 = vmul.f32 1.442695, %v521_v3  ;;  %v470_v21 = vrot.slane %v371_v8, %v1702_v23  ;;  %v515_v36 = vmax.f32 %v507_v20, %v462_v9 }
 0x19d   :  { %1487 = vpow2.f32 %v556_v61  ;;  %v580_v37 = vmul.f32 1.442695, %v570_v16  ;;  %v410_v38 = vcombine.high %v402_v19, %v402_v19  ;;  %v522_v40 = vsub.f32 %v392_v24, %v514_v43 }
 0x19e   :  { %1489 = vpow2.f32 %v576_v4  ;;  %v554_v5 = vmul.f32 1.442695, %v545_v30  ;;  %v508_v41 = vmax.f32 %v402_v19, %v436_v35  ;;  %v478_v44 = vcombine.high %v470_v21, %v470_v21 }
 0x19f   :  { %1491 = vpow2.f32 %v578_v18  ;;  %v523_v45 = vsub.f32 %v394_v6, %v515_v36  ;;  %v509_v25 = vmax.f32 %v410_v38, %v444_v42  ;;  %v532_v49 = vmul.f32 1.442695, %v522_v40 }
 0x1a0   :  { %1493 = vpow2.f32 %v530_v22  ;;  %v516_v46 = vmax.f32 %v508_v41, %v470_v21  ;;  %v547_v50 = vsub.f32 %v428_v1, %v515_v36  ;;  %v571_v43 = vsub.f32 %v462_v9, %v515_v36 }
 0x1a1   :  { %1495 = vpow2.f32 %v580_v37  ;;  %v517_v52 = vmax.f32 %v509_v25, %v478_v44  ;;  %v534_v59 = vmul.f32 1.442695, %v523_v45  ;;  %v395_v62 = vcombine.high %v367_v0, %v367_v0 }
 0x1a2   :  { %1497 = vpow2.f32 %v554_v5  ;;  %v524_v60 = vsub.f32 %v402_v19, %v516_v46  ;;  %v558_v61 = vmul.f32 1.442695, %v547_v50  ;;  %v548_v63 = vsub.f32 %v436_v35, %v516_v46 }
 0x1a3   :  { %1499 = vpow2.f32 %v532_v49  ;;  %v429_v4 = vcombine.high %v369_v7, %v369_v7  ;;  %v525_v6 = vsub.f32 %v410_v38, %v517_v52  ;;  %v463_v1 = vcombine.high %v371_v8, %v371_v8 }
 0x1a4   :  { %1501 = vpow2.f32 %v534_v59  ;;  %v536_v16 = vmul.f32 1.442695, %v524_v60  ;;  %v549_v18 = vsub.f32 %v444_v42, %v517_v52  ;;  %v582_v19 = vmul.f32 1.442695, %v571_v43 }
 0x1a5   :  { %1503 = vpow2.f32 %v558_v61  ;;  %v409_v9 = vrot.slane %v395_v62, %v1702_v23  ;;  %v560_v22 = vmul.f32 1.442695, %v548_v63  ;;  %v572_v30 = vsub.f32 %v470_v21, %v516_v46 }
 0x1a6   :  { %v443_v35 = vrot.slane %v429_v4, %v1702_v23  ;;  %v538_v7 = vmul.f32 1.442695, %v525_v6  ;;  %v1854_v36 = vrot.slane %v463_v1, %v1702_v23  ;;  %1505 = vpow2.f32 %v536_v16 }
 0x1a7   :  { %v562_v8 = vmul.f32 1.442695, %v549_v18  ;;  %1507 = vpow2.f32 %v582_v19  ;;  %v573_v5 = vsub.f32 %v478_v44, %v517_v52  ;;  %v584_v41 = vmul.f32 1.442695, %v572_v30 }
 0x1a8   :  { %v1484_v39 = vpop.eup %1483  ;;  %v510_v40 = vmax.f32 %v409_v9, %v443_v35  ;;  %1509 = vpow2.f32 %v560_v22  ;;  %v411_v23 = vcombine.high %v409_v9, %v409_v9  ;;  %v479_v49 = vcombine.high %v1854_v36, %v1854_v36 }
 0x1a9   :  { %610 = vperm.xlu1 %1445, %v1484_v39   ;;  %v1486_v51 = vpop.eup %1485  ;;  %1511 = vpow2.f32 %v538_v7  ;;  %v586_v46 = vmul.f32 1.442695, %v573_v5 }
 0x1aa   :  { %v1845_v24 = vpop.eup %1487  ;;  %v592_v37 = vadd.f32 %v1486_v51, %v1484_v39  ;;  %v518_v42 = vmax.f32 %v510_v40, %v1854_v36  ;;  %1513 = vpow2.f32 %v562_v8  ;;  %v445_v39 = vcombine.high %v443_v35, %v443_v35 }
 0x1ab   :  { %738 = vperm.xlu0 %1446, %v1845_v24   ;;  %v1490_v3 = vpop.eup %1489  ;;  %1515 = vpow2.f32 %v584_v41 }
 0x1ac   :  { %v1848_v20 = vpop.eup %1491  ;;  %v600_v45 = vadd.f32 %v1490_v3, %v592_v37  ;;  %v526_v50 = vsub.f32 %v409_v9, %v518_v42  ;;  %1517 = vpow2.f32 %v586_v46  ;;  %v550_v6 = vsub.f32 %v443_v35, %v518_v42 }
 0x1ad   :  { %714 = vperm.xlu1 %1445, %v1486_v51   ;;  %v1494_v0 = vpop.eup %1493  ;;  %v511_v51 = vmax.f32 %v411_v23, %v445_v39  ;;  %v574_v40 = vsub.f32 %v1854_v36, %v518_v42 }
 0x1ae   :  { %v1496_v38 = vpop.eup %1495  ;;  %v540_v60 = vmul.f32 1.442695, %v526_v50  ;;  %v564_v30 = vmul.f32 1.442695, %v550_v6  ;;  %v1465_v6 = vld [vmem:[%s2026_s7 + $0x28] sm:$0xff]  }
 0x1af   :  { %838 = vperm.xlu0 %1446, %v1848_v20   ;;  %v1498_v21 = vpop.eup %1497  ;;  %v519_v59 = vmax.f32 %v511_v51, %v479_v49 }
 0x1b0   :  { %v1500_v25 = vpop.eup %1499  ;;  %1519 = vpow2.f32 %v540_v60  ;;  %v593_v1 = vadd.f32 %v1498_v21, %v1494_v0  ;;  %v1457_v60 = vld [vmem:[%s2024_s5 + $0x28] sm:$0xff]  }
 0x1b1   :  { %826 = vperm.xlu1 %1445, %v1490_v3   ;;  %v1502_v44 = vpop.eup %1501  ;;  %v551_v3 = vsub.f32 %v445_v39, %v519_v59  ;;  %v575_v19 = vsub.f32 %v479_v49, %v519_v59  ;;  %v527_v22 = vsub.f32 %v411_v23, %v519_v59  ;;  %v594_v8 = vadd.f32 %v1500_v25, %v1845_v24  ;;  %v1456_v59 = vld [vmem:[%s2024_s5 + $0x30] sm:$0xff]  }
 0x1b2   :  { %v1504_v52 = vpop.eup %1503  ;;  %v601_v7 = vadd.f32 %v1848_v20, %v593_v1  ;;  %v1462_v1 = vld [vmem:[%s2024_s5] sm:$0xff]  }
 0x1b3   :  { %850 = vperm.xlu0 %1446, %v1496_v38   ;;  %v1506_v43 = vpop.eup %1505  ;;  %v566_v18 = vmul.f32 1.442695, %v551_v3  ;;  %v590_v5 = vmul.f32 1.442695, %v575_v19  ;;  %v602_v41 = vadd.f32 %v1496_v38, %v594_v8  ;;  %v595_v20 = vadd.f32 %v1504_v52, %v1502_v44  ;;  %v1464_v3 = vld [vmem:[%s2026_s7 + $0x30] sm:$0xff]  }
 0x1b4   :  { %v1508_v61 = vpop.eup %1507  ;;  %v1468_v19 = vld [vmem:[%s2026_s7 + $0x10] sm:$0xff]  }
 0x1b5   :  { %622 = vperm.xlu1 %1445, %v1494_v0   ;;  %v1510_v62 = vpop.eup %1509  ;;  %1521 = vpow2.f32 %v566_v18  ;;  %v542_v0 = vmul.f32 1.442695, %v527_v22  ;;  %v603_v24 = vadd.f32 %v1508_v61, %v595_v20  ;;  %v1467_v18 = vld [vmem:[%s2026_s7 + $0x18] sm:$0xff]  }
 0x1b6   :  { %v1512_v63 = vpop.eup %1511  ;;  %1523 = vpow2.f32 %v564_v30  ;;  %v596_v23 = vadd.f32 %v1510_v62, %v1506_v43 }
 0x1b7   :  { %938 = vperm.xlu0 %1446, %v600_v45   ;;  %v1514_v4 = vpop.eup %1513  ;;  %1525 = vpow2.f32 %v590_v5 }
 0x1b8   :  { %v1516_v16 = vpop.eup %1515  ;;  %v597_v9 = vadd.f32 %v1514_v4, %v1512_v63  ;;  %1527 = vpow2.f32 %v542_v0 }
 0x1b9   :  { %726 = vperm.xlu1 %1445, %v1498_v21   ;;  %v1518_v37 = vpop.eup %1517  ;;  %v588_v21 = vmul.f32 1.442695, %v574_v40  ;;  %v604_v42 = vadd.f32 %v1516_v16, %v596_v23  ;;  %v1575_v23 = vmov 269488144  }
 0x1ba   :  { %v605_v35 = vadd.f32 %v1518_v37, %v597_v9 }
 0x1bb   :  { %646 = vperm.xlu0 %1446, %v1502_v44   ;;  %1529 = vpow2.f32 %v588_v21 }
 0x1bd   :  { %634 = vperm.xlu1 %1445, %v1500_v25   ;;  %v1520_v45 = vpop.eup %1519 }
 0x1bf   :  { %658 = vperm.xlu0 %1446, %v1506_v43   ;;  %v1458_v43 = vld [vmem:[%s2024_s5 + $0x20] sm:$0xff]  }
 0x1c1   :  { %750 = vperm.xlu1 %1445, %v1504_v52   ;;  %v1455_v52 = vld [vmem:[%s2024_s5 + $0x38] sm:$0xff]  }
 0x1c2   :  { %v1522_v36 = vpop.eup %1521  ;;  %1400 = vmatpush3.bf16.msra.mxu1 %v1455_v52 }
 0x1c3   :  { %862 = vperm.xlu0 %1446, %v1508_v61   ;;  %v1524_v46 = vpop.eup %1523  ;;  %1401 = vmatprep.subr.bf16.mxu1 %v1571_v2  ;;  %v1459_v61 = vld [vmem:[%s2024_s5 + $0x18] sm:$0xff]  }
 0x1c4   :  { %v1526_v25 = vpop.eup %1525  ;;  %v598_v38 = vadd.f32 %v1524_v46, %v1520_v45 }
 0x1c5   :  { %762 = vperm.xlu1 %1445, %v1510_v62   ;;  %v1528_v39 = vpop.eup %1527  ;;  %v1463_v62 = vld [vmem:[%s2026_s7 + $0x38] sm:$0xff]  }
 0x1c6   :  { %v599_v51 = vadd.f32 %v1528_v39, %v1522_v36  ;;  %1402 = vmatpush3.bf16.msra.mxu1 %v1456_v59  ;;  %1420 = vmatpush3.bf16.msra.mxu0 %v1463_v62 }
 0x1c7   :  { %774 = vperm.xlu0 %1446, %v1514_v4   ;;  %1403 = vmatprep.subr.bf16.mxu1 %v1571_v2  ;;  %v1461_v4 = vld [vmem:[%s2024_s5 + $0x8] sm:$0xff]  }
 0x1c8   :  { %v1530_v49 = vpop.eup %1529  ;;  %v607_v44 = vadd.f32 %v1526_v25, %v599_v51  ;;  %1421 = vmatprep.subr.bf16.mxu0 %v1571_v2 }
 0x1c9   :  { %874 = vperm.xlu1 %1445, %v1516_v16   ;;  %v606_v50 = vadd.f32 %v1530_v49, %v598_v38  ;;  %v1466_v16 = vld [vmem:[%s2026_s7 + $0x20] sm:$0xff]  }
 0x1ca   :  { %1404 = vmatpush3.bf16.msra.mxu1 %v1457_v60  ;;  %1422 = vmatpush3.bf16.msra.mxu0 %v1464_v3 }
 0x1cb   :  { %998 = vperm.xlu0 %1446, %v605_v35   ;;  %1405 = vmatprep.subr.bf16.mxu1 %v1571_v2 }
 0x1cc   :  { %1423 = vmatprep.subr.bf16.mxu0 %v1571_v2 }
 0x1cd   :  { %950 = vperm.xlu1 %1445, %v601_v7  }
 0x1ce   :  { %1406 = vmatpush3.bf16.msra.mxu1 %v1458_v43  ;;  %1424 = vmatpush3.bf16.msra.mxu0 %v1465_v6 }
 0x1cf   :  { %682 = vperm.xlu0 %1446, %v1520_v45   ;;  %1407 = vmatprep.subr.bf16.mxu1 %v1571_v2 }
 0x1d0   :  { %1425 = vmatprep.subr.bf16.mxu0 %v1571_v2 }
 0x1d1   :  { %962 = vperm.xlu1 %1445, %v602_v41  }
 0x1d2   :  { %1408 = vmatpush3.bf16.msra.mxu1 %v1459_v61  ;;  %1426 = vmatpush3.bf16.msra.mxu0 %v1466_v16 }
 0x1d3   :  { %886 = vperm.xlu0 %1446, %v1518_v37   ;;  %1409 = vmatprep.subr.bf16.mxu1 %v1571_v2 }
 0x1d4   :  { %1427 = vmatprep.subr.bf16.mxu0 %v1571_v2 }
 0x1d5   :  { %670 = vperm.xlu1 %1445, %v1512_v63   ;;  %v1460_v63 = vld [vmem:[%s2024_s5 + $0x10] sm:$0xff]  }
 0x1d6   :  { %1410 = vmatpush3.bf16.msra.mxu1 %v1460_v63  ;;  %1428 = vmatpush3.bf16.msra.mxu0 %v1467_v18 }
 0x1d7   :  { %798 = vperm.xlu0 %1446, %v1522_v36   ;;  %1411 = vmatprep.subr.bf16.mxu1 %v1571_v2  ;;  %v614_v36 = vunpack.c.l.s4 %v1575_v23 }
 0x1d8   :  { %1429 = vmatprep.subr.bf16.mxu0 %v1571_v2 }
 0x1d9   :  { %974 = vperm.xlu1 %1445, %v603_v24  }
 0x1da   :  { %1412 = vmatpush3.bf16.msra.mxu1 %v1461_v4  ;;  %1430 = vmatpush3.bf16.msra.mxu0 %v1468_v19 }
 0x1db   :  { %910 = vperm.xlu0 %1446, %v1526_v25   ;;  %1413 = vmatprep.subr.bf16.mxu1 %v1571_v2  ;;  %v615_v25 = vunpack.c.0.s8 %v614_v36 }
 0x1dc   :  { %1431 = vmatprep.subr.bf16.mxu0 %v1571_v2 }
 0x1dd   :  { %986 = vperm.xlu1 %1445, %v604_v42  }
 0x1de   :  { %1414 = vmatpush3.bf16.msra.mxu1 %v1462_v1 }
 0x1e1   :  { %786 = vperm.xlu1 %1445, %v1524_v46  }
 0x1e5   :  { %1010 = vperm.xlu1 %1445, %v606_v50  }
 0x1e9   :  { %1022 = vperm.xlu1 %1445, %v607_v44  }
 0x1ed   :  { %694 = vperm.xlu1 %1445, %v1528_v39  }
 0x1f1   :  { %898 = vperm.xlu1 %1445, %v1530_v49   ;;  %v1926_v49 = vsub.s32 %v615_v25, %v1665_v12 }
 0x224   :  { %v611_v9 = vpop.permute.xlu1 %610 }
 0x225   :  { %v619_v62 = vrot.slane %v611_v9, %v1926_v49 }
 0x226   :  { %v739_v30 = vpop.permute.xlu0 %738 }
 0x227   :  { %v747_v4 = vrot.slane %v739_v30, %v1926_v49 }
 0x228   :  { %v715_v22 = vpop.permute.xlu1 %714 }
 0x229   :  { %v723_v63 = vrot.slane %v715_v22, %v1926_v49 }
 0x22a   :  { %v839_v8 = vpop.permute.xlu0 %838 }
 0x22b   :  { %v847_v22 = vrot.slane %v839_v8, %v1926_v49 }
 0x22c   :  { %v827_v7 = vpop.permute.xlu1 %826 }
 0x22d   :  { %v835_v18 = vrot.slane %v827_v7, %v1926_v49 }
 0x22e   :  { %v1917_v40 = vpop.permute.xlu0 %850 }
 0x22f   :  { %v859_v7 = vrot.slane %v1917_v40, %v1926_v49  ;;  %v920_v8 = vmul.f32 %v835_v18, %v1771_v47 }
 0x230   :  { %v623_v37 = vpop.permute.xlu1 %622 }
 0x231   :  { %v631_v12 = vrot.slane %v623_v37, %v1926_v49  ;;  %v704_v37 = vmul.f32 %v619_v62, %v1658_v10 }
 0x232   :  { %v939_v35 = vpop.permute.xlu0 %938 }
 0x233   :  { %v947_v51 = vrot.slane %v939_v35, %v1926_v49  ;;  %v808_v35 = vmul.f32 %v723_v63, %v1710_v26 }
 0x234   :  { %v727_v5 = vpop.permute.xlu1 %726 }
 0x235   :  { %v735_v60 = vrot.slane %v727_v5, %v1926_v49  ;;  %v705_v5 = vmul.f32 %v631_v12, %v1663_v11 }
 0x236   :  { %v647_v41 = vpop.permute.xlu0 %646 }
 0x237   :  { %v809_v6 = vmul.f32 %v735_v60, %v1715_v27  ;;  %v655_v30 = vrot.slane %v647_v41, %v1926_v49 }
 0x238   :  { %v635_v0 = vpop.permute.xlu1 %634 }
 0x239   :  { %v643_v3 = vrot.slane %v635_v0, %v1926_v49  ;;  %v810_v0 = vmul.f32 %v747_v4, %v1720_v28  ;;  %v707_v47 = vmul.f32 %v655_v30, %v1675_v14 }
 0x23a   :  { %v1919_v45 = vpop.permute.xlu0 %658 }
 0x23b   :  { %v706_v27 = vmul.f32 %v643_v3, %v1670_v13  ;;  %v921_v13 = vmul.f32 %v847_v22, %v1776_v48  ;;  %v667_v28 = vrot.slane %v1919_v45, %v1926_v49 }
 0x23c   :  { %v751_v21 = vpop.permute.xlu1 %750 }
 0x23d   :  { %v759_v19 = vrot.slane %v751_v21, %v1926_v49  ;;  %v817_v21 = vadd.f32 %v809_v6, %v705_v5  ;;  %v818_v25 = vadd.f32 %v810_v0, %v706_v27  ;;  %v708_v60 = vmul.f32 %v667_v28, %v1680_v15 }
 0x23e   :  { %v863_v42 = vpop.permute.xlu0 %862 }
 0x23f   :  { %v811_v11 = vmul.f32 %v759_v19, %v1725_v29  ;;  %v871_v26 = vrot.slane %v863_v42, %v1926_v49  ;;  %v922_v42 = vmul.f32 %v859_v7, %v1784_v53 }
 0x240   :  { %v763_v20 = vpop.permute.xlu1 %762 }
 0x241   :  { %v771_v23 = vrot.slane %v763_v20, %v1926_v49 }
 0x242   :  { %v1923_v38 = vpop.permute.xlu0 %774 }
 0x243   :  { %v783_v48 = vrot.slane %v1923_v38, %v1926_v49 }
 0x244   :  { %v1921_v24 = vpop.permute.xlu1 %874 }
 0x245   :  { %v883_v40 = vrot.slane %v1921_v24, %v1926_v49  ;;  %v923_v24 = vmul.f32 %v871_v26, %v1789_v54  ;;  %v813_v63 = vmul.f32 %v783_v48, %v1738_v32  ;;  %v1548_v26 = vld [vmem:[%s2019_s0 + $0xc] sm:$0x3] }
 0x246   :  { %v999_v59 = vpop.permute.xlu0 %998 }
 0x247   :  { %v1007_v41 = vrot.slane %v999_v59, %v1926_v49  ;;  %v924_v53 = vmul.f32 %v883_v40, %v1794_v55 }
 0x248   :  { %v951_v46 = vpop.permute.xlu1 %950 }
 0x249   :  { %v959_v50 = vrot.slane %v951_v46, %v1926_v49  ;;  %v816_v46 = vadd.f32 %v808_v35, %v704_v37 }
 0x24a   :  { %v1939_v1 = vpop.permute.xlu0 %682 }
 0x24b   :  { %1531 = vrcp.f32 %v959_v50  ;;  %v812_v50 = vmul.f32 %v771_v23, %v1733_v31  ;;  %v928_v14 = vadd.f32 %v920_v8, %v816_v46  ;;  %v930_v31 = vadd.f32 %v922_v42, %v818_v25 }
 0x24c   :  { %v963_v39 = vpop.permute.xlu1 %962  ;;  %1533 = vrcp.f32 %v947_v51  ;;  %v691_v22 = vrot.slane %v1939_v1, %v1926_v49 }
 0x24d   :  { %v971_v52 = vrot.slane %v963_v39, %v1926_v49  ;;  %v929_v39 = vadd.f32 %v921_v13, %v817_v21  ;;  %v820_v12 = vadd.f32 %v812_v50, %v708_v60 }
 0x24e   :  { %v887_v36 = vpop.permute.xlu0 %886 }
 0x24f   :  { %1535 = vrcp.f32 %v971_v52  ;;  %v819_v52 = vadd.f32 %v811_v11, %v707_v47  ;;  %v895_v54 = vrot.slane %v887_v36, %v1926_v49  ;;  %v932_v55 = vadd.f32 %v924_v53, %v820_v12  ;;  %v1547_v11 = vld [vmem:[%s2019_s0 + $0xe] sm:$0x3]  ;;  %v1470_v12 = vld [vmem:[%s2026_s7] sm:$0xff]  }
 0x250   :  { %v671_v44 = vpop.permute.xlu1 %670 }
 0x251   :  { %v679_v20 = vrot.slane %v671_v44, %v1926_v49  ;;  %v931_v6 = vadd.f32 %v923_v24, %v819_v52  ;;  %v925_v5 = vmul.f32 %v895_v54, %v1799_v56 }
 0x252   :  { %v799_v3 = vpop.permute.xlu0 %798 }
 0x253   :  { %v807_v27 = vrot.slane %v799_v3, %v1926_v49 }
 0x254   :  { %v975_v43 = vpop.permute.xlu1 %974 }
 0x255   :  { %v983_v61 = vrot.slane %v975_v43, %v1926_v49  ;;  %v709_v43 = vmul.f32 %v679_v20, %v1685_v17  ;;  %v815_v40 = vmul.f32 %v807_v27, %v1748_v34 }
 0x256   :  { %v911_v23 = vpop.permute.xlu0 %910 }
 0x257   :  { %1537 = vrcp.f32 %v983_v61  ;;  %v821_v18 = vadd.f32 %v813_v63, %v709_v43  ;;  %v919_v36 = vrot.slane %v911_v23, %v1926_v49  ;;  %v1048_v43 = vld [vmem:[#allocation2] sm:$0x3] }
 0x258   :  { %v987_v16 = vpop.permute.xlu1 %986  ;;  %v1532_v29 = vpop.eup %1531  ;;  %v1324_v63 = vld [vmem:[%s2025_s6] ss:$0 sm:$0xff] }
 0x259   :  { %v995_v9 = vrot.slane %v987_v16, %v1926_v49  ;;  %v1534_v51 = vpop.eup %1533  ;;  %v1035_v61 = vmul.f32 %v1532_v29, %v929_v39  ;;  %v927_v48 = vmul.f32 %v919_v36, %v1809_v58 }
 0x25a   :  { %v1033_v62 = vmul.f32 %v1534_v51, %v928_v14 }
 0x25b   :  { %1539 = vrcp.f32 %v995_v9  ;;  %v1051_v17 = vsel %vm1049_vm1, %v1035_v61, 0.0 }
 0x25c   :  { %v787_v10 = vpop.permute.xlu1 %786  ;;  %1541 = vrcp.f32 %v1007_v41  ;;  %v1536_v59 = vpop.eup %1535  ;;  %v1050_v32 = vsel %vm1049_vm1, %v1033_v62, 0.0  ;;  %v710_v41 = vmul.f32 %v1548_v26, %v691_v22  ;;  %v1469_v62 = vld [vmem:[%s2026_s7 + $0x8] sm:$0xff]   ;;  %s1576_s7 = smov [#allocation4]  }
 0x25d   :  { %v1037_v16 = vmul.f32 %v1536_v59, %v930_v31  ;;  %v795_v9 = vrot.slane %v787_v10, %v1926_v49  ;;  %v1052_v21 = vadd.f32 %v1051_v17, %v1050_v32  ;;  %v933_v10 = vadd.f32 %v925_v5, %v821_v18  ;;  %1432 = vmatpush3.bf16.msra.mxu0 %v1469_v62  ;;  %v1333_v18 = vld [vmem:[%s2027_s8] ss:$0 sm:$0xff]  ;;  %s1305_s21 = sshll.u32 %s1576_s7, 4  ;;  %s1306_s21 = int_to_ptr.vmem [resolvable:$true] %s1305_s21 }
 0x25e   :  { %1433 = vmatprep.subr.bf16.mxu0 %v1571_v2  ;;  %s1549_s6 = scalar_lea.vmem %s1306_s21, 32  ;;  %p1554_p1 = scmp.lt.s32.totalorder %s1306_s21, %s1306_s21 }
 0x25f   :  { %v1053_v30 = vsel %vm1049_vm1, %v1037_v16, 0.0  ;;  %v814_v8 = vmul.f32 %v795_v9, %v1743_v33  ;;  %p1550_p0 = scmp.ne.s32.totalorder %s1306_s21, %s1549_s6  ;;  %p1555_p2 = scmp.lt.s32.totalorder %s1549_s6, %s1549_s6 }
 0x260   :  { %v1011_v45 = vpop.permute.xlu1 %1010  ;;  %v1054_v13 = vadd.f32 %v1053_v30, %v1052_v21 }
 0x261   :  { %v1019_v44 = vrot.slane %v1011_v45, %v1926_v49  ;;  %v822_v29 = vadd.f32 %v814_v8, %v710_v41  ;;  %1434 = vmatpush3.bf16.msra.mxu0 %v1470_v12  ;;  %p1556_p3 = por %p1555_p2, %p1554_p1 }
 0x263   :  { %1543 = vrcp.f32 %v1019_v44  ;;  %p1557_p4 = pnand %p1556_p3, %p1550_p0 }
 0x264   :  { %v1538_v38 = vpop.eup %1537  ;;  %v1023_v4 = vpop.permute.xlu1 %1022 }
 0x265   :  { %v1031_v15 = vrot.slane %v1023_v4, %v1926_v49  ;;  %v1039_v19 = vmul.f32 %v1538_v38, %v931_v6 }
 0x267   :  { %1545 = vrcp.f32 %v1031_v15  ;;  %v1055_v56 = vsel %vm1049_vm1, %v1039_v19, 0.0 }
 0x268   :  { %v1540_v37 = vpop.eup %1539  ;;  %v695_v35 = vpop.permute.xlu1 %694  ;;  %v1056_v47 = vadd.f32 %v1055_v56, %v1054_v13 }
 0x269   :  { %v1041_v0 = vmul.f32 %v1540_v37, %v932_v55  ;;  %v703_v7 = vrot.slane %v695_v35, %v1926_v49  ;;  %v1542_v46 = vpop.eup %1541 }
 0x26a   :  { %v1043_v25 = vmul.f32 %v1542_v46, %v933_v10 }
 0x26b   :  { %v711_v1 = vmul.f32 %v1547_v11, %v703_v7  ;;  %v1057_v33 = vsel %vm1049_vm1, %v1041_v0, 0.0 }
 0x26c   :  { %v899_v28 = vpop.permute.xlu1 %898  ;;  %v1058_v50 = vadd.f32 %v1057_v33, %v1056_v47  ;;  %v1059_v34 = vsel %vm1049_vm1, %v1043_v25, 0.0 }
 0x26d   :  { %v907_v20 = vrot.slane %v899_v28, %v1926_v49  ;;  %v823_v42 = vadd.f32 %v815_v40, %v711_v1 }
 0x26e   :  { %v1060_v59 = vadd.f32 %v1059_v34, %v1058_v50 }
 0x26f   :  { %v926_v39 = vmul.f32 %v907_v20, %v1804_v57  ;;  %v935_v52 = vadd.f32 %v927_v48, %v823_v42 }
 0x270   :  { %v1544_v51 = vpop.eup %1543 }
 0x271   :  { %v934_v45 = vadd.f32 %v926_v39, %v822_v29 }
 0x273   :  { %v1045_v24 = vmul.f32 %v1544_v51, %v934_v45 }
 0x274   :  { %v1546_v44 = vpop.eup %1545 }
 0x275   :  { %v1047_v14 = vmul.f32 %v1546_v44, %v935_v52  ;;  %v1061_v49 = vsel %vm1049_vm1, %v1045_v24, 0.0 }
 0x276   :  { %v1062_v60 = vadd.f32 %v1061_v49, %v1060_v59 }
 0x277   :  { %v1063_v53 = vsel %vm1049_vm1, %v1047_v14, 0.0 }
 0x278   :  { %v1064_v31 = vadd.f32 %v1063_v53, %v1062_v60 }
 0x27a   :  { %v1065_v57 = vadd.f32 %v1064_v31, %v1048_v43 }
 0x27c   :  { %1066 = vst [vmem:[#allocation2] sm:$0x3] %v1065_v57 }
 0x283   :  { %v1070_v61 = vld [vmem:[#allocation2] sm:$0x3] }
 0x284   :  { %v1071_v58 = vmul.f32 0.125, %v1070_v61 }
 0x286   :  { %v1072_v38 = vpack.c.bf16 %v1071_v58, %v1071_v58 }
 0x288   :  { %1416 = vmatmul.mubr.bf16.vlgmr.msra.gmra.mxu1 %v1072_v38 }
 0x348   :  { %v1178_v54 = vpop.f32.mrf.mxu1 }
 0x349   :  { %v1179_v3 = vadd.f32 %v1324_v63, %v1178_v54 }
 0x34a   :  { %v1417_v4 = vpop.f32.mrf.mxu1 }
 0x34b   :  { %v1184_v6 = vmax.f32 %v1179_v3, 0.0 }
 0x34c   :  { %v1181_v16 = vpop.f32.mrf.mxu1 }
 0x34d   :  { %v1185_v15 = vpack.c.bf16 %v1184_v6, %v1184_v6 }
 0x34e   :  { %v1418_v55 = vpop.f32.mrf.mxu1 }
 0x34f   :  { %1436 = vmatmul.mubr.bf16.vlgmr.msra.gmra.mxu0 %v1185_v15 }
 0x40f   :  { %v1291_v2 = vpop.f32.mrf.mxu0 }
 0x410   :  { %v1292_v17 = vadd.f32 %v1333_v18, %v1291_v2 }
 0x411   :  { %v1437_v19 = vpop.f32.mrf.mxu0 }
 0x412   :  { %1298 = vst.msk [vmem:[#allocation4] sm:$0x3] %vm1297_vm2, %v1292_v17 }
 0x413   :  { %v1294_v9 = vpop.f32.mrf.mxu0 }
 0x414   :  { %1560 = shalt.err (!%p1557_p4)
}
 0x415   :  { %1308 = dma.vmem_to_hbm [thread:$0]  %s1306_s21, 32, %s2028_s9, [#allocation5]   ;;  %v1438_v37 = vpop.f32.mrf.mxu0 }
 0x416   :  { %1569 = dma.done.wait [#allocation5], 32  }
 0x417   :  { %1570 = vsyncadd [#allocation5], 4294967264 }
 0x418   :  { %1312 = vsyncpa [#allocation5], 1 }

</bundles_post_ra>
